<compile_context>
chip_gen: v5e
topology: v5e:2x2
jax: 0.10.0
libtpu: 0.0.40
codegen_flags: <defaults>
</compile_context>

<pallas_src>
import functools

import jax
import jax.numpy as jnp
from jax.experimental import pallas as pl
from jax.experimental.pallas import tpu as pltpu

BN_EPS = 1e-5


def _round_up(x, m):
    return (x + m - 1) // m * m


def _vmem_cap_bytes():
    # ~75% of physical VMEM: 48 MiB on v7x (64 MiB), 96 MiB on v5e/v6e (128 MiB).
    try:
        return int(min(pltpu.get_tpu_info().vmem_capacity_bytes * 3 // 4, 100 << 20))
    except Exception:
        pass
    try:
        if "v7" in jax.devices()[0].device_kind.lower():
            return 48 << 20
    except Exception:
        pass
    return 96 << 20


def _conv_stats_kernel(x_ref, w_ref, y_ref, st_ref, *,
                       kd, kh, kw, Wp, Wo, Ho, Wa_pad, TD, Do, Dp):
    """One (n, depth-tile) step: TD conv depth-slabs + packed BN partial sums.

    x_ref : (1, Dp, Cin, Lp_pad)   bf16  padded input volume of batch n (resident)
    w_ref : (Cout, kd*kh*kw*Cin)   bf16  reshaped weights (resident, constant index)
    y_ref : (1, TD, Cout, Wa_pad)  bf16  conv output slabs, lane = ho*Wp + wo
    st_ref: (1, 1, 2*Cout, 1)      f32   per-channel [sum ; sum-of-squares]
    """
    gd = pl.program_id(1)
    Cout = y_ref.shape[2]
    Kf = kh * kw

    # Valid-output-column mask for the flattened (ho, wp) lane axis (in-kernel iota).
    col = jax.lax.broadcasted_iota(jnp.int32, (Cout, Wa_pad), 1)
    colmask = jnp.logical_and(col < Ho * Wp, col % Wp < Wo).astype(jnp.float32)

    w = w_ref[...]                                     # (Cout, K) bf16

    s1 = jnp.zeros((Cout, 1), jnp.float32)
    s2 = jnp.zeros((Cout, 1), jnp.float32)

    for td in range(TD):
        d = gd * TD + td
        # Build the K = kd*kh*kw*Cin RHS for this slab: every tap is a static
        # lane-offset slice of a resident depth plane.
        taps = []
        for a in range(kd):
            di = jnp.minimum(d + a, Dp - 1)            # clamp for padded tail slabs
            plane = x_ref[0, di]                       # (Cin, Lp_pad) bf16
            for t in range(Kf):
                b, c = divmod(t, kw)
                s = b * Wp + c
                taps.append(plane[:, s:s + Wa_pad])    # (Cin, Wa_pad)
        rhs = jnp.concatenate(taps, axis=0)            # (K, Wa_pad) bf16
        acc = jnp.dot(w, rhs, preferred_element_type=jnp.float32)  # (Cout, Wa_pad) f32
        y_ref[0, td] = acc.astype(y_ref.dtype)

        # BN partial sums from the f32 accumulator, masked to valid columns and
        # to valid (d < Do) slabs.
        valid = (d < Do).astype(jnp.float32)
        av = acc * colmask
        s1 = s1 + valid * jnp.sum(av, axis=1, keepdims=True)
        s2 = s2 + valid * jnp.sum(av * av, axis=1, keepdims=True)

    st_ref[0, 0] = jnp.concatenate([s1, s2], axis=0)   # (2*Cout, 1)


def _bn_relu_kernel(y_ref, scale_ref, shift_ref, o_ref):
    # y_ref: (1, TB, Cout, Wa_pad) bf16; scale/shift: (1, 1, Cout, 1) f32; o_ref f32
    y = y_ref[...].astype(jnp.float32)
    o_ref[...] = jnp.maximum(y * scale_ref[...] + shift_ref[...], 0.0)


def conv_bn_relu(x, weight, bias, gamma, beta, *, stride=1, padding=1):
    """x: (N, Cin, D, H, W) f32 -> (N, Cout, Do, Ho, Wo) f32.

    Conv3d (stride=1, dilation=1, groups=1) -> BatchNorm3d (training-mode batch
    statistics, eps=1e-5) -> ReLU.
    """
    assert stride == 1, "TODO(synk): stride > 1 not supported by the fused path"
    # The per-channel conv bias is exactly cancelled by the batch-statistics
    # mean subtraction of training-mode BatchNorm -> intentionally unused.
    del bias

    N, Cin, D, H, W = map(int, x.shape)
    Cout, Cin_w, kd, kh, kw = map(int, weight.shape)
    assert Cin_w == Cin
    p = int(padding)
    Dp, Hp, Wp = D + 2 * p, H + 2 * p, W + 2 * p
    Do, Ho, Wo = Dp - kd + 1, Hp - kh + 1, Wp - kw + 1

    Wa = Ho * Wp                                   # valid flattened-lane width
    Wa_pad = _round_up(Wa, 128)                    # lane-dense output width
    s_max = (kh - 1) * Wp + (kw - 1)               # largest tap lane offset
    Lp_pad = _round_up(max(Hp * Wp, s_max + Wa_pad), 128)

    # ---- layout prep (no im2col; ~1x input size, bf16) ----
    xp = jnp.pad(x, ((0, 0), (0, 0), (p, p), (p, p), (p, p)))       # (N,Cin,Dp,Hp,Wp)
    xp = xp.transpose(0, 2, 1, 3, 4).reshape(N, Dp, Cin, Hp * Wp)   # (N,Dp,Cin,Hp*Wp)
    xp = jnp.pad(xp, ((0, 0), (0, 0), (0, 0), (0, Lp_pad - Hp * Wp)))
    xp = xp.astype(jnp.bfloat16)                                    # (N,Dp,Cin,Lp_pad)

    # weights -> (Cout, kd*kh*kw*Cin), column order matches the in-kernel RHS rows
    Kred = kd * kh * kw * Cin
    wr = weight.transpose(0, 2, 3, 4, 1).reshape(Cout, Kred).astype(jnp.bfloat16)

    # ---- pass-1 tiling: TD depth-slabs per grid step ----
    y_slab_bytes = Cout * Wa_pad * 2
    TD = max(1, min(Do, 16, (4 << 20) // max(1, y_slab_bytes)))
    GD = pl.cdiv(Do, TD)
    Dy = GD * TD

    cap = _vmem_cap_bytes()
    p1_blk = (Dp * Cin * Lp_pad * 2            # resident input volume (bf16)
              + Cout * Kred * 2                # resident weights (bf16)
              + TD * Cout * Wa_pad * 2         # y block (bf16)
              + 2 * Cout * 4)                  # packed stats block
    p1_tmp = Kred * Wa_pad * 2 + Cout * Wa_pad * 4     # rhs + acc temporaries
    vmem_p1 = int(min(cap, max(32 << 20, 2 * p1_blk + p1_tmp + (8 << 20))))

    conv_kernel = functools.partial(
        _conv_stats_kernel, kd=kd, kh=kh, kw=kw, Wp=Wp, Wo=Wo, Ho=Ho,
        Wa_pad=Wa_pad, TD=TD, Do=Do, Dp=Dp)

    # ---- pass 1: implicit-GEMM conv (one K=108 dot per slab) + BN partials ----
    y, st = pl.pallas_call(
        conv_kernel,
        grid=(N, GD),
        in_specs=[
            pl.BlockSpec((1, Dp, Cin, Lp_pad), lambda n, g: (n, 0, 0, 0)),
            pl.BlockSpec((Cout, Kred), lambda n, g: (0, 0)),
        ],
        out_specs=[
            pl.BlockSpec((1, TD, Cout, Wa_pad), lambda n, g: (n, g, 0, 0)),
            pl.BlockSpec((1, 1, 2 * Cout, 1), lambda n, g: (n, g, 0, 0)),
        ],
        out_shape=(
            jax.ShapeDtypeStruct((N, Dy, Cout, Wa_pad), jnp.bfloat16),
            jax.ShapeDtypeStruct((N, GD, 2 * Cout, 1), jnp.float32),
        ),
        compiler_params=pltpu.CompilerParams(
            dimension_semantics=("parallel", "parallel"),
            vmem_limit_bytes=vmem_p1,
        ),
    )(xp, wr)

    # ---- tiny per-channel reduction of the partial sums (XLA) ----
    cnt = jnp.float32(N * Do * Ho * Wo)
    sum1 = jnp.sum(st[:, :, :Cout, 0], axis=(0, 1))            # (Cout,)
    sum2 = jnp.sum(st[:, :, Cout:, 0], axis=(0, 1))            # (Cout,)
    mean = sum1 / cnt
    var = jnp.maximum(sum2 / cnt - mean * mean, 0.0)           # biased batch variance
    scale_c = gamma.astype(jnp.float32) * jax.lax.rsqrt(var + BN_EPS)
    shift_c = beta.astype(jnp.float32) - mean * scale_c
    scale = scale_c.reshape(1, 1, Cout, 1)
    shift = shift_c.reshape(1, 1, Cout, 1)

    # ---- pass 2: fused BN-apply + ReLU (lane-dense elementwise) ----
    slab2_bytes = Cout * Wa_pad * (2 + 4)
    TB = max(1, min(Dy, (8 << 20) // max(1, slab2_bytes)))
    if N == 1:
        TB = max(1, min(TB, pl.cdiv(Dy, 2)))   # keep >= 2 grid steps for v7x megacore
    GB = pl.cdiv(Dy, TB)
    p2_blk = TB * Cout * Wa_pad * (2 + 4) + 2 * Cout * 4
    vmem_p2 = int(min(cap, max(32 << 20, 2 * p2_blk + (8 << 20))))

    out_p2 = pl.pallas_call(
        _bn_relu_kernel,
        grid=(N, GB),
        in_specs=[
            pl.BlockSpec((1, TB, Cout, Wa_pad), lambda n, g: (n, g, 0, 0)),
            pl.BlockSpec((1, 1, Cout, 1), lambda n, g: (0, 0, 0, 0)),
            pl.BlockSpec((1, 1, Cout, 1), lambda n, g: (0, 0, 0, 0)),
        ],
        out_specs=pl.BlockSpec((1, TB, Cout, Wa_pad), lambda n, g: (n, g, 0, 0)),
        out_shape=jax.ShapeDtypeStruct((N, Dy, Cout, Wa_pad), jnp.float32),
        compiler_params=pltpu.CompilerParams(
            dimension_semantics=("parallel", "parallel"),
            vmem_limit_bytes=vmem_p2,
        ),
    )(y, scale, shift)

    # ---- epilogue: crop padded depth/lanes, return PyTorch NCDHW layout ----
    out = out_p2[:, :Do, :, :Wa].reshape(N, Do, Cout, Ho, Wp)[..., :Wo]
    return out.transpose(0, 2, 1, 3, 4)                        # (N, Cout, Do, Ho, Wo)


def _reference(x, weight, bias, gamma, beta, *, stride=1, padding=1):
    y = jax.lax.conv_general_dilated(
        x, weight,
        window_strides=(stride,) * 3,
        padding=[(padding, padding)] * 3,
        dimension_numbers=("NCDHW", "OIDHW", "NCDHW"),
        precision=jax.lax.Precision.HIGHEST,
    )
    y = y + bias[None, :, None, None, None]
    mean = jnp.mean(y, axis=(0, 2, 3, 4), keepdims=True)
    var = jnp.mean((y - mean) ** 2, axis=(0, 2, 3, 4), keepdims=True)
    y = (y - mean) * jax.lax.rsqrt(var + BN_EPS)
    y = y * gamma[None, :, None, None, None] + beta[None, :, None, None, None]
    return jnp.maximum(y, 0.0)


if __name__ == "__main__":
    # ConvBnRelu(in_channels=4, out_channels=8, kernel_size=3, padding=1)
    N, Cin, Cout, D, H, W, K = 2, 4, 8, 8, 8, 8, 3
    key = jax.random.PRNGKey(0)
    kx, kw_, kb, kg, kbe = jax.random.split(key, 5)

    x = jax.random.normal(kx, (N, Cin, D, H, W), dtype=jnp.float32)
    weight = jax.random.normal(kw_, (Cout, Cin, K, K, K), dtype=jnp.float32) * 0.1
    bias = jax.random.normal(kb, (Cout,), dtype=jnp.float32) * 0.1
    gamma = 1.0 + 0.1 * jax.random.normal(kg, (Cout,), dtype=jnp.float32)
    beta = 0.1 * jax.random.normal(kbe, (Cout,), dtype=jnp.float32)

    fn = jax.jit(functools.partial(conv_bn_relu, stride=1, padding=1))
    out = jax.block_until_ready(fn(x, weight, bias, gamma, beta))

    ref = _reference(x, weight, bias, gamma, beta, stride=1, padding=1)
    assert out.shape == (N, Cout, D, H, W), out.shape
    err = float(jnp.max(jnp.abs(out - ref)))
    assert jnp.allclose(out, ref, atol=3e-2, rtol=3e-2), err

    print("KERNEL_OK")
</pallas_src>

<mosaic_0001>
module attributes {stable_mosaic.version = 11 : i64} {
  func.func @_conv_stats_kernel(%arg0: i32, %arg1: i32, %arg2: memref<1x10x4x256xbf16, #tpu.memory_space<vmem>>, %arg3: memref<8x108xbf16, #tpu.memory_space<vmem>>, %arg4: memref<1x8x8x128xbf16, #tpu.memory_space<vmem>>, %arg5: memref<1x1x16x1xf32, #tpu.memory_space<vmem>>) attributes {dimension_semantics = [#tpu.dimension_semantics<parallel>, #tpu.dimension_semantics<parallel>], iteration_bounds = array<i64: 2, 1>, scalar_prefetch = 0 : i64, scratch_operands = 0 : i64, tpu.core_type = #tpu.core_type<tc>, window_params = [{transform_indices = @transform_0, window_bounds = array<i64: 1, 10, 4, 256>}, {pipeline_mode = #tpu.pipeline_mode<synchronous>, transform_indices = @transform_1, window_bounds = array<i64: 8, 108>}, {transform_indices = @transform_2, window_bounds = array<i64: 1, 8, 8, 128>}, {transform_indices = @transform_3, window_bounds = array<i64: 1, 1, 16, 1>}]} {
    %0 = tpu.iota {dimensions = array<i32: 1>} : vector<8x128xi32>
    %c80_i32 = arith.constant 80 : i32
    %1 = vector.broadcast %c80_i32 : i32 to vector<8x128xi32>
    %2 = arith.cmpi slt, %0, %1 : vector<8x128xi32>
    %c10_i32 = arith.constant 10 : i32
    %c0_i32 = arith.constant 0 : i32
    %3 = arith.cmpi eq, %c10_i32, %c0_i32 : i32
    %c1_i32 = arith.constant 1 : i32
    %4 = arith.select %3, %c1_i32, %c10_i32 : i32
    %5 = vector.broadcast %4 : i32 to vector<8x128xi32>
    %6 = arith.remsi %0, %5 : vector<8x128xi32>
    %c0_i32_0 = arith.constant 0 : i32
    %7 = vector.broadcast %c0_i32_0 : i32 to vector<8x128xi32>
    %8 = arith.cmpi ne, %6, %7 : vector<8x128xi32>
    %c0_i32_1 = arith.constant 0 : i32
    %9 = vector.broadcast %c0_i32_1 : i32 to vector<8x128xi32>
    %10 = arith.cmpi slt, %6, %9 : vector<8x128xi32>
    %c0_i32_2 = arith.constant 0 : i32
    %11 = arith.cmpi slt, %4, %c0_i32_2 : i32
    %12 = vector.broadcast %11 : i1 to vector<8x128xi1>
    %13 = vector.broadcast %12 : vector<8x128xi1> to vector<8x128xi1>
    %14 = arith.xori %10, %13 : vector<8x128xi1>
    %15 = arith.andi %14, %8 : vector<8x128xi1>
    %16 = vector.broadcast %4 : i32 to vector<8x128xi32>
    %17 = arith.addi %6, %16 : vector<8x128xi32>
    %18 = arith.select %15, %17, %6 : vector<8x128xi1>, vector<8x128xi32>
    %c8_i32 = arith.constant 8 : i32
    %19 = vector.broadcast %c8_i32 : i32 to vector<8x128xi32>
    %20 = arith.cmpi slt, %18, %19 : vector<8x128xi32>
    %21 = arith.andi %2, %20 : vector<8x128xi1>
    %22 = arith.extui %21 : vector<8x128xi1> to vector<8x128xi32>
    %23 = arith.sitofp %22 : vector<8x128xi32> to vector<8x128xf32>
    %c0 = arith.constant 0 : index
    %c0_3 = arith.constant 0 : index
    %24 = vector.load %arg3[%c0, %c0_3] : memref<8x108xbf16, #tpu.memory_space<vmem>>, vector<8x108xbf16>
    %cst = arith.constant 0.000000e+00 : f32
    %25 = vector.broadcast %cst : f32 to vector<8x1xf32>
    %cst_4 = arith.constant 0.000000e+00 : f32
    %26 = vector.broadcast %cst_4 : f32 to vector<8x1xf32>
    %c8_i32_5 = arith.constant 8 : i32
    %27 = arith.muli %arg1, %c8_i32_5 : i32
    %c0_i32_6 = arith.constant 0 : i32
    %28 = arith.addi %27, %c0_i32_6 : i32
    %c0_i32_7 = arith.constant 0 : i32
    %29 = arith.addi %28, %c0_i32_7 : i32
    %c9_i32 = arith.constant 9 : i32
    %30 = arith.minsi %29, %c9_i32 : i32
    %c0_8 = arith.constant 0 : index
    %31 = arith.index_cast %30 : i32 to index
    %c0_9 = arith.constant 0 : index
    %c0_10 = arith.constant 0 : index
    %32 = vector.load %arg2[%c0_8, %31, %c0_9, %c0_10] : memref<1x10x4x256xbf16, #tpu.memory_space<vmem>>, vector<1x1x4x256xbf16>
    %33 = vector.shape_cast %32 : vector<1x1x4x256xbf16> to vector<4x256xbf16>
    %34 = vector.extract_strided_slice %33 {offsets = [0, 0], sizes = [4, 128], strides = [1, 1]} : vector<4x256xbf16> to vector<4x128xbf16>
    %35 = vector.extract_strided_slice %33 {offsets = [0, 1], sizes = [4, 128], strides = [1, 1]} : vector<4x256xbf16> to vector<4x128xbf16>
    %36 = vector.extract_strided_slice %33 {offsets = [0, 2], sizes = [4, 128], strides = [1, 1]} : vector<4x256xbf16> to vector<4x128xbf16>
    %37 = vector.extract_strided_slice %33 {offsets = [0, 10], sizes = [4, 128], strides = [1, 1]} : vector<4x256xbf16> to vector<4x128xbf16>
    %38 = vector.extract_strided_slice %33 {offsets = [0, 11], sizes = [4, 128], strides = [1, 1]} : vector<4x256xbf16> to vector<4x128xbf16>
    %39 = vector.extract_strided_slice %33 {offsets = [0, 12], sizes = [4, 128], strides = [1, 1]} : vector<4x256xbf16> to vector<4x128xbf16>
    %40 = vector.extract_strided_slice %33 {offsets = [0, 20], sizes = [4, 128], strides = [1, 1]} : vector<4x256xbf16> to vector<4x128xbf16>
    %41 = vector.extract_strided_slice %33 {offsets = [0, 21], sizes = [4, 128], strides = [1, 1]} : vector<4x256xbf16> to vector<4x128xbf16>
    %42 = vector.extract_strided_slice %33 {offsets = [0, 22], sizes = [4, 128], strides = [1, 1]} : vector<4x256xbf16> to vector<4x128xbf16>
    %c1_i32_11 = arith.constant 1 : i32
    %43 = arith.addi %28, %c1_i32_11 : i32
    %c9_i32_12 = arith.constant 9 : i32
    %44 = arith.minsi %43, %c9_i32_12 : i32
    %c0_13 = arith.constant 0 : index
    %45 = arith.index_cast %44 : i32 to index
    %c0_14 = arith.constant 0 : index
    %c0_15 = arith.constant 0 : index
    %46 = vector.load %arg2[%c0_13, %45, %c0_14, %c0_15] : memref<1x10x4x256xbf16, #tpu.memory_space<vmem>>, vector<1x1x4x256xbf16>
    %47 = vector.shape_cast %46 : vector<1x1x4x256xbf16> to vector<4x256xbf16>
    %48 = vector.extract_strided_slice %47 {offsets = [0, 0], sizes = [4, 128], strides = [1, 1]} : vector<4x256xbf16> to vector<4x128xbf16>
    %49 = vector.extract_strided_slice %47 {offsets = [0, 1], sizes = [4, 128], strides = [1, 1]} : vector<4x256xbf16> to vector<4x128xbf16>
    %50 = vector.extract_strided_slice %47 {offsets = [0, 2], sizes = [4, 128], strides = [1, 1]} : vector<4x256xbf16> to vector<4x128xbf16>
    %51 = vector.extract_strided_slice %47 {offsets = [0, 10], sizes = [4, 128], strides = [1, 1]} : vector<4x256xbf16> to vector<4x128xbf16>
    %52 = vector.extract_strided_slice %47 {offsets = [0, 11], sizes = [4, 128], strides = [1, 1]} : vector<4x256xbf16> to vector<4x128xbf16>
    %53 = vector.extract_strided_slice %47 {offsets = [0, 12], sizes = [4, 128], strides = [1, 1]} : vector<4x256xbf16> to vector<4x128xbf16>
    %54 = vector.extract_strided_slice %47 {offsets = [0, 20], sizes = [4, 128], strides = [1, 1]} : vector<4x256xbf16> to vector<4x128xbf16>
    %55 = vector.extract_strided_slice %47 {offsets = [0, 21], sizes = [4, 128], strides = [1, 1]} : vector<4x256xbf16> to vector<4x128xbf16>
    %56 = vector.extract_strided_slice %47 {offsets = [0, 22], sizes = [4, 128], strides = [1, 1]} : vector<4x256xbf16> to vector<4x128xbf16>
    %c2_i32 = arith.constant 2 : i32
    %57 = arith.addi %28, %c2_i32 : i32
    %c9_i32_16 = arith.constant 9 : i32
    %58 = arith.minsi %57, %c9_i32_16 : i32
    %c0_17 = arith.constant 0 : index
    %59 = arith.index_cast %58 : i32 to index
    %c0_18 = arith.constant 0 : index
    %c0_19 = arith.constant 0 : index
    %60 = vector.load %arg2[%c0_17, %59, %c0_18, %c0_19] : memref<1x10x4x256xbf16, #tpu.memory_space<vmem>>, vector<1x1x4x256xbf16>
    %61 = vector.shape_cast %60 : vector<1x1x4x256xbf16> to vector<4x256xbf16>
    %62 = vector.extract_strided_slice %61 {offsets = [0, 0], sizes = [4, 128], strides = [1, 1]} : vector<4x256xbf16> to vector<4x128xbf16>
    %63 = vector.extract_strided_slice %61 {offsets = [0, 1], sizes = [4, 128], strides = [1, 1]} : vector<4x256xbf16> to vector<4x128xbf16>
    %64 = vector.extract_strided_slice %61 {offsets = [0, 2], sizes = [4, 128], strides = [1, 1]} : vector<4x256xbf16> to vector<4x128xbf16>
    %65 = vector.extract_strided_slice %61 {offsets = [0, 10], sizes = [4, 128], strides = [1, 1]} : vector<4x256xbf16> to vector<4x128xbf16>
    %66 = vector.extract_strided_slice %61 {offsets = [0, 11], sizes = [4, 128], strides = [1, 1]} : vector<4x256xbf16> to vector<4x128xbf16>
    %67 = vector.extract_strided_slice %61 {offsets = [0, 12], sizes = [4, 128], strides = [1, 1]} : vector<4x256xbf16> to vector<4x128xbf16>
    %68 = vector.extract_strided_slice %61 {offsets = [0, 20], sizes = [4, 128], strides = [1, 1]} : vector<4x256xbf16> to vector<4x128xbf16>
    %69 = vector.extract_strided_slice %61 {offsets = [0, 21], sizes = [4, 128], strides = [1, 1]} : vector<4x256xbf16> to vector<4x128xbf16>
    %70 = vector.extract_strided_slice %61 {offsets = [0, 22], sizes = [4, 128], strides = [1, 1]} : vector<4x256xbf16> to vector<4x128xbf16>
    %71 = tpu.concatenate %34, %35, %36, %37, %38, %39, %40, %41, %42, %48, %49, %50, %51, %52, %53, %54 in 0 : vector<4x128xbf16>, vector<4x128xbf16>, vector<4x128xbf16>, vector<4x128xbf16>, vector<4x128xbf16>, vector<4x128xbf16>, vector<4x128xbf16>, vector<4x128xbf16>, vector<4x128xbf16>, vector<4x128xbf16>, vector<4x128xbf16>, vector<4x128xbf16>, vector<4x128xbf16>, vector<4x128xbf16>, vector<4x128xbf16>, vector<4x128xbf16> -> vector<64x128xbf16>
    %72 = tpu.concatenate %55, %56, %62, %63, %64, %65, %66, %67, %68, %69, %70 in 0 : vector<4x128xbf16>, vector<4x128xbf16>, vector<4x128xbf16>, vector<4x128xbf16>, vector<4x128xbf16>, vector<4x128xbf16>, vector<4x128xbf16>, vector<4x128xbf16>, vector<4x128xbf16>, vector<4x128xbf16>, vector<4x128xbf16> -> vector<44x128xbf16>
    %73 = tpu.concatenate %71, %72 in 0 : vector<64x128xbf16>, vector<44x128xbf16> -> vector<108x128xbf16>
    %cst_20 = arith.constant dense<0.000000e+00> : vector<8x128xf32>
    %74 = tpu.matmul %24, %73, %cst_20 {dimension_numbers = #tpu.dot_dimension_numbers<[1], [0], [0], [1], [0, 0, 1, 1], [], []>} : vector<8x108xbf16>, vector<108x128xbf16>, vector<8x128xf32> -> vector<8x128xf32>
    %75 = arith.truncf %74 : vector<8x128xf32> to vector<8x128xbf16>
    %c0_21 = arith.constant 0 : index
    %c0_22 = arith.constant 0 : index
    %c0_23 = arith.constant 0 : index
    %c0_24 = arith.constant 0 : index
    %76 = vector.load %arg4[%c0_21, %c0_22, %c0_23, %c0_24] : memref<1x8x8x128xbf16, #tpu.memory_space<vmem>>, vector<1x1x8x128xbf16>
    %77 = vector.shape_cast %76 : vector<1x1x8x128xbf16> to vector<8x128xbf16>
    %78 = vector.shape_cast %75 : vector<8x128xbf16> to vector<1x1x8x128xbf16>
    tpu.vector_store %arg4[%c0_21, %c0_22, %c0_23, %c0_24], %78 {strides = array<i32>} : memref<1x8x8x128xbf16, #tpu.memory_space<vmem>>, vector<1x1x8x128xbf16>,
    %c8_i32_25 = arith.constant 8 : i32
    %79 = arith.cmpi slt, %28, %c8_i32_25 : i32
    %80 = arith.extui %79 : i1 to i32
    %81 = arith.sitofp %80 : i32 to f32
    %82 = arith.mulf %74, %23 : vector<8x128xf32>
    %cst_26 = arith.constant dense<0.000000e+00> : vector<8xf32>
    %83 = vector.multi_reduction <add>, %82, %cst_26 [1] : vector<8x128xf32> to vector<8xf32>
    %84 = vector.shape_cast %83 : vector<8xf32> to vector<8x1xf32>
    %85 = vector.broadcast %81 : f32 to vector<8x1xf32>
    %86 = arith.mulf %85, %84 : vector<8x1xf32>
    %87 = arith.addf %25, %86 : vector<8x1xf32>
    %88 = arith.mulf %82, %82 : vector<8x128xf32>
    %cst_27 = arith.constant dense<0.000000e+00> : vector<8xf32>
    %89 = vector.multi_reduction <add>, %88, %cst_27 [1] : vector<8x128xf32> to vector<8xf32>
    %90 = vector.shape_cast %89 : vector<8xf32> to vector<8x1xf32>
    %91 = vector.broadcast %81 : f32 to vector<8x1xf32>
    %92 = arith.mulf %91, %90 : vector<8x1xf32>
    %93 = arith.addf %26, %92 : vector<8x1xf32>
    %c8_i32_28 = arith.constant 8 : i32
    %94 = arith.muli %arg1, %c8_i32_28 : i32
    %c1_i32_29 = arith.constant 1 : i32
    %95 = arith.addi %94, %c1_i32_29 : i32
    %c0_i32_30 = arith.constant 0 : i32
    %96 = arith.addi %95, %c0_i32_30 : i32
    %c9_i32_31 = arith.constant 9 : i32
    %97 = arith.minsi %96, %c9_i32_31 : i32
    %c0_32 = arith.constant 0 : index
    %98 = arith.index_cast %97 : i32 to index
    %c0_33 = arith.constant 0 : index
    %c0_34 = arith.constant 0 : index
    %99 = vector.load %arg2[%c0_32, %98, %c0_33, %c0_34] : memref<1x10x4x256xbf16, #tpu.memory_space<vmem>>, vector<1x1x4x256xbf16>
    %100 = vector.shape_cast %99 : vector<1x1x4x256xbf16> to vector<4x256xbf16>
    %101 = vector.extract_strided_slice %100 {offsets = [0, 0], sizes = [4, 128], strides = [1, 1]} : vector<4x256xbf16> to vector<4x128xbf16>
    %102 = vector.extract_strided_slice %100 {offsets = [0, 1], sizes = [4, 128], strides = [1, 1]} : vector<4x256xbf16> to vector<4x128xbf16>
    %103 = vector.extract_strided_slice %100 {offsets = [0, 2], sizes = [4, 128], strides = [1, 1]} : vector<4x256xbf16> to vector<4x128xbf16>
    %104 = vector.extract_strided_slice %100 {offsets = [0, 10], sizes = [4, 128], strides = [1, 1]} : vector<4x256xbf16> to vector<4x128xbf16>
    %105 = vector.extract_strided_slice %100 {offsets = [0, 11], sizes = [4, 128], strides = [1, 1]} : vector<4x256xbf16> to vector<4x128xbf16>
    %106 = vector.extract_strided_slice %100 {offsets = [0, 12], sizes = [4, 128], strides = [1, 1]} : vector<4x256xbf16> to vector<4x128xbf16>
    %107 = vector.extract_strided_slice %100 {offsets = [0, 20], sizes = [4, 128], strides = [1, 1]} : vector<4x256xbf16> to vector<4x128xbf16>
    %108 = vector.extract_strided_slice %100 {offsets = [0, 21], sizes = [4, 128], strides = [1, 1]} : vector<4x256xbf16> to vector<4x128xbf16>
    %109 = vector.extract_strided_slice %100 {offsets = [0, 22], sizes = [4, 128], strides = [1, 1]} : vector<4x256xbf16> to vector<4x128xbf16>
    %c1_i32_35 = arith.constant 1 : i32
    %110 = arith.addi %95, %c1_i32_35 : i32
    %c9_i32_36 = arith.constant 9 : i32
    %111 = arith.minsi %110, %c9_i32_36 : i32
    %c0_37 = arith.constant 0 : index
    %112 = arith.index_cast %111 : i32 to index
    %c0_38 = arith.constant 0 : index
    %c0_39 = arith.constant 0 : index
    %113 = vector.load %arg2[%c0_37, %112, %c0_38, %c0_39] : memref<1x10x4x256xbf16, #tpu.memory_space<vmem>>, vector<1x1x4x256xbf16>
    %114 = vector.shape_cast %113 : vector<1x1x4x256xbf16> to vector<4x256xbf16>
    %115 = vector.extract_strided_slice %114 {offsets = [0, 0], sizes = [4, 128], strides = [1, 1]} : vector<4x256xbf16> to vector<4x128xbf16>
    %116 = vector.extract_strided_slice %114 {offsets = [0, 1], sizes = [4, 128], strides = [1, 1]} : vector<4x256xbf16> to vector<4x128xbf16>
    %117 = vector.extract_strided_slice %114 {offsets = [0, 2], sizes = [4, 128], strides = [1, 1]} : vector<4x256xbf16> to vector<4x128xbf16>
    %118 = vector.extract_strided_slice %114 {offsets = [0, 10], sizes = [4, 128], strides = [1, 1]} : vector<4x256xbf16> to vector<4x128xbf16>
    %119 = vector.extract_strided_slice %114 {offsets = [0, 11], sizes = [4, 128], strides = [1, 1]} : vector<4x256xbf16> to vector<4x128xbf16>
    %120 = vector.extract_strided_slice %114 {offsets = [0, 12], sizes = [4, 128], strides = [1, 1]} : vector<4x256xbf16> to vector<4x128xbf16>
    %121 = vector.extract_strided_slice %114 {offsets = [0, 20], sizes = [4, 128], strides = [1, 1]} : vector<4x256xbf16> to vector<4x128xbf16>
    %122 = vector.extract_strided_slice %114 {offsets = [0, 21], sizes = [4, 128], strides = [1, 1]} : vector<4x256xbf16> to vector<4x128xbf16>
    %123 = vector.extract_strided_slice %114 {offsets = [0, 22], sizes = [4, 128], strides = [1, 1]} : vector<4x256xbf16> to vector<4x128xbf16>
    %c2_i32_40 = arith.constant 2 : i32
    %124 = arith.addi %95, %c2_i32_40 : i32
    %c9_i32_41 = arith.constant 9 : i32
    %125 = arith.minsi %124, %c9_i32_41 : i32
    %c0_42 = arith.constant 0 : index
    %126 = arith.index_cast %125 : i32 to index
    %c0_43 = arith.constant 0 : index
    %c0_44 = arith.constant 0 : index
    %127 = vector.load %arg2[%c0_42, %126, %c0_43, %c0_44] : memref<1x10x4x256xbf16, #tpu.memory_space<vmem>>, vector<1x1x4x256xbf16>
    %128 = vector.shape_cast %127 : vector<1x1x4x256xbf16> to vector<4x256xbf16>
    %129 = vector.extract_strided_slice %128 {offsets = [0, 0], sizes = [4, 128], strides = [1, 1]} : vector<4x256xbf16> to vector<4x128xbf16>
    %130 = vector.extract_strided_slice %128 {offsets = [0, 1], sizes = [4, 128], strides = [1, 1]} : vector<4x256xbf16> to vector<4x128xbf16>
    %131 = vector.extract_strided_slice %128 {offsets = [0, 2], sizes = [4, 128], strides = [1, 1]} : vector<4x256xbf16> to vector<4x128xbf16>
    %132 = vector.extract_strided_slice %128 {offsets = [0, 10], sizes = [4, 128], strides = [1, 1]} : vector<4x256xbf16> to vector<4x128xbf16>
    %133 = vector.extract_strided_slice %128 {offsets = [0, 11], sizes = [4, 128], strides = [1, 1]} : vector<4x256xbf16> to vector<4x128xbf16>
    %134 = vector.extract_strided_slice %128 {offsets = [0, 12], sizes = [4, 128], strides = [1, 1]} : vector<4x256xbf16> to vector<4x128xbf16>
    %135 = vector.extract_strided_slice %128 {offsets = [0, 20], sizes = [4, 128], strides = [1, 1]} : vector<4x256xbf16> to vector<4x128xbf16>
    %136 = vector.extract_strided_slice %128 {offsets = [0, 21], sizes = [4, 128], strides = [1, 1]} : vector<4x256xbf16> to vector<4x128xbf16>
    %137 = vector.extract_strided_slice %128 {offsets = [0, 22], sizes = [4, 128], strides = [1, 1]} : vector<4x256xbf16> to vector<4x128xbf16>
    %138 = tpu.concatenate %101, %102, %103, %104, %105, %106, %107, %108, %109, %115, %116, %117, %118, %119, %120, %121 in 0 : vector<4x128xbf16>, vector<4x128xbf16>, vector<4x128xbf16>, vector<4x128xbf16>, vector<4x128xbf16>, vector<4x128xbf16>, vector<4x128xbf16>, vector<4x128xbf16>, vector<4x128xbf16>, vector<4x128xbf16>, vector<4x128xbf16>, vector<4x128xbf16>, vector<4x128xbf16>, vector<4x128xbf16>, vector<4x128xbf16>, vector<4x128xbf16> -> vector<64x128xbf16>
    %139 = tpu.concatenate %122, %123, %129, %130, %131, %132, %133, %134, %135, %136, %137 in 0 : vector<4x128xbf16>, vector<4x128xbf16>, vector<4x128xbf16>, vector<4x128xbf16>, vector<4x128xbf16>, vector<4x128xbf16>, vector<4x128xbf16>, vector<4x128xbf16>, vector<4x128xbf16>, vector<4x128xbf16>, vector<4x128xbf16> -> vector<44x128xbf16>
    %140 = tpu.concatenate %138, %139 in 0 : vector<64x128xbf16>, vector<44x128xbf16> -> vector<108x128xbf16>
    %cst_45 = arith.constant dense<0.000000e+00> : vector<8x128xf32>
    %141 = tpu.matmul %24, %140, %cst_45 {dimension_numbers = #tpu.dot_dimension_numbers<[1], [0], [0], [1], [0, 0, 1, 1], [], []>} : vector<8x108xbf16>, vector<108x128xbf16>, vector<8x128xf32> -> vector<8x128xf32>
    %142 = arith.truncf %141 : vector<8x128xf32> to vector<8x128xbf16>
    %c0_46 = arith.constant 0 : index
    %c1 = arith.constant 1 : index
    %c0_47 = arith.constant 0 : index
    %c0_48 = arith.constant 0 : index
    %143 = vector.load %arg4[%c0_46, %c1, %c0_47, %c0_48] : memref<1x8x8x128xbf16, #tpu.memory_space<vmem>>, vector<1x1x8x128xbf16>
    %144 = vector.shape_cast %143 : vector<1x1x8x128xbf16> to vector<8x128xbf16>
    %145 = vector.shape_cast %142 : vector<8x128xbf16> to vector<1x1x8x128xbf16>
    tpu.vector_store %arg4[%c0_46, %c1, %c0_47, %c0_48], %145 {strides = array<i32>} : memref<1x8x8x128xbf16, #tpu.memory_space<vmem>>, vector<1x1x8x128xbf16>,
    %c8_i32_49 = arith.constant 8 : i32
    %146 = arith.cmpi slt, %95, %c8_i32_49 : i32
    %147 = arith.extui %146 : i1 to i32
    %148 = arith.sitofp %147 : i32 to f32
    %149 = arith.mulf %141, %23 : vector<8x128xf32>
    %cst_50 = arith.constant dense<0.000000e+00> : vector<8xf32>
    %150 = vector.multi_reduction <add>, %149, %cst_50 [1] : vector<8x128xf32> to vector<8xf32>
    %151 = vector.shape_cast %150 : vector<8xf32> to vector<8x1xf32>
    %152 = vector.broadcast %148 : f32 to vector<8x1xf32>
    %153 = arith.mulf %152, %151 : vector<8x1xf32>
    %154 = arith.addf %87, %153 : vector<8x1xf32>
    %155 = arith.mulf %149, %149 : vector<8x128xf32>
    %cst_51 = arith.constant dense<0.000000e+00> : vector<8xf32>
    %156 = vector.multi_reduction <add>, %155, %cst_51 [1] : vector<8x128xf32> to vector<8xf32>
    %157 = vector.shape_cast %156 : vector<8xf32> to vector<8x1xf32>
    %158 = vector.broadcast %148 : f32 to vector<8x1xf32>
    %159 = arith.mulf %158, %157 : vector<8x1xf32>
    %160 = arith.addf %93, %159 : vector<8x1xf32>
    %c8_i32_52 = arith.constant 8 : i32
    %161 = arith.muli %arg1, %c8_i32_52 : i32
    %c2_i32_53 = arith.constant 2 : i32
    %162 = arith.addi %161, %c2_i32_53 : i32
    %c0_i32_54 = arith.constant 0 : i32
    %163 = arith.addi %162, %c0_i32_54 : i32
    %c9_i32_55 = arith.constant 9 : i32
    %164 = arith.minsi %163, %c9_i32_55 : i32
    %c0_56 = arith.constant 0 : index
    %165 = arith.index_cast %164 : i32 to index
    %c0_57 = arith.constant 0 : index
    %c0_58 = arith.constant 0 : index
    %166 = vector.load %arg2[%c0_56, %165, %c0_57, %c0_58] : memref<1x10x4x256xbf16, #tpu.memory_space<vmem>>, vector<1x1x4x256xbf16>
    %167 = vector.shape_cast %166 : vector<1x1x4x256xbf16> to vector<4x256xbf16>
    %168 = vector.extract_strided_slice %167 {offsets = [0, 0], sizes = [4, 128], strides = [1, 1]} : vector<4x256xbf16> to vector<4x128xbf16>
    %169 = vector.extract_strided_slice %167 {offsets = [0, 1], sizes = [4, 128], strides = [1, 1]} : vector<4x256xbf16> to vector<4x128xbf16>
    %170 = vector.extract_strided_slice %167 {offsets = [0, 2], sizes = [4, 128], strides = [1, 1]} : vector<4x256xbf16> to vector<4x128xbf16>
    %171 = vector.extract_strided_slice %167 {offsets = [0, 10], sizes = [4, 128], strides = [1, 1]} : vector<4x256xbf16> to vector<4x128xbf16>
    %172 = vector.extract_strided_slice %167 {offsets = [0, 11], sizes = [4, 128], strides = [1, 1]} : vector<4x256xbf16> to vector<4x128xbf16>
    %173 = vector.extract_strided_slice %167 {offsets = [0, 12], sizes = [4, 128], strides = [1, 1]} : vector<4x256xbf16> to vector<4x128xbf16>
    %174 = vector.extract_strided_slice %167 {offsets = [0, 20], sizes = [4, 128], strides = [1, 1]} : vector<4x256xbf16> to vector<4x128xbf16>
    %175 = vector.extract_strided_slice %167 {offsets = [0, 21], sizes = [4, 128], strides = [1, 1]} : vector<4x256xbf16> to vector<4x128xbf16>
    %176 = vector.extract_strided_slice %167 {offsets = [0, 22], sizes = [4, 128], strides = [1, 1]} : vector<4x256xbf16> to vector<4x128xbf16>
    %c1_i32_59 = arith.constant 1 : i32
    %177 = arith.addi %162, %c1_i32_59 : i32
    %c9_i32_60 = arith.constant 9 : i32
    %178 = arith.minsi %177, %c9_i32_60 : i32
    %c0_61 = arith.constant 0 : index
    %179 = arith.index_cast %178 : i32 to index
    %c0_62 = arith.constant 0 : index
    %c0_63 = arith.constant 0 : index
    %180 = vector.load %arg2[%c0_61, %179, %c0_62, %c0_63] : memref<1x10x4x256xbf16, #tpu.memory_space<vmem>>, vector<1x1x4x256xbf16>
    %181 = vector.shape_cast %180 : vector<1x1x4x256xbf16> to vector<4x256xbf16>
    %182 = vector.extract_strided_slice %181 {offsets = [0, 0], sizes = [4, 128], strides = [1, 1]} : vector<4x256xbf16> to vector<4x128xbf16>
    %183 = vector.extract_strided_slice %181 {offsets = [0, 1], sizes = [4, 128], strides = [1, 1]} : vector<4x256xbf16> to vector<4x128xbf16>
    %184 = vector.extract_strided_slice %181 {offsets = [0, 2], sizes = [4, 128], strides = [1, 1]} : vector<4x256xbf16> to vector<4x128xbf16>
    %185 = vector.extract_strided_slice %181 {offsets = [0, 10], sizes = [4, 128], strides = [1, 1]} : vector<4x256xbf16> to vector<4x128xbf16>
    %186 = vector.extract_strided_slice %181 {offsets = [0, 11], sizes = [4, 128], strides = [1, 1]} : vector<4x256xbf16> to vector<4x128xbf16>
    %187 = vector.extract_strided_slice %181 {offsets = [0, 12], sizes = [4, 128], strides = [1, 1]} : vector<4x256xbf16> to vector<4x128xbf16>
    %188 = vector.extract_strided_slice %181 {offsets = [0, 20], sizes = [4, 128], strides = [1, 1]} : vector<4x256xbf16> to vector<4x128xbf16>
    %189 = vector.extract_strided_slice %181 {offsets = [0, 21], sizes = [4, 128], strides = [1, 1]} : vector<4x256xbf16> to vector<4x128xbf16>
    %190 = vector.extract_strided_slice %181 {offsets = [0, 22], sizes = [4, 128], strides = [1, 1]} : vector<4x256xbf16> to vector<4x128xbf16>
    %c2_i32_64 = arith.constant 2 : i32
    %191 = arith.addi %162, %c2_i32_64 : i32
    %c9_i32_65 = arith.constant 9 : i32
    %192 = arith.minsi %191, %c9_i32_65 : i32
    %c0_66 = arith.constant 0 : index
    %193 = arith.index_cast %192 : i32 to index
    %c0_67 = arith.constant 0 : index
    %c0_68 = arith.constant 0 : index
    %194 = vector.load %arg2[%c0_66, %193, %c0_67, %c0_68] : memref<1x10x4x256xbf16, #tpu.memory_space<vmem>>, vector<1x1x4x256xbf16>
    %195 = vector.shape_cast %194 : vector<1x1x4x256xbf16> to vector<4x256xbf16>
    %196 = vector.extract_strided_slice %195 {offsets = [0, 0], sizes = [4, 128], strides = [1, 1]} : vector<4x256xbf16> to vector<4x128xbf16>
    %197 = vector.extract_strided_slice %195 {offsets = [0, 1], sizes = [4, 128], strides = [1, 1]} : vector<4x256xbf16> to vector<4x128xbf16>
    %198 = vector.extract_strided_slice %195 {offsets = [0, 2], sizes = [4, 128], strides = [1, 1]} : vector<4x256xbf16> to vector<4x128xbf16>
    %199 = vector.extract_strided_slice %195 {offsets = [0, 10], sizes = [4, 128], strides = [1, 1]} : vector<4x256xbf16> to vector<4x128xbf16>
    %200 = vector.extract_strided_slice %195 {offsets = [0, 11], sizes = [4, 128], strides = [1, 1]} : vector<4x256xbf16> to vector<4x128xbf16>
    %201 = vector.extract_strided_slice %195 {offsets = [0, 12], sizes = [4, 128], strides = [1, 1]} : vector<4x256xbf16> to vector<4x128xbf16>
    %202 = vector.extract_strided_slice %195 {offsets = [0, 20], sizes = [4, 128], strides = [1, 1]} : vector<4x256xbf16> to vector<4x128xbf16>
    %203 = vector.extract_strided_slice %195 {offsets = [0, 21], sizes = [4, 128], strides = [1, 1]} : vector<4x256xbf16> to vector<4x128xbf16>
    %204 = vector.extract_strided_slice %195 {offsets = [0, 22], sizes = [4, 128], strides = [1, 1]} : vector<4x256xbf16> to vector<4x128xbf16>
    %205 = tpu.concatenate %168, %169, %170, %171, %172, %173, %174, %175, %176, %182, %183, %184, %185, %186, %187, %188 in 0 : vector<4x128xbf16>, vector<4x128xbf16>, vector<4x128xbf16>, vector<4x128xbf16>, vector<4x128xbf16>, vector<4x128xbf16>, vector<4x128xbf16>, vector<4x128xbf16>, vector<4x128xbf16>, vector<4x128xbf16>, vector<4x128xbf16>, vector<4x128xbf16>, vector<4x128xbf16>, vector<4x128xbf16>, vector<4x128xbf16>, vector<4x128xbf16> -> vector<64x128xbf16>
    %206 = tpu.concatenate %189, %190, %196, %197, %198, %199, %200, %201, %202, %203, %204 in 0 : vector<4x128xbf16>, vector<4x128xbf16>, vector<4x128xbf16>, vector<4x128xbf16>, vector<4x128xbf16>, vector<4x128xbf16>, vector<4x128xbf16>, vector<4x128xbf16>, vector<4x128xbf16>, vector<4x128xbf16>, vector<4x128xbf16> -> vector<44x128xbf16>
    %207 = tpu.concatenate %205, %206 in 0 : vector<64x128xbf16>, vector<44x128xbf16> -> vector<108x128xbf16>
    %cst_69 = arith.constant dense<0.000000e+00> : vector<8x128xf32>
    %208 = tpu.matmul %24, %207, %cst_69 {dimension_numbers = #tpu.dot_dimension_numbers<[1], [0], [0], [1], [0, 0, 1, 1], [], []>} : vector<8x108xbf16>, vector<108x128xbf16>, vector<8x128xf32> -> vector<8x128xf32>
    %209 = arith.truncf %208 : vector<8x128xf32> to vector<8x128xbf16>
    %c0_70 = arith.constant 0 : index
    %c2 = arith.constant 2 : index
    %c0_71 = arith.constant 0 : index
    %c0_72 = arith.constant 0 : index
    %210 = vector.load %arg4[%c0_70, %c2, %c0_71, %c0_72] : memref<1x8x8x128xbf16, #tpu.memory_space<vmem>>, vector<1x1x8x128xbf16>
    %211 = vector.shape_cast %210 : vector<1x1x8x128xbf16> to vector<8x128xbf16>
    %212 = vector.shape_cast %209 : vector<8x128xbf16> to vector<1x1x8x128xbf16>
    tpu.vector_store %arg4[%c0_70, %c2, %c0_71, %c0_72], %212 {strides = array<i32>} : memref<1x8x8x128xbf16, #tpu.memory_space<vmem>>, vector<1x1x8x128xbf16>,
    %c8_i32_73 = arith.constant 8 : i32
    %213 = arith.cmpi slt, %162, %c8_i32_73 : i32
    %214 = arith.extui %213 : i1 to i32
    %215 = arith.sitofp %214 : i32 to f32
    %216 = arith.mulf %208, %23 : vector<8x128xf32>
    %cst_74 = arith.constant dense<0.000000e+00> : vector<8xf32>
    %217 = vector.multi_reduction <add>, %216, %cst_74 [1] : vector<8x128xf32> to vector<8xf32>
    %218 = vector.shape_cast %217 : vector<8xf32> to vector<8x1xf32>
    %219 = vector.broadcast %215 : f32 to vector<8x1xf32>
    %220 = arith.mulf %219, %218 : vector<8x1xf32>
    %221 = arith.addf %154, %220 : vector<8x1xf32>
    %222 = arith.mulf %216, %216 : vector<8x128xf32>
    %cst_75 = arith.constant dense<0.000000e+00> : vector<8xf32>
    %223 = vector.multi_reduction <add>, %222, %cst_75 [1] : vector<8x128xf32> to vector<8xf32>
    %224 = vector.shape_cast %223 : vector<8xf32> to vector<8x1xf32>
    %225 = vector.broadcast %215 : f32 to vector<8x1xf32>
    %226 = arith.mulf %225, %224 : vector<8x1xf32>
    %227 = arith.addf %160, %226 : vector<8x1xf32>
    %c8_i32_76 = arith.constant 8 : i32
    %228 = arith.muli %arg1, %c8_i32_76 : i32
    %c3_i32 = arith.constant 3 : i32
    %229 = arith.addi %228, %c3_i32 : i32
    %c0_i32_77 = arith.constant 0 : i32
    %230 = arith.addi %229, %c0_i32_77 : i32
    %c9_i32_78 = arith.constant 9 : i32
    %231 = arith.minsi %230, %c9_i32_78 : i32
    %c0_79 = arith.constant 0 : index
    %232 = arith.index_cast %231 : i32 to index
    %c0_80 = arith.constant 0 : index
    %c0_81 = arith.constant 0 : index
    %233 = vector.load %arg2[%c0_79, %232, %c0_80, %c0_81] : memref<1x10x4x256xbf16, #tpu.memory_space<vmem>>, vector<1x1x4x256xbf16>
    %234 = vector.shape_cast %233 : vector<1x1x4x256xbf16> to vector<4x256xbf16>
    %235 = vector.extract_strided_slice %234 {offsets = [0, 0], sizes = [4, 128], strides = [1, 1]} : vector<4x256xbf16> to vector<4x128xbf16>
    %236 = vector.extract_strided_slice %234 {offsets = [0, 1], sizes = [4, 128], strides = [1, 1]} : vector<4x256xbf16> to vector<4x128xbf16>
    %237 = vector.extract_strided_slice %234 {offsets = [0, 2], sizes = [4, 128], strides = [1, 1]} : vector<4x256xbf16> to vector<4x128xbf16>
    %238 = vector.extract_strided_slice %234 {offsets = [0, 10], sizes = [4, 128], strides = [1, 1]} : vector<4x256xbf16> to vector<4x128xbf16>
    %239 = vector.extract_strided_slice %234 {offsets = [0, 11], sizes = [4, 128], strides = [1, 1]} : vector<4x256xbf16> to vector<4x128xbf16>
    %240 = vector.extract_strided_slice %234 {offsets = [0, 12], sizes = [4, 128], strides = [1, 1]} : vector<4x256xbf16> to vector<4x128xbf16>
    %241 = vector.extract_strided_slice %234 {offsets = [0, 20], sizes = [4, 128], strides = [1, 1]} : vector<4x256xbf16> to vector<4x128xbf16>
    %242 = vector.extract_strided_slice %234 {offsets = [0, 21], sizes = [4, 128], strides = [1, 1]} : vector<4x256xbf16> to vector<4x128xbf16>
    %243 = vector.extract_strided_slice %234 {offsets = [0, 22], sizes = [4, 128], strides = [1, 1]} : vector<4x256xbf16> to vector<4x128xbf16>
    %c1_i32_82 = arith.constant 1 : i32
    %244 = arith.addi %229, %c1_i32_82 : i32
    %c9_i32_83 = arith.constant 9 : i32
    %245 = arith.minsi %244, %c9_i32_83 : i32
    %c0_84 = arith.constant 0 : index
    %246 = arith.index_cast %245 : i32 to index
    %c0_85 = arith.constant 0 : index
    %c0_86 = arith.constant 0 : index
    %247 = vector.load %arg2[%c0_84, %246, %c0_85, %c0_86] : memref<1x10x4x256xbf16, #tpu.memory_space<vmem>>, vector<1x1x4x256xbf16>
    %248 = vector.shape_cast %247 : vector<1x1x4x256xbf16> to vector<4x256xbf16>
    %249 = vector.extract_strided_slice %248 {offsets = [0, 0], sizes = [4, 128], strides = [1, 1]} : vector<4x256xbf16> to vector<4x128xbf16>
    %250 = vector.extract_strided_slice %248 {offsets = [0, 1], sizes = [4, 128], strides = [1, 1]} : vector<4x256xbf16> to vector<4x128xbf16>
    %251 = vector.extract_strided_slice %248 {offsets = [0, 2], sizes = [4, 128], strides = [1, 1]} : vector<4x256xbf16> to vector<4x128xbf16>
    %252 = vector.extract_strided_slice %248 {offsets = [0, 10], sizes = [4, 128], strides = [1, 1]} : vector<4x256xbf16> to vector<4x128xbf16>
    %253 = vector.extract_strided_slice %248 {offsets = [0, 11], sizes = [4, 128], strides = [1, 1]} : vector<4x256xbf16> to vector<4x128xbf16>
    %254 = vector.extract_strided_slice %248 {offsets = [0, 12], sizes = [4, 128], strides = [1, 1]} : vector<4x256xbf16> to vector<4x128xbf16>
    %255 = vector.extract_strided_slice %248 {offsets = [0, 20], sizes = [4, 128], strides = [1, 1]} : vector<4x256xbf16> to vector<4x128xbf16>
    %256 = vector.extract_strided_slice %248 {offsets = [0, 21], sizes = [4, 128], strides = [1, 1]} : vector<4x256xbf16> to vector<4x128xbf16>
    %257 = vector.extract_strided_slice %248 {offsets = [0, 22], sizes = [4, 128], strides = [1, 1]} : vector<4x256xbf16> to vector<4x128xbf16>
    %c2_i32_87 = arith.constant 2 : i32
    %258 = arith.addi %229, %c2_i32_87 : i32
    %c9_i32_88 = arith.constant 9 : i32
    %259 = arith.minsi %258, %c9_i32_88 : i32
    %c0_89 = arith.constant 0 : index
    %260 = arith.index_cast %259 : i32 to index
    %c0_90 = arith.constant 0 : index
    %c0_91 = arith.constant 0 : index
    %261 = vector.load %arg2[%c0_89, %260, %c0_90, %c0_91] : memref<1x10x4x256xbf16, #tpu.memory_space<vmem>>, vector<1x1x4x256xbf16>
    %262 = vector.shape_cast %261 : vector<1x1x4x256xbf16> to vector<4x256xbf16>
    %263 = vector.extract_strided_slice %262 {offsets = [0, 0], sizes = [4, 128], strides = [1, 1]} : vector<4x256xbf16> to vector<4x128xbf16>
    %264 = vector.extract_strided_slice %262 {offsets = [0, 1], sizes = [4, 128], strides = [1, 1]} : vector<4x256xbf16> to vector<4x128xbf16>
    %265 = vector.extract_strided_slice %262 {offsets = [0, 2], sizes = [4, 128], strides = [1, 1]} : vector<4x256xbf16> to vector<4x128xbf16>
    %266 = vector.extract_strided_slice %262 {offsets = [0, 10], sizes = [4, 128], strides = [1, 1]} : vector<4x256xbf16> to vector<4x128xbf16>
    %267 = vector.extract_strided_slice %262 {offsets = [0, 11], sizes = [4, 128], strides = [1, 1]} : vector<4x256xbf16> to vector<4x128xbf16>
    %268 = vector.extract_strided_slice %262 {offsets = [0, 12], sizes = [4, 128], strides = [1, 1]} : vector<4x256xbf16> to vector<4x128xbf16>
    %269 = vector.extract_strided_slice %262 {offsets = [0, 20], sizes = [4, 128], strides = [1, 1]} : vector<4x256xbf16> to vector<4x128xbf16>
    %270 = vector.extract_strided_slice %262 {offsets = [0, 21], sizes = [4, 128], strides = [1, 1]} : vector<4x256xbf16> to vector<4x128xbf16>
    %271 = vector.extract_strided_slice %262 {offsets = [0, 22], sizes = [4, 128], strides = [1, 1]} : vector<4x256xbf16> to vector<4x128xbf16>
    %272 = tpu.concatenate %235, %236, %237, %238, %239, %240, %241, %242, %243, %249, %250, %251, %252, %253, %254, %255 in 0 : vector<4x128xbf16>, vector<4x128xbf16>, vector<4x128xbf16>, vector<4x128xbf16>, vector<4x128xbf16>, vector<4x128xbf16>, vector<4x128xbf16>, vector<4x128xbf16>, vector<4x128xbf16>, vector<4x128xbf16>, vector<4x128xbf16>, vector<4x128xbf16>, vector<4x128xbf16>, vector<4x128xbf16>, vector<4x128xbf16>, vector<4x128xbf16> -> vector<64x128xbf16>
    %273 = tpu.concatenate %256, %257, %263, %264, %265, %266, %267, %268, %269, %270, %271 in 0 : vector<4x128xbf16>, vector<4x128xbf16>, vector<4x128xbf16>, vector<4x128xbf16>, vector<4x128xbf16>, vector<4x128xbf16>, vector<4x128xbf16>, vector<4x128xbf16>, vector<4x128xbf16>, vector<4x128xbf16>, vector<4x128xbf16> -> vector<44x128xbf16>
    %274 = tpu.concatenate %272, %273 in 0 : vector<64x128xbf16>, vector<44x128xbf16> -> vector<108x128xbf16>
    %cst_92 = arith.constant dense<0.000000e+00> : vector<8x128xf32>
    %275 = tpu.matmul %24, %274, %cst_92 {dimension_numbers = #tpu.dot_dimension_numbers<[1], [0], [0], [1], [0, 0, 1, 1], [], []>} : vector<8x108xbf16>, vector<108x128xbf16>, vector<8x128xf32> -> vector<8x128xf32>
    %276 = arith.truncf %275 : vector<8x128xf32> to vector<8x128xbf16>
    %c0_93 = arith.constant 0 : index
    %c3 = arith.constant 3 : index
    %c0_94 = arith.constant 0 : index
    %c0_95 = arith.constant 0 : index
    %277 = vector.load %arg4[%c0_93, %c3, %c0_94, %c0_95] : memref<1x8x8x128xbf16, #tpu.memory_space<vmem>>, vector<1x1x8x128xbf16>
    %278 = vector.shape_cast %277 : vector<1x1x8x128xbf16> to vector<8x128xbf16>
    %279 = vector.shape_cast %276 : vector<8x128xbf16> to vector<1x1x8x128xbf16>
    tpu.vector_store %arg4[%c0_93, %c3, %c0_94, %c0_95], %279 {strides = array<i32>} : memref<1x8x8x128xbf16, #tpu.memory_space<vmem>>, vector<1x1x8x128xbf16>,
    %c8_i32_96 = arith.constant 8 : i32
    %280 = arith.cmpi slt, %229, %c8_i32_96 : i32
    %281 = arith.extui %280 : i1 to i32
    %282 = arith.sitofp %281 : i32 to f32
    %283 = arith.mulf %275, %23 : vector<8x128xf32>
    %cst_97 = arith.constant dense<0.000000e+00> : vector<8xf32>
    %284 = vector.multi_reduction <add>, %283, %cst_97 [1] : vector<8x128xf32> to vector<8xf32>
    %285 = vector.shape_cast %284 : vector<8xf32> to vector<8x1xf32>
    %286 = vector.broadcast %282 : f32 to vector<8x1xf32>
    %287 = arith.mulf %286, %285 : vector<8x1xf32>
    %288 = arith.addf %221, %287 : vector<8x1xf32>
    %289 = arith.mulf %283, %283 : vector<8x128xf32>
    %cst_98 = arith.constant dense<0.000000e+00> : vector<8xf32>
    %290 = vector.multi_reduction <add>, %289, %cst_98 [1] : vector<8x128xf32> to vector<8xf32>
    %291 = vector.shape_cast %290 : vector<8xf32> to vector<8x1xf32>
    %292 = vector.broadcast %282 : f32 to vector<8x1xf32>
    %293 = arith.mulf %292, %291 : vector<8x1xf32>
    %294 = arith.addf %227, %293 : vector<8x1xf32>
    %c8_i32_99 = arith.constant 8 : i32
    %295 = arith.muli %arg1, %c8_i32_99 : i32
    %c4_i32 = arith.constant 4 : i32
    %296 = arith.addi %295, %c4_i32 : i32
    %c0_i32_100 = arith.constant 0 : i32
    %297 = arith.addi %296, %c0_i32_100 : i32
    %c9_i32_101 = arith.constant 9 : i32
    %298 = arith.minsi %297, %c9_i32_101 : i32
    %c0_102 = arith.constant 0 : index
    %299 = arith.index_cast %298 : i32 to index
    %c0_103 = arith.constant 0 : index
    %c0_104 = arith.constant 0 : index
    %300 = vector.load %arg2[%c0_102, %299, %c0_103, %c0_104] : memref<1x10x4x256xbf16, #tpu.memory_space<vmem>>, vector<1x1x4x256xbf16>
    %301 = vector.shape_cast %300 : vector<1x1x4x256xbf16> to vector<4x256xbf16>
    %302 = vector.extract_strided_slice %301 {offsets = [0, 0], sizes = [4, 128], strides = [1, 1]} : vector<4x256xbf16> to vector<4x128xbf16>
    %303 = vector.extract_strided_slice %301 {offsets = [0, 1], sizes = [4, 128], strides = [1, 1]} : vector<4x256xbf16> to vector<4x128xbf16>
    %304 = vector.extract_strided_slice %301 {offsets = [0, 2], sizes = [4, 128], strides = [1, 1]} : vector<4x256xbf16> to vector<4x128xbf16>
    %305 = vector.extract_strided_slice %301 {offsets = [0, 10], sizes = [4, 128], strides = [1, 1]} : vector<4x256xbf16> to vector<4x128xbf16>
    %306 = vector.extract_strided_slice %301 {offsets = [0, 11], sizes = [4, 128], strides = [1, 1]} : vector<4x256xbf16> to vector<4x128xbf16>
    %307 = vector.extract_strided_slice %301 {offsets = [0, 12], sizes = [4, 128], strides = [1, 1]} : vector<4x256xbf16> to vector<4x128xbf16>
    %308 = vector.extract_strided_slice %301 {offsets = [0, 20], sizes = [4, 128], strides = [1, 1]} : vector<4x256xbf16> to vector<4x128xbf16>
    %309 = vector.extract_strided_slice %301 {offsets = [0, 21], sizes = [4, 128], strides = [1, 1]} : vector<4x256xbf16> to vector<4x128xbf16>
    %310 = vector.extract_strided_slice %301 {offsets = [0, 22], sizes = [4, 128], strides = [1, 1]} : vector<4x256xbf16> to vector<4x128xbf16>
    %c1_i32_105 = arith.constant 1 : i32
    %311 = arith.addi %296, %c1_i32_105 : i32
    %c9_i32_106 = arith.constant 9 : i32
    %312 = arith.minsi %311, %c9_i32_106 : i32
    %c0_107 = arith.constant 0 : index
    %313 = arith.index_cast %312 : i32 to index
    %c0_108 = arith.constant 0 : index
    %c0_109 = arith.constant 0 : index
    %314 = vector.load %arg2[%c0_107, %313, %c0_108, %c0_109] : memref<1x10x4x256xbf16, #tpu.memory_space<vmem>>, vector<1x1x4x256xbf16>
    %315 = vector.shape_cast %314 : vector<1x1x4x256xbf16> to vector<4x256xbf16>
    %316 = vector.extract_strided_slice %315 {offsets = [0, 0], sizes = [4, 128], strides = [1, 1]} : vector<4x256xbf16> to vector<4x128xbf16>
    %317 = vector.extract_strided_slice %315 {offsets = [0, 1], sizes = [4, 128], strides = [1, 1]} : vector<4x256xbf16> to vector<4x128xbf16>
    %318 = vector.extract_strided_slice %315 {offsets = [0, 2], sizes = [4, 128], strides = [1, 1]} : vector<4x256xbf16> to vector<4x128xbf16>
    %319 = vector.extract_strided_slice %315 {offsets = [0, 10], sizes = [4, 128], strides = [1, 1]} : vector<4x256xbf16> to vector<4x128xbf16>
    %320 = vector.extract_strided_slice %315 {offsets = [0, 11], sizes = [4, 128], strides = [1, 1]} : vector<4x256xbf16> to vector<4x128xbf16>
    %321 = vector.extract_strided_slice %315 {offsets = [0, 12], sizes = [4, 128], strides = [1, 1]} : vector<4x256xbf16> to vector<4x128xbf16>
    %322 = vector.extract_strided_slice %315 {offsets = [0, 20], sizes = [4, 128], strides = [1, 1]} : vector<4x256xbf16> to vector<4x128xbf16>
    %323 = vector.extract_strided_slice %315 {offsets = [0, 21], sizes = [4, 128], strides = [1, 1]} : vector<4x256xbf16> to vector<4x128xbf16>
    %324 = vector.extract_strided_slice %315 {offsets = [0, 22], sizes = [4, 128], strides = [1, 1]} : vector<4x256xbf16> to vector<4x128xbf16>
    %c2_i32_110 = arith.constant 2 : i32
    %325 = arith.addi %296, %c2_i32_110 : i32
    %c9_i32_111 = arith.constant 9 : i32
    %326 = arith.minsi %325, %c9_i32_111 : i32
    %c0_112 = arith.constant 0 : index
    %327 = arith.index_cast %326 : i32 to index
    %c0_113 = arith.constant 0 : index
    %c0_114 = arith.constant 0 : index
    %328 = vector.load %arg2[%c0_112, %327, %c0_113, %c0_114] : memref<1x10x4x256xbf16, #tpu.memory_space<vmem>>, vector<1x1x4x256xbf16>
    %329 = vector.shape_cast %328 : vector<1x1x4x256xbf16> to vector<4x256xbf16>
    %330 = vector.extract_strided_slice %329 {offsets = [0, 0], sizes = [4, 128], strides = [1, 1]} : vector<4x256xbf16> to vector<4x128xbf16>
    %331 = vector.extract_strided_slice %329 {offsets = [0, 1], sizes = [4, 128], strides = [1, 1]} : vector<4x256xbf16> to vector<4x128xbf16>
    %332 = vector.extract_strided_slice %329 {offsets = [0, 2], sizes = [4, 128], strides = [1, 1]} : vector<4x256xbf16> to vector<4x128xbf16>
    %333 = vector.extract_strided_slice %329 {offsets = [0, 10], sizes = [4, 128], strides = [1, 1]} : vector<4x256xbf16> to vector<4x128xbf16>
    %334 = vector.extract_strided_slice %329 {offsets = [0, 11], sizes = [4, 128], strides = [1, 1]} : vector<4x256xbf16> to vector<4x128xbf16>
    %335 = vector.extract_strided_slice %329 {offsets = [0, 12], sizes = [4, 128], strides = [1, 1]} : vector<4x256xbf16> to vector<4x128xbf16>
    %336 = vector.extract_strided_slice %329 {offsets = [0, 20], sizes = [4, 128], strides = [1, 1]} : vector<4x256xbf16> to vector<4x128xbf16>
    %337 = vector.extract_strided_slice %329 {offsets = [0, 21], sizes = [4, 128], strides = [1, 1]} : vector<4x256xbf16> to vector<4x128xbf16>
    %338 = vector.extract_strided_slice %329 {offsets = [0, 22], sizes = [4, 128], strides = [1, 1]} : vector<4x256xbf16> to vector<4x128xbf16>
    %339 = tpu.concatenate %302, %303, %304, %305, %306, %307, %308, %309, %310, %316, %317, %318, %319, %320, %321, %322 in 0 : vector<4x128xbf16>, vector<4x128xbf16>, vector<4x128xbf16>, vector<4x128xbf16>, vector<4x128xbf16>, vector<4x128xbf16>, vector<4x128xbf16>, vector<4x128xbf16>, vector<4x128xbf16>, vector<4x128xbf16>, vector<4x128xbf16>, vector<4x128xbf16>, vector<4x128xbf16>, vector<4x128xbf16>, vector<4x128xbf16>, vector<4x128xbf16> -> vector<64x128xbf16>
    %340 = tpu.concatenate %323, %324, %330, %331, %332, %333, %334, %335, %336, %337, %338 in 0 : vector<4x128xbf16>, vector<4x128xbf16>, vector<4x128xbf16>, vector<4x128xbf16>, vector<4x128xbf16>, vector<4x128xbf16>, vector<4x128xbf16>, vector<4x128xbf16>, vector<4x128xbf16>, vector<4x128xbf16>, vector<4x128xbf16> -> vector<44x128xbf16>
    %341 = tpu.concatenate %339, %340 in 0 : vector<64x128xbf16>, vector<44x128xbf16> -> vector<108x128xbf16>
    %cst_115 = arith.constant dense<0.000000e+00> : vector<8x128xf32>
    %342 = tpu.matmul %24, %341, %cst_115 {dimension_numbers = #tpu.dot_dimension_numbers<[1], [0], [0], [1], [0, 0, 1, 1], [], []>} : vector<8x108xbf16>, vector<108x128xbf16>, vector<8x128xf32> -> vector<8x128xf32>
    %343 = arith.truncf %342 : vector<8x128xf32> to vector<8x128xbf16>
    %c0_116 = arith.constant 0 : index
    %c4 = arith.constant 4 : index
    %c0_117 = arith.constant 0 : index
    %c0_118 = arith.constant 0 : index
    %344 = vector.load %arg4[%c0_116, %c4, %c0_117, %c0_118] : memref<1x8x8x128xbf16, #tpu.memory_space<vmem>>, vector<1x1x8x128xbf16>
    %345 = vector.shape_cast %344 : vector<1x1x8x128xbf16> to vector<8x128xbf16>
    %346 = vector.shape_cast %343 : vector<8x128xbf16> to vector<1x1x8x128xbf16>
    tpu.vector_store %arg4[%c0_116, %c4, %c0_117, %c0_118], %346 {strides = array<i32>} : memref<1x8x8x128xbf16, #tpu.memory_space<vmem>>, vector<1x1x8x128xbf16>,
    %c8_i32_119 = arith.constant 8 : i32
    %347 = arith.cmpi slt, %296, %c8_i32_119 : i32
    %348 = arith.extui %347 : i1 to i32
    %349 = arith.sitofp %348 : i32 to f32
    %350 = arith.mulf %342, %23 : vector<8x128xf32>
    %cst_120 = arith.constant dense<0.000000e+00> : vector<8xf32>
    %351 = vector.multi_reduction <add>, %350, %cst_120 [1] : vector<8x128xf32> to vector<8xf32>
    %352 = vector.shape_cast %351 : vector<8xf32> to vector<8x1xf32>
    %353 = vector.broadcast %349 : f32 to vector<8x1xf32>
    %354 = arith.mulf %353, %352 : vector<8x1xf32>
    %355 = arith.addf %288, %354 : vector<8x1xf32>
    %356 = arith.mulf %350, %350 : vector<8x128xf32>
    %cst_121 = arith.constant dense<0.000000e+00> : vector<8xf32>
    %357 = vector.multi_reduction <add>, %356, %cst_121 [1] : vector<8x128xf32> to vector<8xf32>
    %358 = vector.shape_cast %357 : vector<8xf32> to vector<8x1xf32>
    %359 = vector.broadcast %349 : f32 to vector<8x1xf32>
    %360 = arith.mulf %359, %358 : vector<8x1xf32>
    %361 = arith.addf %294, %360 : vector<8x1xf32>
    %c8_i32_122 = arith.constant 8 : i32
    %362 = arith.muli %arg1, %c8_i32_122 : i32
    %c5_i32 = arith.constant 5 : i32
    %363 = arith.addi %362, %c5_i32 : i32
    %c0_i32_123 = arith.constant 0 : i32
    %364 = arith.addi %363, %c0_i32_123 : i32
    %c9_i32_124 = arith.constant 9 : i32
    %365 = arith.minsi %364, %c9_i32_124 : i32
    %c0_125 = arith.constant 0 : index
    %366 = arith.index_cast %365 : i32 to index
    %c0_126 = arith.constant 0 : index
    %c0_127 = arith.constant 0 : index
    %367 = vector.load %arg2[%c0_125, %366, %c0_126, %c0_127] : memref<1x10x4x256xbf16, #tpu.memory_space<vmem>>, vector<1x1x4x256xbf16>
    %368 = vector.shape_cast %367 : vector<1x1x4x256xbf16> to vector<4x256xbf16>
    %369 = vector.extract_strided_slice %368 {offsets = [0, 0], sizes = [4, 128], strides = [1, 1]} : vector<4x256xbf16> to vector<4x128xbf16>
    %370 = vector.extract_strided_slice %368 {offsets = [0, 1], sizes = [4, 128], strides = [1, 1]} : vector<4x256xbf16> to vector<4x128xbf16>
    %371 = vector.extract_strided_slice %368 {offsets = [0, 2], sizes = [4, 128], strides = [1, 1]} : vector<4x256xbf16> to vector<4x128xbf16>
    %372 = vector.extract_strided_slice %368 {offsets = [0, 10], sizes = [4, 128], strides = [1, 1]} : vector<4x256xbf16> to vector<4x128xbf16>
    %373 = vector.extract_strided_slice %368 {offsets = [0, 11], sizes = [4, 128], strides = [1, 1]} : vector<4x256xbf16> to vector<4x128xbf16>
    %374 = vector.extract_strided_slice %368 {offsets = [0, 12], sizes = [4, 128], strides = [1, 1]} : vector<4x256xbf16> to vector<4x128xbf16>
    %375 = vector.extract_strided_slice %368 {offsets = [0, 20], sizes = [4, 128], strides = [1, 1]} : vector<4x256xbf16> to vector<4x128xbf16>
    %376 = vector.extract_strided_slice %368 {offsets = [0, 21], sizes = [4, 128], strides = [1, 1]} : vector<4x256xbf16> to vector<4x128xbf16>
    %377 = vector.extract_strided_slice %368 {offsets = [0, 22], sizes = [4, 128], strides = [1, 1]} : vector<4x256xbf16> to vector<4x128xbf16>
    %c1_i32_128 = arith.constant 1 : i32
    %378 = arith.addi %363, %c1_i32_128 : i32
    %c9_i32_129 = arith.constant 9 : i32
    %379 = arith.minsi %378, %c9_i32_129 : i32
    %c0_130 = arith.constant 0 : index
    %380 = arith.index_cast %379 : i32 to index
    %c0_131 = arith.constant 0 : index
    %c0_132 = arith.constant 0 : index
    %381 = vector.load %arg2[%c0_130, %380, %c0_131, %c0_132] : memref<1x10x4x256xbf16, #tpu.memory_space<vmem>>, vector<1x1x4x256xbf16>
    %382 = vector.shape_cast %381 : vector<1x1x4x256xbf16> to vector<4x256xbf16>
    %383 = vector.extract_strided_slice %382 {offsets = [0, 0], sizes = [4, 128], strides = [1, 1]} : vector<4x256xbf16> to vector<4x128xbf16>
    %384 = vector.extract_strided_slice %382 {offsets = [0, 1], sizes = [4, 128], strides = [1, 1]} : vector<4x256xbf16> to vector<4x128xbf16>
    %385 = vector.extract_strided_slice %382 {offsets = [0, 2], sizes = [4, 128], strides = [1, 1]} : vector<4x256xbf16> to vector<4x128xbf16>
    %386 = vector.extract_strided_slice %382 {offsets = [0, 10], sizes = [4, 128], strides = [1, 1]} : vector<4x256xbf16> to vector<4x128xbf16>
    %387 = vector.extract_strided_slice %382 {offsets = [0, 11], sizes = [4, 128], strides = [1, 1]} : vector<4x256xbf16> to vector<4x128xbf16>
    %388 = vector.extract_strided_slice %382 {offsets = [0, 12], sizes = [4, 128], strides = [1, 1]} : vector<4x256xbf16> to vector<4x128xbf16>
    %389 = vector.extract_strided_slice %382 {offsets = [0, 20], sizes = [4, 128], strides = [1, 1]} : vector<4x256xbf16> to vector<4x128xbf16>
    %390 = vector.extract_strided_slice %382 {offsets = [0, 21], sizes = [4, 128], strides = [1, 1]} : vector<4x256xbf16> to vector<4x128xbf16>
    %391 = vector.extract_strided_slice %382 {offsets = [0, 22], sizes = [4, 128], strides = [1, 1]} : vector<4x256xbf16> to vector<4x128xbf16>
    %c2_i32_133 = arith.constant 2 : i32
    %392 = arith.addi %363, %c2_i32_133 : i32
    %c9_i32_134 = arith.constant 9 : i32
    %393 = arith.minsi %392, %c9_i32_134 : i32
    %c0_135 = arith.constant 0 : index
    %394 = arith.index_cast %393 : i32 to index
    %c0_136 = arith.constant 0 : index
    %c0_137 = arith.constant 0 : index
    %395 = vector.load %arg2[%c0_135, %394, %c0_136, %c0_137] : memref<1x10x4x256xbf16, #tpu.memory_space<vmem>>, vector<1x1x4x256xbf16>
    %396 = vector.shape_cast %395 : vector<1x1x4x256xbf16> to vector<4x256xbf16>
    %397 = vector.extract_strided_slice %396 {offsets = [0, 0], sizes = [4, 128], strides = [1, 1]} : vector<4x256xbf16> to vector<4x128xbf16>
    %398 = vector.extract_strided_slice %396 {offsets = [0, 1], sizes = [4, 128], strides = [1, 1]} : vector<4x256xbf16> to vector<4x128xbf16>
    %399 = vector.extract_strided_slice %396 {offsets = [0, 2], sizes = [4, 128], strides = [1, 1]} : vector<4x256xbf16> to vector<4x128xbf16>
    %400 = vector.extract_strided_slice %396 {offsets = [0, 10], sizes = [4, 128], strides = [1, 1]} : vector<4x256xbf16> to vector<4x128xbf16>
    %401 = vector.extract_strided_slice %396 {offsets = [0, 11], sizes = [4, 128], strides = [1, 1]} : vector<4x256xbf16> to vector<4x128xbf16>
    %402 = vector.extract_strided_slice %396 {offsets = [0, 12], sizes = [4, 128], strides = [1, 1]} : vector<4x256xbf16> to vector<4x128xbf16>
    %403 = vector.extract_strided_slice %396 {offsets = [0, 20], sizes = [4, 128], strides = [1, 1]} : vector<4x256xbf16> to vector<4x128xbf16>
    %404 = vector.extract_strided_slice %396 {offsets = [0, 21], sizes = [4, 128], strides = [1, 1]} : vector<4x256xbf16> to vector<4x128xbf16>
    %405 = vector.extract_strided_slice %396 {offsets = [0, 22], sizes = [4, 128], strides = [1, 1]} : vector<4x256xbf16> to vector<4x128xbf16>
    %406 = tpu.concatenate %369, %370, %371, %372, %373, %374, %375, %376, %377, %383, %384, %385, %386, %387, %388, %389 in 0 : vector<4x128xbf16>, vector<4x128xbf16>, vector<4x128xbf16>, vector<4x128xbf16>, vector<4x128xbf16>, vector<4x128xbf16>, vector<4x128xbf16>, vector<4x128xbf16>, vector<4x128xbf16>, vector<4x128xbf16>, vector<4x128xbf16>, vector<4x128xbf16>, vector<4x128xbf16>, vector<4x128xbf16>, vector<4x128xbf16>, vector<4x128xbf16> -> vector<64x128xbf16>
    %407 = tpu.concatenate %390, %391, %397, %398, %399, %400, %401, %402, %403, %404, %405 in 0 : vector<4x128xbf16>, vector<4x128xbf16>, vector<4x128xbf16>, vector<4x128xbf16>, vector<4x128xbf16>, vector<4x128xbf16>, vector<4x128xbf16>, vector<4x128xbf16>, vector<4x128xbf16>, vector<4x128xbf16>, vector<4x128xbf16> -> vector<44x128xbf16>
    %408 = tpu.concatenate %406, %407 in 0 : vector<64x128xbf16>, vector<44x128xbf16> -> vector<108x128xbf16>
    %cst_138 = arith.constant dense<0.000000e+00> : vector<8x128xf32>
    %409 = tpu.matmul %24, %408, %cst_138 {dimension_numbers = #tpu.dot_dimension_numbers<[1], [0], [0], [1], [0, 0, 1, 1], [], []>} : vector<8x108xbf16>, vector<108x128xbf16>, vector<8x128xf32> -> vector<8x128xf32>
    %410 = arith.truncf %409 : vector<8x128xf32> to vector<8x128xbf16>
    %c0_139 = arith.constant 0 : index
    %c5 = arith.constant 5 : index
    %c0_140 = arith.constant 0 : index
    %c0_141 = arith.constant 0 : index
    %411 = vector.load %arg4[%c0_139, %c5, %c0_140, %c0_141] : memref<1x8x8x128xbf16, #tpu.memory_space<vmem>>, vector<1x1x8x128xbf16>
    %412 = vector.shape_cast %411 : vector<1x1x8x128xbf16> to vector<8x128xbf16>
    %413 = vector.shape_cast %410 : vector<8x128xbf16> to vector<1x1x8x128xbf16>
    tpu.vector_store %arg4[%c0_139, %c5, %c0_140, %c0_141], %413 {strides = array<i32>} : memref<1x8x8x128xbf16, #tpu.memory_space<vmem>>, vector<1x1x8x128xbf16>,
    %c8_i32_142 = arith.constant 8 : i32
    %414 = arith.cmpi slt, %363, %c8_i32_142 : i32
    %415 = arith.extui %414 : i1 to i32
    %416 = arith.sitofp %415 : i32 to f32
    %417 = arith.mulf %409, %23 : vector<8x128xf32>
    %cst_143 = arith.constant dense<0.000000e+00> : vector<8xf32>
    %418 = vector.multi_reduction <add>, %417, %cst_143 [1] : vector<8x128xf32> to vector<8xf32>
    %419 = vector.shape_cast %418 : vector<8xf32> to vector<8x1xf32>
    %420 = vector.broadcast %416 : f32 to vector<8x1xf32>
    %421 = arith.mulf %420, %419 : vector<8x1xf32>
    %422 = arith.addf %355, %421 : vector<8x1xf32>
    %423 = arith.mulf %417, %417 : vector<8x128xf32>
    %cst_144 = arith.constant dense<0.000000e+00> : vector<8xf32>
    %424 = vector.multi_reduction <add>, %423, %cst_144 [1] : vector<8x128xf32> to vector<8xf32>
    %425 = vector.shape_cast %424 : vector<8xf32> to vector<8x1xf32>
    %426 = vector.broadcast %416 : f32 to vector<8x1xf32>
    %427 = arith.mulf %426, %425 : vector<8x1xf32>
    %428 = arith.addf %361, %427 : vector<8x1xf32>
    %c8_i32_145 = arith.constant 8 : i32
    %429 = arith.muli %arg1, %c8_i32_145 : i32
    %c6_i32 = arith.constant 6 : i32
    %430 = arith.addi %429, %c6_i32 : i32
    %c0_i32_146 = arith.constant 0 : i32
    %431 = arith.addi %430, %c0_i32_146 : i32
    %c9_i32_147 = arith.constant 9 : i32
    %432 = arith.minsi %431, %c9_i32_147 : i32
    %c0_148 = arith.constant 0 : index
    %433 = arith.index_cast %432 : i32 to index
    %c0_149 = arith.constant 0 : index
    %c0_150 = arith.constant 0 : index
    %434 = vector.load %arg2[%c0_148, %433, %c0_149, %c0_150] : memref<1x10x4x256xbf16, #tpu.memory_space<vmem>>, vector<1x1x4x256xbf16>
    %435 = vector.shape_cast %434 : vector<1x1x4x256xbf16> to vector<4x256xbf16>
    %436 = vector.extract_strided_slice %435 {offsets = [0, 0], sizes = [4, 128], strides = [1, 1]} : vector<4x256xbf16> to vector<4x128xbf16>
    %437 = vector.extract_strided_slice %435 {offsets = [0, 1], sizes = [4, 128], strides = [1, 1]} : vector<4x256xbf16> to vector<4x128xbf16>
    %438 = vector.extract_strided_slice %435 {offsets = [0, 2], sizes = [4, 128], strides = [1, 1]} : vector<4x256xbf16> to vector<4x128xbf16>
    %439 = vector.extract_strided_slice %435 {offsets = [0, 10], sizes = [4, 128], strides = [1, 1]} : vector<4x256xbf16> to vector<4x128xbf16>
    %440 = vector.extract_strided_slice %435 {offsets = [0, 11], sizes = [4, 128], strides = [1, 1]} : vector<4x256xbf16> to vector<4x128xbf16>
    %441 = vector.extract_strided_slice %435 {offsets = [0, 12], sizes = [4, 128], strides = [1, 1]} : vector<4x256xbf16> to vector<4x128xbf16>
    %442 = vector.extract_strided_slice %435 {offsets = [0, 20], sizes = [4, 128], strides = [1, 1]} : vector<4x256xbf16> to vector<4x128xbf16>
    %443 = vector.extract_strided_slice %435 {offsets = [0, 21], sizes = [4, 128], strides = [1, 1]} : vector<4x256xbf16> to vector<4x128xbf16>
    %444 = vector.extract_strided_slice %435 {offsets = [0, 22], sizes = [4, 128], strides = [1, 1]} : vector<4x256xbf16> to vector<4x128xbf16>
    %c1_i32_151 = arith.constant 1 : i32
    %445 = arith.addi %430, %c1_i32_151 : i32
    %c9_i32_152 = arith.constant 9 : i32
    %446 = arith.minsi %445, %c9_i32_152 : i32
    %c0_153 = arith.constant 0 : index
    %447 = arith.index_cast %446 : i32 to index
    %c0_154 = arith.constant 0 : index
    %c0_155 = arith.constant 0 : index
    %448 = vector.load %arg2[%c0_153, %447, %c0_154, %c0_155] : memref<1x10x4x256xbf16, #tpu.memory_space<vmem>>, vector<1x1x4x256xbf16>
    %449 = vector.shape_cast %448 : vector<1x1x4x256xbf16> to vector<4x256xbf16>
    %450 = vector.extract_strided_slice %449 {offsets = [0, 0], sizes = [4, 128], strides = [1, 1]} : vector<4x256xbf16> to vector<4x128xbf16>
    %451 = vector.extract_strided_slice %449 {offsets = [0, 1], sizes = [4, 128], strides = [1, 1]} : vector<4x256xbf16> to vector<4x128xbf16>
    %452 = vector.extract_strided_slice %449 {offsets = [0, 2], sizes = [4, 128], strides = [1, 1]} : vector<4x256xbf16> to vector<4x128xbf16>
    %453 = vector.extract_strided_slice %449 {offsets = [0, 10], sizes = [4, 128], strides = [1, 1]} : vector<4x256xbf16> to vector<4x128xbf16>
    %454 = vector.extract_strided_slice %449 {offsets = [0, 11], sizes = [4, 128], strides = [1, 1]} : vector<4x256xbf16> to vector<4x128xbf16>
    %455 = vector.extract_strided_slice %449 {offsets = [0, 12], sizes = [4, 128], strides = [1, 1]} : vector<4x256xbf16> to vector<4x128xbf16>
    %456 = vector.extract_strided_slice %449 {offsets = [0, 20], sizes = [4, 128], strides = [1, 1]} : vector<4x256xbf16> to vector<4x128xbf16>
    %457 = vector.extract_strided_slice %449 {offsets = [0, 21], sizes = [4, 128], strides = [1, 1]} : vector<4x256xbf16> to vector<4x128xbf16>
    %458 = vector.extract_strided_slice %449 {offsets = [0, 22], sizes = [4, 128], strides = [1, 1]} : vector<4x256xbf16> to vector<4x128xbf16>
    %c2_i32_156 = arith.constant 2 : i32
    %459 = arith.addi %430, %c2_i32_156 : i32
    %c9_i32_157 = arith.constant 9 : i32
    %460 = arith.minsi %459, %c9_i32_157 : i32
    %c0_158 = arith.constant 0 : index
    %461 = arith.index_cast %460 : i32 to index
    %c0_159 = arith.constant 0 : index
    %c0_160 = arith.constant 0 : index
    %462 = vector.load %arg2[%c0_158, %461, %c0_159, %c0_160] : memref<1x10x4x256xbf16, #tpu.memory_space<vmem>>, vector<1x1x4x256xbf16>
    %463 = vector.shape_cast %462 : vector<1x1x4x256xbf16> to vector<4x256xbf16>
    %464 = vector.extract_strided_slice %463 {offsets = [0, 0], sizes = [4, 128], strides = [1, 1]} : vector<4x256xbf16> to vector<4x128xbf16>
    %465 = vector.extract_strided_slice %463 {offsets = [0, 1], sizes = [4, 128], strides = [1, 1]} : vector<4x256xbf16> to vector<4x128xbf16>
    %466 = vector.extract_strided_slice %463 {offsets = [0, 2], sizes = [4, 128], strides = [1, 1]} : vector<4x256xbf16> to vector<4x128xbf16>
    %467 = vector.extract_strided_slice %463 {offsets = [0, 10], sizes = [4, 128], strides = [1, 1]} : vector<4x256xbf16> to vector<4x128xbf16>
    %468 = vector.extract_strided_slice %463 {offsets = [0, 11], sizes = [4, 128], strides = [1, 1]} : vector<4x256xbf16> to vector<4x128xbf16>
    %469 = vector.extract_strided_slice %463 {offsets = [0, 12], sizes = [4, 128], strides = [1, 1]} : vector<4x256xbf16> to vector<4x128xbf16>
    %470 = vector.extract_strided_slice %463 {offsets = [0, 20], sizes = [4, 128], strides = [1, 1]} : vector<4x256xbf16> to vector<4x128xbf16>
    %471 = vector.extract_strided_slice %463 {offsets = [0, 21], sizes = [4, 128], strides = [1, 1]} : vector<4x256xbf16> to vector<4x128xbf16>
    %472 = vector.extract_strided_slice %463 {offsets = [0, 22], sizes = [4, 128], strides = [1, 1]} : vector<4x256xbf16> to vector<4x128xbf16>
    %473 = tpu.concatenate %436, %437, %438, %439, %440, %441, %442, %443, %444, %450, %451, %452, %453, %454, %455, %456 in 0 : vector<4x128xbf16>, vector<4x128xbf16>, vector<4x128xbf16>, vector<4x128xbf16>, vector<4x128xbf16>, vector<4x128xbf16>, vector<4x128xbf16>, vector<4x128xbf16>, vector<4x128xbf16>, vector<4x128xbf16>, vector<4x128xbf16>, vector<4x128xbf16>, vector<4x128xbf16>, vector<4x128xbf16>, vector<4x128xbf16>, vector<4x128xbf16> -> vector<64x128xbf16>
    %474 = tpu.concatenate %457, %458, %464, %465, %466, %467, %468, %469, %470, %471, %472 in 0 : vector<4x128xbf16>, vector<4x128xbf16>, vector<4x128xbf16>, vector<4x128xbf16>, vector<4x128xbf16>, vector<4x128xbf16>, vector<4x128xbf16>, vector<4x128xbf16>, vector<4x128xbf16>, vector<4x128xbf16>, vector<4x128xbf16> -> vector<44x128xbf16>
    %475 = tpu.concatenate %473, %474 in 0 : vector<64x128xbf16>, vector<44x128xbf16> -> vector<108x128xbf16>
    %cst_161 = arith.constant dense<0.000000e+00> : vector<8x128xf32>
    %476 = tpu.matmul %24, %475, %cst_161 {dimension_numbers = #tpu.dot_dimension_numbers<[1], [0], [0], [1], [0, 0, 1, 1], [], []>} : vector<8x108xbf16>, vector<108x128xbf16>, vector<8x128xf32> -> vector<8x128xf32>
    %477 = arith.truncf %476 : vector<8x128xf32> to vector<8x128xbf16>
    %c0_162 = arith.constant 0 : index
    %c6 = arith.constant 6 : index
    %c0_163 = arith.constant 0 : index
    %c0_164 = arith.constant 0 : index
    %478 = vector.load %arg4[%c0_162, %c6, %c0_163, %c0_164] : memref<1x8x8x128xbf16, #tpu.memory_space<vmem>>, vector<1x1x8x128xbf16>
    %479 = vector.shape_cast %478 : vector<1x1x8x128xbf16> to vector<8x128xbf16>
    %480 = vector.shape_cast %477 : vector<8x128xbf16> to vector<1x1x8x128xbf16>
    tpu.vector_store %arg4[%c0_162, %c6, %c0_163, %c0_164], %480 {strides = array<i32>} : memref<1x8x8x128xbf16, #tpu.memory_space<vmem>>, vector<1x1x8x128xbf16>,
    %c8_i32_165 = arith.constant 8 : i32
    %481 = arith.cmpi slt, %430, %c8_i32_165 : i32
    %482 = arith.extui %481 : i1 to i32
    %483 = arith.sitofp %482 : i32 to f32
    %484 = arith.mulf %476, %23 : vector<8x128xf32>
    %cst_166 = arith.constant dense<0.000000e+00> : vector<8xf32>
    %485 = vector.multi_reduction <add>, %484, %cst_166 [1] : vector<8x128xf32> to vector<8xf32>
    %486 = vector.shape_cast %485 : vector<8xf32> to vector<8x1xf32>
    %487 = vector.broadcast %483 : f32 to vector<8x1xf32>
    %488 = arith.mulf %487, %486 : vector<8x1xf32>
    %489 = arith.addf %422, %488 : vector<8x1xf32>
    %490 = arith.mulf %484, %484 : vector<8x128xf32>
    %cst_167 = arith.constant dense<0.000000e+00> : vector<8xf32>
    %491 = vector.multi_reduction <add>, %490, %cst_167 [1] : vector<8x128xf32> to vector<8xf32>
    %492 = vector.shape_cast %491 : vector<8xf32> to vector<8x1xf32>
    %493 = vector.broadcast %483 : f32 to vector<8x1xf32>
    %494 = arith.mulf %493, %492 : vector<8x1xf32>
    %495 = arith.addf %428, %494 : vector<8x1xf32>
    %c8_i32_168 = arith.constant 8 : i32
    %496 = arith.muli %arg1, %c8_i32_168 : i32
    %c7_i32 = arith.constant 7 : i32
    %497 = arith.addi %496, %c7_i32 : i32
    %c0_i32_169 = arith.constant 0 : i32
    %498 = arith.addi %497, %c0_i32_169 : i32
    %c9_i32_170 = arith.constant 9 : i32
    %499 = arith.minsi %498, %c9_i32_170 : i32
    %c0_171 = arith.constant 0 : index
    %500 = arith.index_cast %499 : i32 to index
    %c0_172 = arith.constant 0 : index
    %c0_173 = arith.constant 0 : index
    %501 = vector.load %arg2[%c0_171, %500, %c0_172, %c0_173] : memref<1x10x4x256xbf16, #tpu.memory_space<vmem>>, vector<1x1x4x256xbf16>
    %502 = vector.shape_cast %501 : vector<1x1x4x256xbf16> to vector<4x256xbf16>
    %503 = vector.extract_strided_slice %502 {offsets = [0, 0], sizes = [4, 128], strides = [1, 1]} : vector<4x256xbf16> to vector<4x128xbf16>
    %504 = vector.extract_strided_slice %502 {offsets = [0, 1], sizes = [4, 128], strides = [1, 1]} : vector<4x256xbf16> to vector<4x128xbf16>
    %505 = vector.extract_strided_slice %502 {offsets = [0, 2], sizes = [4, 128], strides = [1, 1]} : vector<4x256xbf16> to vector<4x128xbf16>
    %506 = vector.extract_strided_slice %502 {offsets = [0, 10], sizes = [4, 128], strides = [1, 1]} : vector<4x256xbf16> to vector<4x128xbf16>
    %507 = vector.extract_strided_slice %502 {offsets = [0, 11], sizes = [4, 128], strides = [1, 1]} : vector<4x256xbf16> to vector<4x128xbf16>
    %508 = vector.extract_strided_slice %502 {offsets = [0, 12], sizes = [4, 128], strides = [1, 1]} : vector<4x256xbf16> to vector<4x128xbf16>
    %509 = vector.extract_strided_slice %502 {offsets = [0, 20], sizes = [4, 128], strides = [1, 1]} : vector<4x256xbf16> to vector<4x128xbf16>
    %510 = vector.extract_strided_slice %502 {offsets = [0, 21], sizes = [4, 128], strides = [1, 1]} : vector<4x256xbf16> to vector<4x128xbf16>
    %511 = vector.extract_strided_slice %502 {offsets = [0, 22], sizes = [4, 128], strides = [1, 1]} : vector<4x256xbf16> to vector<4x128xbf16>
    %c1_i32_174 = arith.constant 1 : i32
    %512 = arith.addi %497, %c1_i32_174 : i32
    %c9_i32_175 = arith.constant 9 : i32
    %513 = arith.minsi %512, %c9_i32_175 : i32
    %c0_176 = arith.constant 0 : index
    %514 = arith.index_cast %513 : i32 to index
    %c0_177 = arith.constant 0 : index
    %c0_178 = arith.constant 0 : index
    %515 = vector.load %arg2[%c0_176, %514, %c0_177, %c0_178] : memref<1x10x4x256xbf16, #tpu.memory_space<vmem>>, vector<1x1x4x256xbf16>
    %516 = vector.shape_cast %515 : vector<1x1x4x256xbf16> to vector<4x256xbf16>
    %517 = vector.extract_strided_slice %516 {offsets = [0, 0], sizes = [4, 128], strides = [1, 1]} : vector<4x256xbf16> to vector<4x128xbf16>
    %518 = vector.extract_strided_slice %516 {offsets = [0, 1], sizes = [4, 128], strides = [1, 1]} : vector<4x256xbf16> to vector<4x128xbf16>
    %519 = vector.extract_strided_slice %516 {offsets = [0, 2], sizes = [4, 128], strides = [1, 1]} : vector<4x256xbf16> to vector<4x128xbf16>
    %520 = vector.extract_strided_slice %516 {offsets = [0, 10], sizes = [4, 128], strides = [1, 1]} : vector<4x256xbf16> to vector<4x128xbf16>
    %521 = vector.extract_strided_slice %516 {offsets = [0, 11], sizes = [4, 128], strides = [1, 1]} : vector<4x256xbf16> to vector<4x128xbf16>
    %522 = vector.extract_strided_slice %516 {offsets = [0, 12], sizes = [4, 128], strides = [1, 1]} : vector<4x256xbf16> to vector<4x128xbf16>
    %523 = vector.extract_strided_slice %516 {offsets = [0, 20], sizes = [4, 128], strides = [1, 1]} : vector<4x256xbf16> to vector<4x128xbf16>
    %524 = vector.extract_strided_slice %516 {offsets = [0, 21], sizes = [4, 128], strides = [1, 1]} : vector<4x256xbf16> to vector<4x128xbf16>
    %525 = vector.extract_strided_slice %516 {offsets = [0, 22], sizes = [4, 128], strides = [1, 1]} : vector<4x256xbf16> to vector<4x128xbf16>
    %c2_i32_179 = arith.constant 2 : i32
    %526 = arith.addi %497, %c2_i32_179 : i32
    %c9_i32_180 = arith.constant 9 : i32
    %527 = arith.minsi %526, %c9_i32_180 : i32
    %c0_181 = arith.constant 0 : index
    %528 = arith.index_cast %527 : i32 to index
    %c0_182 = arith.constant 0 : index
    %c0_183 = arith.constant 0 : index
    %529 = vector.load %arg2[%c0_181, %528, %c0_182, %c0_183] : memref<1x10x4x256xbf16, #tpu.memory_space<vmem>>, vector<1x1x4x256xbf16>
    %530 = vector.shape_cast %529 : vector<1x1x4x256xbf16> to vector<4x256xbf16>
    %531 = vector.extract_strided_slice %530 {offsets = [0, 0], sizes = [4, 128], strides = [1, 1]} : vector<4x256xbf16> to vector<4x128xbf16>
    %532 = vector.extract_strided_slice %530 {offsets = [0, 1], sizes = [4, 128], strides = [1, 1]} : vector<4x256xbf16> to vector<4x128xbf16>
    %533 = vector.extract_strided_slice %530 {offsets = [0, 2], sizes = [4, 128], strides = [1, 1]} : vector<4x256xbf16> to vector<4x128xbf16>
    %534 = vector.extract_strided_slice %530 {offsets = [0, 10], sizes = [4, 128], strides = [1, 1]} : vector<4x256xbf16> to vector<4x128xbf16>
    %535 = vector.extract_strided_slice %530 {offsets = [0, 11], sizes = [4, 128], strides = [1, 1]} : vector<4x256xbf16> to vector<4x128xbf16>
    %536 = vector.extract_strided_slice %530 {offsets = [0, 12], sizes = [4, 128], strides = [1, 1]} : vector<4x256xbf16> to vector<4x128xbf16>
    %537 = vector.extract_strided_slice %530 {offsets = [0, 20], sizes = [4, 128], strides = [1, 1]} : vector<4x256xbf16> to vector<4x128xbf16>
    %538 = vector.extract_strided_slice %530 {offsets = [0, 21], sizes = [4, 128], strides = [1, 1]} : vector<4x256xbf16> to vector<4x128xbf16>
    %539 = vector.extract_strided_slice %530 {offsets = [0, 22], sizes = [4, 128], strides = [1, 1]} : vector<4x256xbf16> to vector<4x128xbf16>
    %540 = tpu.concatenate %503, %504, %505, %506, %507, %508, %509, %510, %511, %517, %518, %519, %520, %521, %522, %523 in 0 : vector<4x128xbf16>, vector<4x128xbf16>, vector<4x128xbf16>, vector<4x128xbf16>, vector<4x128xbf16>, vector<4x128xbf16>, vector<4x128xbf16>, vector<4x128xbf16>, vector<4x128xbf16>, vector<4x128xbf16>, vector<4x128xbf16>, vector<4x128xbf16>, vector<4x128xbf16>, vector<4x128xbf16>, vector<4x128xbf16>, vector<4x128xbf16> -> vector<64x128xbf16>
    %541 = tpu.concatenate %524, %525, %531, %532, %533, %534, %535, %536, %537, %538, %539 in 0 : vector<4x128xbf16>, vector<4x128xbf16>, vector<4x128xbf16>, vector<4x128xbf16>, vector<4x128xbf16>, vector<4x128xbf16>, vector<4x128xbf16>, vector<4x128xbf16>, vector<4x128xbf16>, vector<4x128xbf16>, vector<4x128xbf16> -> vector<44x128xbf16>
    %542 = tpu.concatenate %540, %541 in 0 : vector<64x128xbf16>, vector<44x128xbf16> -> vector<108x128xbf16>
    %cst_184 = arith.constant dense<0.000000e+00> : vector<8x128xf32>
    %543 = tpu.matmul %24, %542, %cst_184 {dimension_numbers = #tpu.dot_dimension_numbers<[1], [0], [0], [1], [0, 0, 1, 1], [], []>} : vector<8x108xbf16>, vector<108x128xbf16>, vector<8x128xf32> -> vector<8x128xf32>
    %544 = arith.truncf %543 : vector<8x128xf32> to vector<8x128xbf16>
    %c0_185 = arith.constant 0 : index
    %c7 = arith.constant 7 : index
    %c0_186 = arith.constant 0 : index
    %c0_187 = arith.constant 0 : index
    %545 = vector.load %arg4[%c0_185, %c7, %c0_186, %c0_187] : memref<1x8x8x128xbf16, #tpu.memory_space<vmem>>, vector<1x1x8x128xbf16>
    %546 = vector.shape_cast %545 : vector<1x1x8x128xbf16> to vector<8x128xbf16>
    %547 = vector.shape_cast %544 : vector<8x128xbf16> to vector<1x1x8x128xbf16>
    tpu.vector_store %arg4[%c0_185, %c7, %c0_186, %c0_187], %547 {strides = array<i32>} : memref<1x8x8x128xbf16, #tpu.memory_space<vmem>>, vector<1x1x8x128xbf16>,
    %c8_i32_188 = arith.constant 8 : i32
    %548 = arith.cmpi slt, %497, %c8_i32_188 : i32
    %549 = arith.extui %548 : i1 to i32
    %550 = arith.sitofp %549 : i32 to f32
    %551 = arith.mulf %543, %23 : vector<8x128xf32>
    %cst_189 = arith.constant dense<0.000000e+00> : vector<8xf32>
    %552 = vector.multi_reduction <add>, %551, %cst_189 [1] : vector<8x128xf32> to vector<8xf32>
    %553 = vector.shape_cast %552 : vector<8xf32> to vector<8x1xf32>
    %554 = vector.broadcast %550 : f32 to vector<8x1xf32>
    %555 = arith.mulf %554, %553 : vector<8x1xf32>
    %556 = arith.addf %489, %555 : vector<8x1xf32>
    %557 = arith.mulf %551, %551 : vector<8x128xf32>
    %cst_190 = arith.constant dense<0.000000e+00> : vector<8xf32>
    %558 = vector.multi_reduction <add>, %557, %cst_190 [1] : vector<8x128xf32> to vector<8xf32>
    %559 = vector.shape_cast %558 : vector<8xf32> to vector<8x1xf32>
    %560 = vector.broadcast %550 : f32 to vector<8x1xf32>
    %561 = arith.mulf %560, %559 : vector<8x1xf32>
    %562 = arith.addf %495, %561 : vector<8x1xf32>
    %563 = tpu.concatenate %556, %562 in 0 : vector<8x1xf32>, vector<8x1xf32> -> vector<16x1xf32>
    %c0_191 = arith.constant 0 : index
    %c0_192 = arith.constant 0 : index
    %c0_193 = arith.constant 0 : index
    %c0_194 = arith.constant 0 : index
    %564 = vector.load %arg5[%c0_191, %c0_192, %c0_193, %c0_194] : memref<1x1x16x1xf32, #tpu.memory_space<vmem>>, vector<1x1x16x1xf32>
    %565 = vector.shape_cast %564 : vector<1x1x16x1xf32> to vector<16x1xf32>
    %566 = vector.shape_cast %563 : vector<16x1xf32> to vector<1x1x16x1xf32>
    tpu.vector_store %arg5[%c0_191, %c0_192, %c0_193, %c0_194], %566 {strides = array<i32>} : memref<1x1x16x1xf32, #tpu.memory_space<vmem>>, vector<1x1x16x1xf32>,
    return
  }
  func.func @transform_0(%arg0: i32, %arg1: i32) -> (i32, i32, i32, i32) {
    %c0_i32 = arith.constant 0 : i32
    %c0_i32_0 = arith.constant 0 : i32
    %c0_i32_1 = arith.constant 0 : i32
    %c0_i32_2 = arith.constant 0 : i32
    return %arg0, %c0_i32, %c0_i32_0, %c0_i32_1 : i32, i32, i32, i32
  }
  func.func @transform_1(%arg0: i32, %arg1: i32) -> (i32, i32) {
    %c0_i32 = arith.constant 0 : i32
    %c0_i32_0 = arith.constant 0 : i32
    %c0_i32_1 = arith.constant 0 : i32
    return %c0_i32, %c0_i32_0 : i32, i32
  }
  func.func @transform_2(%arg0: i32, %arg1: i32) -> (i32, i32, i32, i32) {
    %c0_i32 = arith.constant 0 : i32
    %c0_i32_0 = arith.constant 0 : i32
    %c0_i32_1 = arith.constant 0 : i32
    return %arg0, %arg1, %c0_i32, %c0_i32_0 : i32, i32, i32, i32
  }
  func.func @transform_3(%arg0: i32, %arg1: i32) -> (i32, i32, i32, i32) {
    %c0_i32 = arith.constant 0 : i32
    %c0_i32_0 = arith.constant 0 : i32
    %c0_i32_1 = arith.constant 0 : i32
    return %arg0, %arg1, %c0_i32, %c0_i32_0 : i32, i32, i32, i32
  }
}

module attributes {stable_mosaic.version = 11 : i64} {
  func.func @_bn_relu_kernel(%arg0: i32, %arg1: i32, %arg2: memref<1x8x8x128xbf16, #tpu.memory_space<vmem>>, %arg3: memref<1x1x8x1xf32, #tpu.memory_space<vmem>>, %arg4: memref<1x1x8x1xf32, #tpu.memory_space<vmem>>, %arg5: memref<1x8x8x128xf32, #tpu.memory_space<vmem>>) attributes {dimension_semantics = [#tpu.dimension_semantics<parallel>, #tpu.dimension_semantics<parallel>], iteration_bounds = array<i64: 2, 1>, scalar_prefetch = 0 : i64, scratch_operands = 0 : i64, tpu.core_type = #tpu.core_type<tc>, window_params = [{transform_indices = @transform_0, window_bounds = array<i64: 1, 8, 8, 128>}, {pipeline_mode = #tpu.pipeline_mode<synchronous>, transform_indices = @transform_1, window_bounds = array<i64: 1, 1, 8, 1>}, {pipeline_mode = #tpu.pipeline_mode<synchronous>, transform_indices = @transform_2, window_bounds = array<i64: 1, 1, 8, 1>}, {transform_indices = @transform_3, window_bounds = array<i64: 1, 8, 8, 128>}]} {
    %c0 = arith.constant 0 : index
    %c0_0 = arith.constant 0 : index
    %c0_1 = arith.constant 0 : index
    %c0_2 = arith.constant 0 : index
    %0 = vector.load %arg2[%c0, %c0_0, %c0_1, %c0_2] : memref<1x8x8x128xbf16, #tpu.memory_space<vmem>>, vector<1x8x8x128xbf16>
    %1 = arith.extf %0 : vector<1x8x8x128xbf16> to vector<1x8x8x128xf32>
    %c0_3 = arith.constant 0 : index
    %c0_4 = arith.constant 0 : index
    %c0_5 = arith.constant 0 : index
    %c0_6 = arith.constant 0 : index
    %2 = vector.load %arg3[%c0_3, %c0_4, %c0_5, %c0_6] : memref<1x1x8x1xf32, #tpu.memory_space<vmem>>, vector<1x1x8x1xf32>
    %3 = vector.broadcast %2 : vector<1x1x8x1xf32> to vector<1x8x8x128xf32>
    %4 = arith.mulf %1, %3 : vector<1x8x8x128xf32>
    %c0_7 = arith.constant 0 : index
    %c0_8 = arith.constant 0 : index
    %c0_9 = arith.constant 0 : index
    %c0_10 = arith.constant 0 : index
    %5 = vector.load %arg4[%c0_7, %c0_8, %c0_9, %c0_10] : memref<1x1x8x1xf32, #tpu.memory_space<vmem>>, vector<1x1x8x1xf32>
    %6 = vector.broadcast %5 : vector<1x1x8x1xf32> to vector<1x8x8x128xf32>
    %7 = arith.addf %4, %6 : vector<1x8x8x128xf32>
    %cst = arith.constant 0.000000e+00 : f32
    %8 = vector.broadcast %cst : f32 to vector<1x8x8x128xf32>
    %9 = arith.maximumf %7, %8 : vector<1x8x8x128xf32>
    %c0_11 = arith.constant 0 : index
    %c0_12 = arith.constant 0 : index
    %c0_13 = arith.constant 0 : index
    %c0_14 = arith.constant 0 : index
    %10 = vector.load %arg5[%c0_11, %c0_12, %c0_13, %c0_14] : memref<1x8x8x128xf32, #tpu.memory_space<vmem>>, vector<1x8x8x128xf32>
    tpu.vector_store %arg5[%c0_11, %c0_12, %c0_13, %c0_14], %9 {strides = array<i32>} : memref<1x8x8x128xf32, #tpu.memory_space<vmem>>, vector<1x8x8x128xf32>,
    return
  }
  func.func @transform_0(%arg0: i32, %arg1: i32) -> (i32, i32, i32, i32) {
    %c0_i32 = arith.constant 0 : i32
    %c0_i32_0 = arith.constant 0 : i32
    %c0_i32_1 = arith.constant 0 : i32
    return %arg0, %arg1, %c0_i32, %c0_i32_0 : i32, i32, i32, i32
  }
  func.func @transform_1(%arg0: i32, %arg1: i32) -> (i32, i32, i32, i32) {
    %c0_i32 = arith.constant 0 : i32
    %c0_i32_0 = arith.constant 0 : i32
    %c0_i32_1 = arith.constant 0 : i32
    %c0_i32_2 = arith.constant 0 : i32
    %c0_i32_3 = arith.constant 0 : i32
    return %c0_i32, %c0_i32_0, %c0_i32_1, %c0_i32_2 : i32, i32, i32, i32
  }
  func.func @transform_2(%arg0: i32, %arg1: i32) -> (i32, i32, i32, i32) {
    %c0_i32 = arith.constant 0 : i32
    %c0_i32_0 = arith.constant 0 : i32
    %c0_i32_1 = arith.constant 0 : i32
    %c0_i32_2 = arith.constant 0 : i32
    %c0_i32_3 = arith.constant 0 : i32
    return %c0_i32, %c0_i32_0, %c0_i32_1, %c0_i32_2 : i32, i32, i32, i32
  }
  func.func @transform_3(%arg0: i32, %arg1: i32) -> (i32, i32, i32, i32) {
    %c0_i32 = arith.constant 0 : i32
    %c0_i32_0 = arith.constant 0 : i32
    %c0_i32_1 = arith.constant 0 : i32
    return %arg0, %arg1, %c0_i32, %c0_i32_0 : i32, i32, i32, i32
  }
}

</mosaic_0001>

<bundles_post_ra>
// kernel: conv_bn_relu.3
= control target key start
LH: loop header
LB: loop body
LE: loop exit
PB: predicated region body
PF: predicated region fallthrough
CT: control target
= control target key end

     0   :  { %s460_s12 = smov 0   ;;  %s462_s13 = smov 0   ;;  %s503_s0 = inlined_call_operand.vmem [shape: bf16[2,8,8,128], index: 0, kind: input, shape index: {}]   ;;  %s504_s1 = inlined_call_operand.vmem [shape: f32[1,1,8,1], index: 1, kind: input, shape index: {}]   ;;  %s505_s2 = inlined_call_operand.vmem [shape: f32[1,1,8,1], index: 2, kind: input, shape index: {}]   ;;  %s506_s3 = inlined_call_operand.vmem [shape: f32[2,8,8,128], index: 3, kind: output, shape index: {}]  }
   0x1   :  { %s464_s14 = smov 0  }
   0x2 LB: > { %s25_s15 = sadd.s32 1, %s433_s13  ;;  %p361_p0 = scmp.ge.s32.totalorder %s437_s14, 1  ;;  %s437_s14 = sphi %s464_s14, %s13_s14   ;;  %s433_s13 = sphi %s462_s13, %s508_s13   ;;  %s429_s12 = sphi %s460_s12, %s507_s12  }
   0x3   : > { %p27_p1 = scmp.ge.s32.totalorder %s25_s15, 2  ;;  %p158_p2 = scmp.lt.s32.totalorder %s437_s14, 3 }
   0x5   : > { %s510_s15 = smov (%p27_p1, %s25_s15), 0  ;;  %p159_p3 = pnand %p361_p0, %p158_p2 }
   0x6   : > { %p191_p4 = scmp.lt.s32.totalorder (!%p159_p3), %s429_s12, 1 }
   0x7   : > { %162 = sbr.rel (%p159_p3) target bundleno = 149 (0x95), region = 32 }
   0xc   : > { %v226_v0 = vld [vmem:[%s504_s1] sm:$0xff]  ;;  %v439_v1 = vmov 0   ;;  %s512_s12 = smov (!%p191_p4, %s429_s12), 1 }
   0xd   : > { %414 = vset.pattern.permute.xlu0 %v439_v1  ;;  %v240_v2 = vld [vmem:[%s505_s2] sm:$0xff]  ;;  %s368_s20 = sshll.u32 %s512_s12, 5  ;;  %s369_s24 = sshll.u32 %s512_s12, 6 }
   0xe   : > { %229 = vperm.xlu0 %414, %v226_v0   ;;  %s198_s23 = scalar_lea.vmem %s503_s0, %s368_s20  ;;  %s208_s27 = scalar_lea.vmem %s506_s3, %s369_s24 }
   0xf   : > { %v371_v4 = vld [vmem:[%s198_s23] sm:$0xff]   ;;  %v386_v5 = vld [vmem:[%s198_s23 + $0x8] sm:$0xff]   ;;  %v387_v6 = vld [vmem:[%s198_s23 + $0x10] sm:$0xff]  }
  0x10   : > { %v388_v7 = vld [vmem:[%s198_s23 + $0x18] sm:$0xff]   ;;  %v372_v8 = vunpack.c.l.bf16 %v371_v4  ;;  %v373_v9 = vunpack.c.h.bf16 %v371_v4  ;;  %v376_v10 = vunpack.c.l.bf16 %v386_v5  ;;  %v377_v11 = vunpack.c.h.bf16 %v386_v5 }
  0x11   : > { %v380_v12 = vunpack.c.l.bf16 %v387_v6  ;;  %v381_v13 = vunpack.c.h.bf16 %v387_v6  ;;  %v384_v14 = vunpack.c.l.bf16 %v388_v7  ;;  %v385_v15 = vunpack.c.h.bf16 %v388_v7 }
  0x16   : > { %243 = vperm.xlu0 %414, %v240_v2  }
  0x80   : > { %v230_v3 = vpop.permute.xlu0 %229 }
  0x81   : > { %v232_v16 = vmul.f32 %v372_v8, %v230_v3  ;;  %v233_v17 = vmul.f32 %v373_v9, %v230_v3  ;;  %v234_v18 = vmul.f32 %v376_v10, %v230_v3  ;;  %v235_v19 = vmul.f32 %v377_v11, %v230_v3 }
  0x82   : > { %v236_v21 = vmul.f32 %v380_v12, %v230_v3  ;;  %v237_v22 = vmul.f32 %v381_v13, %v230_v3  ;;  %v238_v23 = vmul.f32 %v384_v14, %v230_v3  ;;  %v239_v28 = vmul.f32 %v385_v15, %v230_v3 }
  0x88   : > { %v244_v20 = vpop.permute.xlu0 %243 }
  0x89   : > { %v246_v24 = vadd.f32 %v244_v20, %v232_v16  ;;  %v247_v25 = vadd.f32 %v244_v20, %v233_v17  ;;  %v248_v26 = vadd.f32 %v244_v20, %v234_v18  ;;  %v249_v27 = vadd.f32 %v244_v20, %v235_v19 }
  0x8a   : > { %v250_v29 = vadd.f32 %v244_v20, %v236_v21  ;;  %v251_v30 = vadd.f32 %v244_v20, %v237_v22  ;;  %v252_v31 = vadd.f32 %v244_v20, %v238_v23  ;;  %v253_v35 = vadd.f32 %v244_v20, %v239_v28 }
  0x8b   : > { %v254_v32 = vmax.f32 %v246_v24, 0.0  ;;  %v255_v33 = vmax.f32 %v247_v25, 0.0  ;;  %v256_v34 = vmax.f32 %v248_v26, 0.0  ;;  %v257_v36 = vmax.f32 %v249_v27, 0.0 }
  0x8c   : > { %v258_v37 = vmax.f32 %v250_v29, 0.0  ;;  %v259_v38 = vmax.f32 %v251_v30, 0.0  ;;  %v260_v39 = vmax.f32 %v252_v31, 0.0  ;;  %v261_v40 = vmax.f32 %v253_v35, 0.0 }
  0x8d   : > { %262 = vst [vmem:[%s208_s27] sm:$0xff] %v254_v32 }
  0x8e   : > { %263 = vst [vmem:[%s208_s27 + $0x8] sm:$0xff] %v255_v33 }
  0x8f   : > { %264 = vst [vmem:[%s208_s27 + $0x10] sm:$0xff] %v256_v34 }
  0x90   : > { %265 = vst [vmem:[%s208_s27 + $0x18] sm:$0xff] %v257_v36 }
  0x91   : > { %266 = vst [vmem:[%s208_s27 + $0x20] sm:$0xff] %v258_v37 }
  0x92   : > { %267 = vst [vmem:[%s208_s27 + $0x28] sm:$0xff] %v259_v38 }
  0x93   : > { %268 = vst [vmem:[%s208_s27 + $0x30] sm:$0xff] %v260_v39 }
  0x94   : > { %269 = vst [vmem:[%s208_s27 + $0x38] sm:$0xff] %v261_v40 }
  0x95 PF: > { %s13_s14 = sadd.s32 1, %s437_s14   ;;  %s507_s12 = smov %s433_s13 }
  0x96   : > { %p10_p5 = scmp.ge.s32.totalorder %s13_s14, 4   ;;  %s508_s13 = smov %s510_s15 }
  0x98   :  { %12 = sbr.rel (!%p10_p5) target bundleno = 2 (0x2), region = 62 }

// kernel: conv_bn_relu.2
= control target key start
LH: loop header
LB: loop body
LE: loop exit
PB: predicated region body
PF: predicated region fallthrough
CT: control target
= control target key end

     0   :  { %s3680_s12 = smov 0   ;;  %s3682_s13 = smov 0   ;;  %s5833_s0 = inlined_call_operand.vmem [shape: bf16[2,10,4,256], index: 0, kind: input, shape index: {}]   ;;  %s5834_s1 = inlined_call_operand.vmem [shape: bf16[8,108], index: 1, kind: input, shape index: {}]   ;;  %s5835_s2 = inlined_call_operand.vmem [shape: bf16[2,8,8,128], index: 2, kind: output, shape index: {0}]   ;;  %s5836_s3 = inlined_call_operand.vmem [shape: f32[2,1,16,1], index: 3, kind: output, shape index: {1}]  }
   0x1   :  { %s3684_s14 = smov 0  }
   0x2 LB: > { %s26_s15 = sadd.s32 1, %s3637_s13  ;;  %p3525_p0 = scmp.ge.s32.totalorder %s3641_s14, 1  ;;  %s3641_s14 = sphi %s3684_s14, %s14_s14   ;;  %s3637_s13 = sphi %s3682_s13, %s6008_s13   ;;  %s3633_s12 = sphi %s3680_s12, %s6007_s12  }
   0x3   : > { %p28_p1 = scmp.ge.s32.totalorder %s26_s15, 2  ;;  %p156_p2 = scmp.lt.s32.totalorder %s3641_s14, 3 }
   0x5   : > { %s6010_s15 = smov (%p28_p1, %s26_s15), 0  ;;  %p157_p3 = pnand %p3525_p0, %p156_p2 }
   0x7   : > { %160 = sbr.rel (%p157_p3) target bundleno = 2343 (0x927), region = 28 }
   0xc   : > { %p193_p4 = scmp.lt.s32.totalorder %s3633_s12, 1  ;;  %s3643_s20 = smov 127   ;;  %vm292_vm0 = vcmask 1039360   ;;  %vm445_vm1 = vcmask 1041408   ;;  %vm5844_vm2 = vcmask 162816   ;;  %vm448_vm3 = vcmask 1043456  }
   0xd   : > { %s3644_s21 = smov 126   ;;  %s3645_s22 = smov 118   ;;  %vm451_vm4 = vcmask 1045504   ;;  %vm5843_vm5 = vcmask 154624   ;;  %vm5842_vm6 = vcmask 89088   ;;  %vm5841_vm7 = vcmask 80896  }
   0xe   : > { %s6012_s12 = smov (!%p193_p4, %s3633_s12), 1  ;;  %s3646_s23 = smov 117   ;;  %vm5840_vm8 = vcmask 72704   ;;  %vm5839_vm9 = vcmask 7168   ;;  %vm363_vm10 = vcmask 875520   ;;  %vm316_vm11 = vcmask 965632  }
   0xf   : > { %s3574_s16 = smul.u32 40, %s6012_s12  ;;  %s3647_s24 = smov 116   ;;  %vm327_vm12 = vcmask 957440   ;;  %vm5838_vm13 = vcmask 867328   ;;  %vm339_vm14 = vcmask 949248   ;;  %vm351_vm15 = vcmask 883712  }
  0x10   : > { %s3648_s25 = smov 108   ;;  %s3649_s26 = smov 107  }
  0x11   : > { %s3704_s19 = scalar_lea.vmem %s5833_s0, %s3574_s16  ;;  %s3650_s27 = smov 106  }
  0x12   : > { %v3707_v0 = vld [vmem:[%s3704_s19] sm:$0xf]  ;;  %v3532_v15 = vld [vmem:[%s3704_s19 + $0x4] sm:$0xf]  ;;  %v3533_v33 = vld [vmem:[%s3704_s19 + $0x8] sm:$0xf] }
  0x13   : > { %283 = vst [vmem:[#allocation1 + $0x1] ss:$4 sm:$0xff] %v3707_v0  ;;  %s3651_s28 = smov 21   ;;  %s3652_s29 = smov 20  }
  0x14   : > { %s3653_s30 = smov 19   ;;  %s3654_s4 = smov 11  }
  0x15   : > { %s3655_s5 = smov 10   ;;  %s3656_s6 = smov 9  }
  0x16   : > { %s3657_s7 = smov 1   ;;  %s3572_s10 = sshll.u32 %s6012_s12, 5 }
  0x17   : > { %s4216_s17 = scalar_lea.vmem %s5835_s2, %s3572_s10 }
  0x1a   : > { %v284_v1 = vld.sshfl [vmem:[#allocation1] sm:$0xff pattern:$0x73625140]  ;;  %v286_v2 = vld.sshfl [vmem:[#allocation1 + $0x8] sm:$0xff pattern:$0x73625140] }
  0x1b   : > { %288 = vrot.lane.b32.xlu0 %v284_v1, %s3643_s20  ;;  %295 = vst [vmem:[#allocation1 + $0x2] ss:$4 sm:$0xff] %v3707_v0 }
  0x22   : > { %v296_v3 = vld.sshfl [vmem:[#allocation1] sm:$0xff pattern:$0x73625140]  ;;  %v298_v4 = vld.sshfl [vmem:[#allocation1 + $0x8] sm:$0xff pattern:$0x73625140] }
  0x23   : > { %300 = vrot.lane.b32.xlu1 %v296_v3, %s3644_s21  ;;  %290 = vrot.lane.b32.xlu0 %v286_v2, %s3643_s20  ;;  %307 = vst [vmem:[#allocation1 + $0x3] ss:$4 sm:$0xff] %v3707_v0  ;;  %v3801_v2 = vld [vmem:[%s3704_s19 + $0x4] sm:$0xf] }
  0x24   : > { %5849 = vst [vmem:[#allocation2_spill] sm:$0xff] %v3801_v2 }
  0x2a   : > { %v308_v5 = vld.sshfl [vmem:[#allocation1] sm:$0xff pattern:$0x73625140]  ;;  %v310_v6 = vld.sshfl [vmem:[#allocation1 + $0x8] sm:$0xff pattern:$0x73625140] }
  0x2b   : > { %302 = vrot.lane.b32.xlu1 %v298_v4, %s3644_s21  ;;  %318 = vst [vmem:[#allocation1] ss:$4 sm:$0xff] %v3707_v0  ;;  %312 = vrot.lane.b32.xlu2 %v308_v5, %s3645_s22 }
  0x32   : > { %v321_v7 = vld.sshfl [vmem:[#allocation1 + $0x8] sm:$0xff pattern:$0x73625140]  ;;  %v319_v8 = vld.sshfl [vmem:[#allocation1] sm:$0xff pattern:$0x73625140] }
  0x33   : > { %325 = vrot.lane.b32.xlu1 %v321_v7, %s3646_s23  ;;  %323 = vrot.lane.b32.xlu0 %v319_v8, %s3646_s23  ;;  %330 = vst [vmem:[#allocation1 + $0x1] ss:$4 sm:$0xff] %v3707_v0 }
  0x34   : > { %314 = vrot.lane.b32.xlu2 %v310_v6, %s3645_s22 }
  0x3a   : > { %v333_v9 = vld.sshfl [vmem:[#allocation1 + $0x8] sm:$0xff pattern:$0x73625140]  ;;  %v331_v10 = vld.sshfl [vmem:[#allocation1] sm:$0xff pattern:$0x73625140] }
  0x3b   : > { %337 = vrot.lane.b32.xlu0 %v333_v9, %s3647_s24  ;;  %342 = vst [vmem:[#allocation1 + $0x2] ss:$4 sm:$0xff] %v3707_v0 }
  0x3c   : > { %335 = vrot.lane.b32.xlu2 %v331_v10, %s3647_s24 }
  0x42   : > { %v343_v11 = vld.sshfl [vmem:[#allocation1] sm:$0xff pattern:$0x73625140]  ;;  %v345_v12 = vld.sshfl [vmem:[#allocation1 + $0x8] sm:$0xff pattern:$0x73625140] }
  0x43   : > { %347 = vrot.lane.b32.xlu1 %v343_v11, %s3648_s25  ;;  %354 = vst [vmem:[#allocation1 + $0x3] ss:$4 sm:$0xff] %v3707_v0 }
  0x44   : > { %349 = vrot.lane.b32.xlu2 %v345_v12, %s3648_s25 }
  0x4a   : > { %v357_v13 = vld.sshfl [vmem:[#allocation1 + $0x8] sm:$0xff pattern:$0x73625140]  ;;  %v355_v14 = vld.sshfl [vmem:[#allocation1] sm:$0xff pattern:$0x73625140] }
  0x4b   : > { %361 = vrot.lane.b32.xlu1 %v357_v13, %s3649_s26  ;;  %359 = vrot.lane.b32.xlu0 %v355_v14, %s3649_s26  ;;  %365 = vst [vmem:[#allocation1] ss:$4 sm:$0xff] %v3707_v0 }
  0x52   : > { %v368_v16 = vld.sshfl [vmem:[#allocation1 + $0x8] sm:$0xff pattern:$0x73625140]  ;;  %v366_v17 = vld.sshfl [vmem:[#allocation1] sm:$0xff pattern:$0x73625140] }
  0x53   : > { %372 = vrot.lane.b32.xlu0 %v368_v16, %s3650_s27  ;;  %378 = vst [vmem:[#allocation1 + $0x1] ss:$4 sm:$0xff] %v3532_v15  ;;  %370 = vrot.lane.b32.xlu2 %v366_v17, %s3650_s27 }
  0x5a   : > { %v3734_v18 = vld.sshfl [vmem:[#allocation1] sm:$0xff pattern:$0x73625140] }
  0x5b   : > { %381 = vst [vmem:[#allocation1 + $0x2] ss:$4 sm:$0xff] %v3532_v15 }
  0x62   : > { %v382_v19 = vld.sshfl [vmem:[#allocation1] sm:$0xff pattern:$0x73625140]  ;;  %v384_v20 = vld.sshfl [vmem:[#allocation1 + $0x8] sm:$0xff pattern:$0x73625140] }
  0x63   : > { %386 = vrot.lane.b32.xlu1 %v382_v19, %s3643_s20  ;;  %392 = vst [vmem:[#allocation1 + $0x3] ss:$4 sm:$0xff] %v3532_v15  ;;  %388 = vrot.lane.b32.xlu2 %v384_v20, %s3643_s20 }
  0x6a   : > { %v395_v21 = vld.sshfl [vmem:[#allocation1 + $0x8] sm:$0xff pattern:$0x73625140]  ;;  %v393_v22 = vld.sshfl [vmem:[#allocation1] sm:$0xff pattern:$0x73625140] }
  0x6b   : > { %399 = vrot.lane.b32.xlu1 %v395_v21, %s3644_s21  ;;  %397 = vrot.lane.b32.xlu0 %v393_v22, %s3644_s21  ;;  %402 = vst [vmem:[#allocation1] ss:$4 sm:$0xff] %v3532_v15 }
  0x72   : > { %v405_v23 = vld.sshfl [vmem:[#allocation1 + $0x8] sm:$0xff pattern:$0x73625140]  ;;  %v403_v24 = vld.sshfl [vmem:[#allocation1] sm:$0xff pattern:$0x73625140] }
  0x73   : > { %409 = vrot.lane.b32.xlu0 %v405_v23, %s3645_s22  ;;  %413 = vst [vmem:[#allocation1 + $0x1] ss:$4 sm:$0xff] %v3532_v15  ;;  %407 = vrot.lane.b32.xlu2 %v403_v24, %s3645_s22 }
  0x7a   : > { %v414_v25 = vld.sshfl [vmem:[#allocation1] sm:$0xff pattern:$0x73625140]  ;;  %v416_v26 = vld.sshfl [vmem:[#allocation1 + $0x8] sm:$0xff pattern:$0x73625140] }
  0x7b   : > { %418 = vrot.lane.b32.xlu1 %v414_v25, %s3646_s23  ;;  %424 = vst [vmem:[#allocation1 + $0x2] ss:$4 sm:$0xff] %v3532_v15  ;;  %420 = vrot.lane.b32.xlu2 %v416_v26, %s3646_s23 }
  0x82   : > { %v427_v27 = vld.sshfl [vmem:[#allocation1 + $0x8] sm:$0xff pattern:$0x73625140]  ;;  %v425_v28 = vld.sshfl [vmem:[#allocation1] sm:$0xff pattern:$0x73625140] }
  0x83   : > { %431 = vrot.lane.b32.xlu1 %v427_v27, %s3647_s24  ;;  %429 = vrot.lane.b32.xlu0 %v425_v28, %s3647_s24  ;;  %435 = vst [vmem:[#allocation1 + $0x3] ss:$4 sm:$0xff] %v3532_v15 }
  0x85   : > { %v3764_v43 = vpop.permute.xlu2 %312 }
  0x8a   : > { %v438_v29 = vld.sshfl [vmem:[#allocation1 + $0x8] sm:$0xff pattern:$0x73625140]  ;;  %v436_v30 = vld.sshfl [vmem:[#allocation1] sm:$0xff pattern:$0x73625140] }
  0x8b   : > { %442 = vrot.lane.b32.xlu0 %v438_v29, %s3648_s25  ;;  %478 = vst [vmem:[#allocation1] ss:$4 sm:$0xff] %v3532_v15  ;;  %440 = vrot.lane.b32.xlu2 %v436_v30, %s3648_s25 }
  0x8d   : > { %v3760_v41 = vpop.permute.xlu0 %288 }
  0x8e   : > { %v3774_v50 = vpop.permute.xlu2 %314 }
  0x92   : > { %v3748_v31 = vld.sshfl [vmem:[#allocation1] sm:$0xff pattern:$0x73625140]  ;;  %v3750_v32 = vld.sshfl [vmem:[#allocation1 + $0x8] sm:$0xff pattern:$0x73625140] }
  0x93   : > { %482 = vst [vmem:[#allocation1 + $0x1] ss:$4 sm:$0xff] %v3532_v15 }
  0x95   : > { %v3762_v42 = vpop.permute.xlu1 %300  ;;  %v3768_v46 = vpop.permute.xlu0 %290 }
  0x96   : > { %v3780_v54 = vpop.permute.xlu2 %335 }
  0x9a   : > { %v483_v34 = vld.sshfl [vmem:[#allocation1] sm:$0xff pattern:$0x73625140]  ;;  %v485_v35 = vld.sshfl [vmem:[#allocation1 + $0x8] sm:$0xff pattern:$0x73625140] }
  0x9b   : > { %487 = vrot.lane.b32.xlu1 %v483_v34, %s3643_s20  ;;  %494 = vst [vmem:[#allocation1 + $0x2] ss:$4 sm:$0xff] %v3533_v33  ;;  %489 = vrot.lane.b32.xlu2 %v485_v35, %s3643_s20 }
  0x9d   : > { %v3772_v49 = vpop.permute.xlu1 %302 }
  0x9e   : > { %v3785_v58 = vpop.permute.xlu2 %349 }
  0xa2   : > { %v495_v36 = vld.sshfl [vmem:[#allocation1] sm:$0xff pattern:$0x73625140] }
  0xa3   : > { %497 = vrot.lane.b32.xlu0 %v495_v36, %s3651_s28  ;;  %500 = vst [vmem:[#allocation1 + $0x3] ss:$4 sm:$0xff] %v3533_v33 }
  0xa5   : > { %v3776_v53 = vpop.permute.xlu0 %323  ;;  %v3782_v55 = vpop.permute.xlu1 %325 }
  0xaa   : > { %v501_v37 = vld.sshfl [vmem:[#allocation1] sm:$0xff pattern:$0x73625140]  ;;  %v503_v38 = vld.sshfl [vmem:[#allocation1 + $0x8] sm:$0xff pattern:$0x73625140] }
  0xab   : > { %505 = vrot.lane.b32.xlu1 %v501_v37, %s3652_s29  ;;  %511 = vst [vmem:[#allocation1] ss:$4 sm:$0xff] %v3533_v33  ;;  %507 = vrot.lane.b32.xlu2 %v503_v38, %s3652_s29 }
  0xad   : > { %v3788_v59 = vpop.permute.xlu0 %337  ;;  %v3796_v63 = vpop.permute.xlu2 %370 }
  0xb2   : > { %v514_v39 = vld.sshfl [vmem:[#allocation1 + $0x8] sm:$0xff pattern:$0x73625140]  ;;  %v512_v40 = vld.sshfl [vmem:[#allocation1] sm:$0xff pattern:$0x73625140] }
  0xb3   : > { %518 = vrot.lane.b32.xlu1 %v514_v39, %s3653_s30  ;;  %516 = vrot.lane.b32.xlu0 %v512_v40, %s3653_s30  ;;  %523 = vst [vmem:[#allocation1 + $0x1] ss:$4 sm:$0xff] %v3533_v33 }
  0xb5   : > { %v3790_v60 = vpop.permute.xlu1 %347 }
  0xba   : > { %v526_v44 = vld.sshfl [vmem:[#allocation1 + $0x8] sm:$0xff pattern:$0x73625140]  ;;  %v524_v45 = vld.sshfl [vmem:[#allocation1] sm:$0xff pattern:$0x73625140] }
  0xbb   : > { %530 = vrot.lane.b32.xlu0 %v526_v44, %s3654_s4  ;;  %535 = vst [vmem:[#allocation1 + $0x2] ss:$4 sm:$0xff] %v3533_v33  ;;  %528 = vrot.lane.b32.xlu2 %v524_v45, %s3654_s4 }
  0xbd   : > { %v3798_v1 = vpop.permute.xlu0 %359  ;;  %v3803_v3 = vpop.permute.xlu1 %361 }
  0xbe   : > { %v3808_v6 = vpop.permute.xlu2 %388 }
  0xc2   : > { %v536_v47 = vld.sshfl [vmem:[#allocation1] sm:$0xff pattern:$0x73625140]  ;;  %v538_v48 = vld.sshfl [vmem:[#allocation1 + $0x8] sm:$0xff pattern:$0x73625140] }
  0xc3   : > { %540 = vrot.lane.b32.xlu1 %v536_v47, %s3655_s5  ;;  %547 = vst [vmem:[#allocation1 + $0x3] ss:$4 sm:$0xff] %v3533_v33  ;;  %542 = vrot.lane.b32.xlu2 %v538_v48, %s3655_s5 }
  0xc5   : > { %v3810_v7 = vpop.permute.xlu0 %372 }
  0xca   : > { %v550_v51 = vld.sshfl [vmem:[#allocation1 + $0x8] sm:$0xff pattern:$0x73625140]  ;;  %v548_v52 = vld.sshfl [vmem:[#allocation1] sm:$0xff pattern:$0x73625140] }
  0xcb   : > { %554 = vrot.lane.b32.xlu1 %v550_v51, %s3656_s6  ;;  %552 = vrot.lane.b32.xlu0 %v548_v52, %s3656_s6  ;;  %558 = vst [vmem:[#allocation1] ss:$4 sm:$0xff] %v3533_v33 }
  0xcd   : > { %v3816_v11 = vpop.permute.xlu2 %407 }
  0xd2   : > { %v559_v56 = vld.sshfl [vmem:[#allocation1] sm:$0xff pattern:$0x73625140]  ;;  %v561_v57 = vld.sshfl [vmem:[#allocation1 + $0x8] sm:$0xff pattern:$0x73625140] }
  0xd3   : > { %570 = vst [vmem:[#allocation1 + $0x1] ss:$4 sm:$0xff] %v3533_v33  ;;  %563 = vrot.lane.b32.xlu2 %v559_v56, %s3657_s7  ;;  %565 = vrot.lane.b32.xlu0 %v561_v57, %s3657_s7  ;;  %v3864_v57 = vld [vmem:[%s3704_s19 + $0x8] sm:$0xf] }
  0xd5   : > { %v3814_v10 = vpop.permute.xlu1 %386  ;;  %v3824_v16 = vpop.permute.xlu2 %420 }
  0xda   : > { %v3792_v61 = vld.sshfl [vmem:[#allocation1] sm:$0xff pattern:$0x73625140]  ;;  %v3794_v62 = vld.sshfl [vmem:[#allocation1 + $0x8] sm:$0xff pattern:$0x73625140] }
  0xdb   : > { %574 = vst [vmem:[#allocation1 + $0x2] ss:$4 sm:$0xff] %v3533_v33 }
  0xdd   : > { %v3818_v13 = vpop.permute.xlu0 %397  ;;  %v3822_v15 = vpop.permute.xlu1 %399 }
  0xe2   : > { %v575_v4 = vld.sshfl [vmem:[#allocation1] sm:$0xff pattern:$0x73625140]  ;;  %v577_v5 = vld.sshfl [vmem:[#allocation1 + $0x8] sm:$0xff pattern:$0x73625140] }
  0xe3   : > { %579 = vrot.lane.b32.xlu1 %v575_v4, %s3643_s20  ;;  %581 = vrot.lane.b32.xlu2 %v577_v5, %s3643_s20  ;;  %687 = vst [vmem:[#allocation1 + $0x1] ss:$4 sm:$0xff] %v3801_v2 }
  0xe5   : > { %v3828_v20 = vpop.permute.xlu0 %409  ;;  %v3832_v24 = vpop.permute.xlu2 %440 }
  0xea   : > { %v688_v8 = vld.sshfl [vmem:[#allocation1] sm:$0xff pattern:$0x73625140]  ;;  %v690_v9 = vld.sshfl [vmem:[#allocation1 + $0x8] sm:$0xff pattern:$0x73625140] }
  0xeb   : > { %692 = vrot.lane.b32.xlu2 %v688_v8, %s3643_s20  ;;  %698 = vst [vmem:[#allocation1 + $0x2] ss:$4 sm:$0xff] %v3801_v2 }
  0xed   : > { %v3830_v21 = vpop.permute.xlu1 %418 }
  0xf2   : > { %v699_v12 = vld.sshfl [vmem:[#allocation1] sm:$0xff pattern:$0x73625140]  ;;  %v701_v14 = vld.sshfl [vmem:[#allocation1 + $0x8] sm:$0xff pattern:$0x73625140] }
  0xf3   : > { %694 = vrot.lane.b32.xlu2 %v690_v9, %s3643_s20  ;;  %709 = vst [vmem:[#allocation1 + $0x3] ss:$4 sm:$0xff] %v3801_v2 }
  0xf5   : > { %v3838_v25 = vpop.permute.xlu0 %429  ;;  %v3840_v26 = vpop.permute.xlu1 %431 }
  0xf6   : > { %v490_v29 = vpop.permute.xlu2 %489 }
  0xf7   : > { %v587_v38 = vsel %vm445_vm1, %v3750_v32, %v490_v29 }
  0xfa   : > { %v710_v17 = vld.sshfl [vmem:[#allocation1] sm:$0xff pattern:$0x73625140]  ;;  %v712_v19 = vld.sshfl [vmem:[#allocation1 + $0x8] sm:$0xff pattern:$0x73625140] }
  0xfb   : > { %703 = vrot.lane.b32.xlu2 %v699_v12, %s3644_s21  ;;  %719 = vst [vmem:[#allocation1] ss:$4 sm:$0xff] %v3801_v2 }
  0xfd   : > { %v3844_v30 = vpop.permute.xlu0 %442 }
 0x102   : > { %v720_v22 = vld.sshfl [vmem:[#allocation1] sm:$0xff pattern:$0x73625140]  ;;  %v722_v23 = vld.sshfl [vmem:[#allocation1 + $0x8] sm:$0xff pattern:$0x73625140] }
 0x103   : > { %705 = vrot.lane.b32.xlu2 %v701_v14, %s3644_s21  ;;  %724 = vrot.lane.b32.xlu0 %v720_v22, %s3646_s23  ;;  %730 = vst [vmem:[#allocation1 + $0x1] ss:$4 sm:$0xff] %v3801_v2 }
 0x104   : > { %726 = vrot.lane.b32.xlu1 %v722_v23, %s3646_s23 }
 0x105   : > { %v508_v36 = vpop.permute.xlu2 %507 }
 0x10a   : > { %v731_v27 = vld.sshfl [vmem:[#allocation1] sm:$0xff pattern:$0x73625140]  ;;  %v733_v28 = vld.sshfl [vmem:[#allocation1 + $0x8] sm:$0xff pattern:$0x73625140] }
 0x10b   : > { %714 = vrot.lane.b32.xlu2 %v710_v17, %s3645_s22  ;;  %741 = vst [vmem:[#allocation1 + $0x2] ss:$4 sm:$0xff] %v3801_v2 }
 0x10d   : > { %v488_v35 = vpop.permute.xlu1 %487 }
 0x10e   : > { %v491_v37 = vsel %vm292_vm0, %v488_v35, %v490_v29 }
 0x10f   : > { %v585_v44 = vsel %vm445_vm1, %v3748_v31, %v491_v37 }
 0x112   : > { %v742_v33 = vld.sshfl [vmem:[#allocation1] sm:$0xff pattern:$0x73625140]  ;;  %v744_v34 = vld.sshfl [vmem:[#allocation1 + $0x8] sm:$0xff pattern:$0x73625140] }
 0x113   : > { %746 = vrot.lane.b32.xlu0 %v742_v33, %s3648_s25  ;;  %752 = vst [vmem:[#allocation1 + $0x3] ss:$4 sm:$0xff] %v3801_v2  ;;  %716 = vrot.lane.b32.xlu2 %v712_v19, %s3645_s22 }
 0x115   : > { %v498_v45 = vpop.permute.xlu0 %497  ;;  %v529_v56 = vpop.permute.xlu2 %528 }
 0x116   : > { %v589_v47 = vsel %vm448_vm3, %v585_v44, %v498_v45  ;;  %v590_v32 = vsel %vm448_vm3, %v587_v38, %v498_v45 }
 0x11a   : > { %v755_v39 = vld.sshfl [vmem:[#allocation1 + $0x8] sm:$0xff pattern:$0x73625140]  ;;  %v753_v40 = vld.sshfl [vmem:[#allocation1] sm:$0xff pattern:$0x73625140] }
 0x11b   : > { %759 = vrot.lane.b32.xlu0 %v755_v39, %s3649_s26  ;;  %757 = vrot.lane.b32.xlu1 %v753_v40, %s3649_s26  ;;  %762 = vst [vmem:[#allocation1] ss:$4 sm:$0xff] %v3801_v2 }
 0x11c   : > { %735 = vrot.lane.b32.xlu2 %v731_v27, %s3647_s24 }
 0x11d   : > { %v506_v48 = vpop.permute.xlu1 %505  ;;  %v543_v12 = vpop.permute.xlu2 %542 }
 0x11e   : > { %v510_v51 = vsel %vm5844_vm2, %v506_v48, %v508_v36  ;;  %v592_v31 = vsel %vm451_vm4, %v589_v47, %v506_v48 }
 0x11f   : > { %v594_v52 = vsel %vm451_vm4, %v590_v32, %v510_v51 }
 0x122   : > { %v763_v4 = vld.sshfl [vmem:[#allocation1] sm:$0xff pattern:$0x73625140]  ;;  %v765_v5 = vld.sshfl [vmem:[#allocation1 + $0x8] sm:$0xff pattern:$0x73625140] }
 0x123   : > { %623 = vrot.lane.b32.xlu0 %v592_v31, %s3649_s26  ;;  %625 = vrot.lane.b32.xlu1 %v594_v52, %s3649_s26  ;;  %774 = vst [vmem:[#allocation1 + $0x1] ss:$4 sm:$0xff] %v3864_v57 }
 0x124   : > { %737 = vrot.lane.b32.xlu2 %v733_v28, %s3647_s24 }
 0x125   : > { %v517_v8 = vpop.permute.xlu0 %516  ;;  %v519_v14 = vpop.permute.xlu1 %518 }
 0x126   : > { %v521_v28 = vsel %vm5843_vm5, %v517_v8, %v519_v14  ;;  %v597_v37 = vsel %vm445_vm1, %v517_v8, %v529_v56 }
 0x12a   : > { %v3870_v9 = vld.sshfl [vmem:[#allocation1] sm:$0xff pattern:$0x73625140] }
 0x12b   : > { %777 = vst [vmem:[#allocation1 + $0x2] ss:$4 sm:$0xff] %v3864_v57  ;;  %769 = vrot.lane.b32.xlu1 %v765_v5, %s3650_s27 }
 0x12c   : > { %748 = vrot.lane.b32.xlu2 %v744_v34, %s3648_s25 }
 0x12d   : > { %v531_v22 = vpop.permute.xlu0 %530  ;;  %v564_v23 = vpop.permute.xlu2 %563 }
 0x12e   : > { %v533_v29 = vsel %vm5842_vm6, %v529_v56, %v531_v22 }
 0x12f   : > { %v600_v33 = vsel %vm445_vm1, %v521_v28, %v533_v29 }
 0x132   : > { %v778_v17 = vld.sshfl [vmem:[#allocation1] sm:$0xff pattern:$0x73625140]  ;;  %v780_v19 = vld.sshfl [vmem:[#allocation1 + $0x8] sm:$0xff pattern:$0x73625140] }
 0x133   : > { %782 = vrot.lane.b32.xlu0 %v778_v17, %s3643_s20  ;;  %788 = vst [vmem:[#allocation1 + $0x3] ss:$4 sm:$0xff] %v3864_v57 }
 0x134   : > { %767 = vrot.lane.b32.xlu2 %v763_v4, %s3650_s27 }
 0x135   : > { %v541_v27 = vpop.permute.xlu1 %540 }
 0x136   : > { %v545_v34 = vsel %vm5841_vm7, %v541_v27, %v543_v12  ;;  %v602_v44 = vsel %vm448_vm3, %v597_v37, %v541_v27 }
 0x137   : > { %v604_v40 = vsel %vm448_vm3, %v600_v33, %v545_v34 }
 0x13a   : > { %v791_v35 = vld.sshfl [vmem:[#allocation1 + $0x8] sm:$0xff pattern:$0x73625140]  ;;  %v789_v36 = vld.sshfl [vmem:[#allocation1] sm:$0xff pattern:$0x73625140] }
 0x13b   : > { %795 = vrot.lane.b32.xlu0 %v791_v35, %s3644_s21  ;;  %793 = vrot.lane.b32.xlu1 %v789_v36, %s3644_s21  ;;  %798 = vst [vmem:[#allocation1] ss:$4 sm:$0xff] %v3864_v57 }
 0x13c   : > { %784 = vrot.lane.b32.xlu2 %v780_v19, %s3643_s20  ;;  %v610_v19 = vsel %vm445_vm1, %v564_v23, %v3792_v61 }
 0x13d   : > { %v555_v38 = vpop.permute.xlu1 %554  ;;  %v553_v39 = vpop.permute.xlu0 %552 }
 0x13e   : > { %v557_v45 = vsel %vm5840_vm8, %v553_v39, %v555_v38  ;;  %v582_v47 = vpop.permute.xlu2 %581  ;;  %v606_v48 = vsel %vm451_vm4, %v602_v44, %v553_v39 }
 0x13f   : > { %v608_v32 = vsel %vm451_vm4, %v604_v40, %v557_v45 }
 0x142   : > { %v801_v51 = vld.sshfl [vmem:[#allocation1 + $0x8] sm:$0xff pattern:$0x73625140]  ;;  %v799_v31 = vld.sshfl [vmem:[#allocation1] sm:$0xff pattern:$0x73625140] }
 0x143   : > { %629 = vrot.lane.b32.xlu0 %v608_v32, %s3649_s26  ;;  %805 = vrot.lane.b32.xlu1 %v801_v51, %s3645_s22  ;;  %809 = vst [vmem:[#allocation1 + $0x1] ss:$4 sm:$0xff] %v3864_v57 }
 0x144   : > { %627 = vrot.lane.b32.xlu2 %v606_v48, %s3649_s26 }
 0x145   : > { %v566_v8 = vpop.permute.xlu0 %565 }
 0x146   : > { %v3896_v52 = vpop.permute.xlu2 %692  ;;  %v568_v17 = vsel %vm5839_vm9, %v564_v23, %v566_v8 }
 0x147   : > { %5850 = vst [vmem:[#allocation3_spill] sm:$0xff] %v3896_v52  ;;  %v612_v29 = vsel %vm445_vm1, %v568_v17, %v3794_v62  ;;  %v3537_v62 = vld [vmem:[%s3704_s19 + $0xc] sm:$0xf] }
 0x148   : > { %v616_v34 = vsel %vm448_vm3, %v612_v29, %v582_v47 }
 0x14a   : > { %v810_v56 = vld.sshfl [vmem:[#allocation1] sm:$0xff pattern:$0x73625140]  ;;  %v812_v4 = vld.sshfl [vmem:[#allocation1 + $0x8] sm:$0xff pattern:$0x73625140] }
 0x14b   : > { %820 = vst [vmem:[#allocation1 + $0x2] ss:$4 sm:$0xff] %v3864_v57  ;;  %814 = vrot.lane.b32.xlu0 %v810_v56, %s3646_s23 }
 0x14c   : > { %803 = vrot.lane.b32.xlu2 %v799_v31, %s3645_s22 }
 0x14e   : > { %v3901_v5 = vpop.permute.xlu2 %694 }
 0x14f   : > { %5851 = vst [vmem:[#allocation4_spill] sm:$0xff] %v3901_v5 }
 0x152   : > { %v821_v12 = vld.sshfl [vmem:[#allocation1] sm:$0xff pattern:$0x73625140]  ;;  %v823_v14 = vld.sshfl [vmem:[#allocation1 + $0x8] sm:$0xff pattern:$0x73625140] }
 0x153   : > { %825 = vrot.lane.b32.xlu1 %v821_v12, %s3647_s24  ;;  %827 = vrot.lane.b32.xlu0 %v823_v14, %s3647_s24  ;;  %831 = vst [vmem:[#allocation1 + $0x3] ss:$4 sm:$0xff] %v3864_v57 }
 0x154   : > { %816 = vrot.lane.b32.xlu2 %v812_v4, %s3646_s23 }
 0x155   : > { %v580_v22 = vpop.permute.xlu1 %579 }
 0x156   : > { %v583_v27 = vsel %vm292_vm0, %v580_v22, %v582_v47  ;;  %v3911_v28 = vpop.permute.xlu2 %703 }
 0x157   : > { %5852 = vst [vmem:[#allocation5_spill] sm:$0xff] %v3911_v28  ;;  %v614_v33 = vsel %vm448_vm3, %v610_v19, %v583_v27 }
 0x15a   : > { %v834_v35 = vld.sshfl [vmem:[#allocation1 + $0x8] sm:$0xff pattern:$0x73625140]  ;;  %v832_v36 = vld.sshfl [vmem:[#allocation1] sm:$0xff pattern:$0x73625140] }
 0x15b   : > { %631 = vrot.lane.b32.xlu1 %v614_v33, %s3649_s26  ;;  %871 = vst [vmem:[#allocation1] ss:$4 sm:$0xff] %v3864_v57 }
 0x15c   : > { %633 = vrot.lane.b32.xlu2 %v616_v34, %s3649_s26 }
 0x15e   : > { %v3920_v61 = vpop.permute.xlu2 %705 }
 0x15f   : > { %5853 = vst [vmem:[#allocation6_spill] sm:$0xff] %v3920_v61 }
 0x162   : > { %v3922_v23 = vld.sshfl [vmem:[#allocation1] sm:$0xff pattern:$0x73625140]  ;;  %v3924_v37 = vld.sshfl [vmem:[#allocation1 + $0x8] sm:$0xff pattern:$0x73625140] }
 0x163   : > { %838 = vrot.lane.b32.xlu1 %v834_v35, %s3648_s25  ;;  %875 = vst [vmem:[#allocation1 + $0x1] ss:$4 sm:$0xff] %v3864_v57 }
 0x164   : > { %836 = vrot.lane.b32.xlu2 %v832_v36, %s3648_s25 }
 0x166   : > { %v3930_v38 = vpop.permute.xlu2 %714 }
 0x167   : > { %5854 = vst [vmem:[#allocation7_spill] sm:$0xff] %v3930_v38 }
 0x16a   : > { %v876_v39 = vld.sshfl [vmem:[#allocation1] sm:$0xff pattern:$0x73625140]  ;;  %v878_v40 = vld.sshfl [vmem:[#allocation1 + $0x8] sm:$0xff pattern:$0x73625140] }
 0x16b   : > { %880 = vrot.lane.b32.xlu0 %v876_v39, %s3643_s20  ;;  %887 = vst [vmem:[#allocation1 + $0x2] ss:$4 sm:$0xff] %v3537_v62 }
 0x16c   : > { %882 = vrot.lane.b32.xlu2 %v878_v40, %s3643_s20 }
 0x16e   : > { %v3935_v45 = vpop.permute.xlu2 %716 }
 0x16f   : > { %5855 = vst [vmem:[#allocation8_spill] sm:$0xff] %v3935_v45 }
 0x172   : > { %v888_v44 = vld.sshfl [vmem:[#allocation1] sm:$0xff pattern:$0x73625140] }
 0x173   : > { %890 = vrot.lane.b32.xlu1 %v888_v44, %s3651_s28  ;;  %893 = vst [vmem:[#allocation1 + $0x3] ss:$4 sm:$0xff] %v3537_v62 }
 0x175   : > { %v3949_v12 = vpop.permute.xlu0 %724 }
 0x176   : > { %v3939_v32 = vpop.permute.xlu2 %735  ;;  %v3945_v56 = vpop.permute.xlu1 %726 }
 0x17a   : > { %v894_v47 = vld.sshfl [vmem:[#allocation1] sm:$0xff pattern:$0x73625140]  ;;  %v896_v57 = vld.sshfl [vmem:[#allocation1 + $0x8] sm:$0xff pattern:$0x73625140] }
 0x17b   : > { %898 = vrot.lane.b32.xlu0 %v894_v47, %s3652_s29  ;;  %903 = vst [vmem:[#allocation1] ss:$4 sm:$0xff] %v3537_v62  ;;  %900 = vrot.lane.b32.xlu2 %v896_v57, %s3652_s29 }
 0x17e   : > { %v3943_v31 = vpop.permute.xlu2 %737 }
 0x182   : > { %v906_v48 = vld.sshfl [vmem:[#allocation1 + $0x8] sm:$0xff pattern:$0x73625140]  ;;  %v904_v51 = vld.sshfl [vmem:[#allocation1] sm:$0xff pattern:$0x73625140] }
 0x183   : > { %910 = vrot.lane.b32.xlu0 %v906_v48, %s3653_s30  ;;  %908 = vrot.lane.b32.xlu1 %v904_v51, %s3653_s30  ;;  %914 = vst [vmem:[#allocation1 + $0x1] ss:$4 sm:$0xff] %v3537_v62 }
 0x185   : > { %v3957_v27 = vpop.permute.xlu0 %746 }
 0x186   : > { %v3951_v14 = vpop.permute.xlu2 %748  ;;  %5858 = vst [vmem:[#allocation11_spill] sm:$0xff] %v3957_v27 }
 0x187   : > { %5856 = vst [vmem:[#allocation9_spill] sm:$0xff] %v3951_v14 }
 0x18a   : > { %v917_v4 = vld.sshfl [vmem:[#allocation1 + $0x8] sm:$0xff pattern:$0x73625140]  ;;  %v915_v8 = vld.sshfl [vmem:[#allocation1] sm:$0xff pattern:$0x73625140] }
 0x18b   : > { %921 = vrot.lane.b32.xlu1 %v917_v4, %s3654_s4  ;;  %925 = vst [vmem:[#allocation1 + $0x2] ss:$4 sm:$0xff] %v3537_v62  ;;  %919 = vrot.lane.b32.xlu2 %v915_v8, %s3654_s4  ;;  %v3978_v8 = vld [vmem:[%s3704_s19 + $0x8] sm:$0xf] }
 0x18c   : > { %5860 = vst [vmem:[#allocation13_spill] sm:$0xff] %v3978_v8 }
 0x18d   : > { %v3954_v22 = vpop.permute.xlu1 %757  ;;  %v3965_v36 = vpop.permute.xlu0 %759 }
 0x18e   : > { %5857 = vst [vmem:[#allocation10_spill] sm:$0xff] %v3954_v22  ;;  %v3959_v34 = vpop.permute.xlu2 %767 }
 0x18f   : > { %5859 = vst [vmem:[#allocation12_spill] sm:$0xff] %v3965_v36 }
 0x192   : > { %v926_v17 = vld.sshfl [vmem:[#allocation1] sm:$0xff pattern:$0x73625140]  ;;  %v928_v19 = vld.sshfl [vmem:[#allocation1 + $0x8] sm:$0xff pattern:$0x73625140] }
 0x193   : > { %930 = vrot.lane.b32.xlu0 %v926_v17, %s3655_s5  ;;  %936 = vst [vmem:[#allocation1 + $0x3] ss:$4 sm:$0xff] %v3537_v62  ;;  %932 = vrot.lane.b32.xlu2 %v928_v19, %s3655_s5 }
 0x195   : > { %v3963_v35 = vpop.permute.xlu1 %625  ;;  %v624_v51 = vpop.permute.xlu0 %623 }
 0x196   : > { %v3969_v44 = vpop.permute.xlu2 %784 }
 0x19a   : > { %v939_v29 = vld.sshfl [vmem:[#allocation1 + $0x8] sm:$0xff pattern:$0x73625140]  ;;  %v937_v33 = vld.sshfl [vmem:[#allocation1] sm:$0xff pattern:$0x73625140] }
 0x19b   : > { %943 = vrot.lane.b32.xlu0 %v939_v29, %s3656_s6  ;;  %941 = vrot.lane.b32.xlu1 %v937_v33, %s3656_s6  ;;  %946 = vst [vmem:[#allocation1] ss:$4 sm:$0xff] %v3537_v62 }
 0x19d   : > { %v3971_v47 = vpop.permute.xlu1 %769 }
 0x19e   : > { %v628_v4 = vpop.permute.xlu2 %627 }
 0x1a2   : > { %v947_v39 = vld.sshfl [vmem:[#allocation1] sm:$0xff pattern:$0x73625140]  ;;  %v949_v40 = vld.sshfl [vmem:[#allocation1 + $0x8] sm:$0xff pattern:$0x73625140] }
 0x1a3   : > { %951 = vrot.lane.b32.xlu2 %v947_v39, %s3657_s7  ;;  %957 = vst [vmem:[#allocation1 + $0x1] ss:$4 sm:$0xff] %v3537_v62  ;;  %953 = vrot.lane.b32.xlu1 %v949_v40, %s3657_s7 }
 0x1a5   : > { %v3985_v33 = vpop.permute.xlu0 %782 }
 0x1a6   : > { %v3987_v39 = vpop.permute.xlu2 %803 }
 0x1aa   : > { %v3973_v57 = vld.sshfl [vmem:[#allocation1] sm:$0xff pattern:$0x73625140]  ;;  %v3975_v48 = vld.sshfl [vmem:[#allocation1 + $0x8] sm:$0xff pattern:$0x73625140] }
 0x1ab   : > { %961 = vst [vmem:[#allocation1 + $0x2] ss:$4 sm:$0xff] %v3537_v62 }
 0x1ad   : > { %v3980_v17 = vpop.permute.xlu1 %793  ;;  %v3993_v45 = vpop.permute.xlu0 %795 }
 0x1ae   : > { %5861 = vst [vmem:[#allocation14_spill] sm:$0xff] %v3980_v17  ;;  %v3995_v28 = vpop.permute.xlu2 %816 }
 0x1b2   : > { %v962_v19 = vld.sshfl [vmem:[#allocation1] sm:$0xff pattern:$0x73625140]  ;;  %v964_v29 = vld.sshfl [vmem:[#allocation1 + $0x8] sm:$0xff pattern:$0x73625140] }
 0x1b3   : > { %966 = vrot.lane.b32.xlu0 %v962_v19, %s3643_s20  ;;  %968 = vrot.lane.b32.xlu2 %v964_v29, %s3643_s20  ;;  %1071 = vst [vmem:[#allocation1 + $0x1] ss:$4 sm:$0xff] %v3978_v8 }
 0x1b5   : > { %v3989_v62 = vpop.permute.xlu1 %805  ;;  %v630_v2 = vpop.permute.xlu0 %629 }
 0x1ba   : > { %v1072_v40 = vld.sshfl [vmem:[#allocation1] sm:$0xff pattern:$0x73625140]  ;;  %v1074_v38 = vld.sshfl [vmem:[#allocation1 + $0x8] sm:$0xff pattern:$0x73625140] }
 0x1bb   : > { %1076 = vrot.lane.b32.xlu2 %v1072_v40, %s3643_s20  ;;  %1082 = vst [vmem:[#allocation1 + $0x2] ss:$4 sm:$0xff] %v3978_v8  ;;  %v634_v40 = vpop.permute.xlu2 %633 }
 0x1bd   : > { %v4006_v27 = vpop.permute.xlu0 %814 }
 0x1c2   : > { %v1083_v19 = vld.sshfl [vmem:[#allocation1] sm:$0xff pattern:$0x73625140]  ;;  %v1085_v29 = vld.sshfl [vmem:[#allocation1 + $0x8] sm:$0xff pattern:$0x73625140] }
 0x1c3   : > { %1078 = vrot.lane.b32.xlu2 %v1074_v38, %s3643_s20  ;;  %1093 = vst [vmem:[#allocation1 + $0x3] ss:$4 sm:$0xff] %v3978_v8 }
 0x1c5   : > { %v3999_v61 = vpop.permute.xlu1 %825 }
 0x1ca   : > { %v1094_v22 = vld.sshfl [vmem:[#allocation1] sm:$0xff pattern:$0x73625140]  ;;  %v1096_v36 = vld.sshfl [vmem:[#allocation1 + $0x8] sm:$0xff pattern:$0x73625140] }
 0x1cb   : > { %1087 = vrot.lane.b32.xlu2 %v1083_v19, %s3644_s21  ;;  %1100 = vrot.lane.b32.xlu1 %v1096_v36, %s3645_s22  ;;  %1103 = vst [vmem:[#allocation1] ss:$4 sm:$0xff] %v3978_v8  ;;  %v411_v19 = vsel %vm316_vm11, %v3816_v11, %v3828_v20  ;;  %v422_v36 = vsel %vm327_vm12, %v3830_v21, %v3824_v16 }
 0x1cc   : > { %v472_v11 = vsel %vm445_vm1, %v411_v19, %v422_v36  ;;  %v433_v16 = vsel %vm339_vm14, %v3838_v25, %v3840_v26  ;;  %v635_v20 = vsel %vm363_vm10, %v624_v51, %v3963_v35  ;;  %v444_v21 = vsel %vm351_vm15, %v3832_v24, %v3844_v30  ;;  %v4045_v35 = vpop.permute.xlu0 %827 }
 0x1cd   : > { %v632_v52 = vpop.permute.xlu1 %631  ;;  %v390_v25 = vsel %vm292_vm0, %v3814_v10, %v3808_v6  ;;  %v293_v6 = vsel %vm292_vm0, %v3760_v41, %v3768_v46 }
 0x1ce   : > { %v637_v5 = vsel %vm363_vm10, %v632_v52, %v634_v40  ;;  %v636_v52 = vsel %vm363_vm10, %v628_v4, %v630_v2  ;;  %v375_v2 = vsel %vm5838_vm13, %v3796_v63, %v3810_v7  ;;  %v328_v63 = vsel %vm327_vm12, %v3776_v53, %v3782_v55 }
 0x1cf   : > { %v645_v38 = vsel %vm451_vm4, %v637_v5, 0  ;;  %v4018_v5 = vpop.permute.xlu2 %836  ;;  %v464_v4 = vsel %vm445_vm1, %v375_v2, %v3734_v18  ;;  %v340_v7 = vsel %vm339_vm14, %v3780_v54, %v3788_v59  ;;  %vm304_vm13 = vcmask 1031168   ;;  %v4103_v2 = vld [vmem:[%s3704_s19 + $0xc] sm:$0xf] }
 0x1d0   : > { %648 = vmatpush.bf16.msra.mxu0 %v645_v38  ;;  %v401_v18 = vsel %vm304_vm13, %v3818_v13, %v3822_v15  ;;  %v466_v53 = vsel %vm448_vm3, %v464_v4, %v390_v25  ;;  %v457_v54 = vsel %vm445_vm1, %v328_v63, %v340_v7  ;;  %v352_v59 = vsel %vm351_vm15, %v3790_v60, %v3785_v58 }
 0x1d1   : > { %v468_v10 = vsel %vm451_vm4, %v466_v53, %v401_v18  ;;  %v364_v13 = vsel %vm363_vm10, %v3798_v1, %v3803_v3  ;;  %v447_v51 = vsel %vm445_vm1, %v3707_v0, %v293_v6  ;;  %v305_v58 = vsel %vm304_vm13, %v3762_v42, %v3772_v49 }
 0x1d2   : > { %v1104_v14 = vld.sshfl [vmem:[#allocation1] sm:$0xff pattern:$0x73625140]  ;;  %v1106_v17 = vld.sshfl [vmem:[#allocation1 + $0x8] sm:$0xff pattern:$0x73625140]  ;;  %v317_v1 = vsel %vm316_vm11, %v3764_v43, %v3774_v50  ;;  %v450_v0 = vsel %vm448_vm3, %v447_v51, %v305_v58 }
 0x1d3   : > { %1089 = vrot.lane.b32.xlu2 %v1085_v29, %s3644_s21  ;;  %1108 = vrot.lane.b32.xlu0 %v1104_v14, %s3646_s23  ;;  %1114 = vst [vmem:[#allocation1 + $0x1] ss:$4 sm:$0xff] %v3978_v8  ;;  %v474_v14 = vsel %vm448_vm3, %v472_v11, %v433_v16  ;;  %v453_v3 = vsel %vm451_vm4, %v450_v0, %v317_v1  ;;  %v4088_v43 = vld [vmem:[%s5834_s1] sm:$0xf] }
 0x1d4   : > { %649 = vmatpush.bf16.msra.mxu0 %v636_v52  ;;  %v476_v30 = vsel %vm451_vm4, %v474_v14, %v444_v21 }
 0x1d5   : > { %v4064_v15 = vpop.permute.xlu1 %838 }
 0x1d7   : > { %v883_v55 = vpop.permute.xlu2 %882 }
 0x1d8   : > { %650 = vmatpush.bf16.msra.mxu0 %v635_v20  ;;  %v974_v19 = vsel %vm445_vm1, %v3924_v37, %v883_v55 }
 0x1da   : > { %v1115_v26 = vld.sshfl [vmem:[#allocation1] sm:$0xff pattern:$0x73625140]  ;;  %v1117_v24 = vld.sshfl [vmem:[#allocation1 + $0x8] sm:$0xff pattern:$0x73625140] }
 0x1db   : > { %1098 = vrot.lane.b32.xlu2 %v1094_v22, %s3645_s22  ;;  %1125 = vst [vmem:[#allocation1 + $0x2] ss:$4 sm:$0xff] %v3978_v8  ;;  %v459_v22 = vsel %vm448_vm3, %v457_v54, %v352_v59 }
 0x1dc   : > { %651 = vmatpush.bf16.msra.mxu0 %v476_v30  ;;  %v461_v46 = vsel %vm451_vm4, %v459_v22, %v364_v13 }
 0x1dd   : > { %v881_v29 = vpop.permute.xlu0 %880 }
 0x1de   : > { %v884_v42 = vsel %vm292_vm0, %v881_v29, %v883_v55 }
 0x1df   : > { %v901_v49 = vpop.permute.xlu2 %900 }
 0x1e0   : > { %652 = vmatpush.bf16.msra.mxu0 %v468_v10 }
 0x1e2   : > { %v1128_v60 = vld.sshfl [vmem:[#allocation1 + $0x8] sm:$0xff pattern:$0x73625140]  ;;  %v1126_v41 = vld.sshfl [vmem:[#allocation1] sm:$0xff pattern:$0x73625140] }
 0x1e3   : > { %1110 = vrot.lane.b32.xlu2 %v1106_v17, %s3646_s23  ;;  %1132 = vrot.lane.b32.xlu1 %v1128_v60, %s3648_s25  ;;  %1136 = vst [vmem:[#allocation1 + $0x3] ss:$4 sm:$0xff] %v3978_v8  ;;  %v972_v17 = vsel %vm445_vm1, %v3922_v23, %v884_v42 }
 0x1e4   : > { %653 = vmatpush.bf16.msra.mxu0 %v461_v46  ;;  %1130 = vrot.lane.b32.xlu0 %v1126_v41, %s3648_s25 }
 0x1e5   : > { %v891_v40 = vpop.permute.xlu1 %890 }
 0x1e6   : > { %v976_v36 = vsel %vm448_vm3, %v972_v17, %v891_v40  ;;  %v977_v52 = vsel %vm448_vm3, %v974_v19, %v891_v40 }
 0x1e7   : > { %v920_v37 = vpop.permute.xlu2 %919 }
 0x1e8   : > { %654 = vmatpush.bf16.msra.mxu0 %v453_v3 }
 0x1ea   : > { %v1139_v50 = vld.sshfl [vmem:[#allocation1 + $0x8] sm:$0xff pattern:$0x73625140]  ;;  %v1137_v38 = vld.sshfl [vmem:[#allocation1] sm:$0xff pattern:$0x73625140] }
 0x1eb   : > { %1119 = vrot.lane.b32.xlu2 %v1115_v26, %s3647_s24  ;;  %1146 = vst [vmem:[#allocation1] ss:$4 sm:$0xff] %v3978_v8  ;;  %3534 = vmatmul.msk.bf16.vlgmr.msra.gmra.mxu0 %vm351_vm15, %v4088_v43 }
 0x1ec   : > { %1143 = vrot.lane.b32.xlu0 %v1139_v50, %s3649_s26 }
 0x1ed   : > { %v899_v23 = vpop.permute.xlu0 %898 }
 0x1ee   : > { %v902_v11 = vsel %vm5844_vm2, %v899_v23, %v901_v49  ;;  %v979_v16 = vsel %vm451_vm4, %v976_v36, %v899_v23 }
 0x1ef   : > { %1010 = vrot.lane.b32.xlu1 %v979_v16, %s3649_s26  ;;  %v981_v20 = vsel %vm451_vm4, %v977_v52, %v902_v11  ;;  %v933_v25 = vpop.permute.xlu2 %932 }
 0x1f2   : > { %v1147_v21 = vld.sshfl [vmem:[#allocation1] sm:$0xff pattern:$0x73625140]  ;;  %v1149_v14 = vld.sshfl [vmem:[#allocation1 + $0x8] sm:$0xff pattern:$0x73625140] }
 0x1f3   : > { %1121 = vrot.lane.b32.xlu2 %v1117_v24, %s3647_s24  ;;  %1158 = vst [vmem:[#allocation1 + $0x1] ss:$4 sm:$0xff] %v4103_v2 }
 0x1f4   : > { %1012 = vrot.lane.b32.xlu0 %v981_v20, %s3649_s26 }
 0x1f5   : > { %v909_v4 = vpop.permute.xlu1 %908  ;;  %v911_v7 = vpop.permute.xlu0 %910 }
 0x1f6   : > { %v912_v55 = vsel %vm5843_vm5, %v909_v4, %v911_v7  ;;  %v984_v22 = vsel %vm445_vm1, %v909_v4, %v920_v37 }
 0x1f7   : > { %1151 = vrot.lane.b32.xlu1 %v1147_v21, %s3650_s27 }
 0x1fa   : > { %v4110_v63 = vld.sshfl [vmem:[#allocation1] sm:$0xff pattern:$0x73625140] }
 0x1fb   : > { %1141 = vrot.lane.b32.xlu2 %v1137_v38, %s3649_s26  ;;  %1161 = vst [vmem:[#allocation1 + $0x2] ss:$4 sm:$0xff] %v4103_v2 }
 0x1fd   : > { %v922_v18 = vpop.permute.xlu1 %921  ;;  %v952_v24 = vpop.permute.xlu2 %951 }
 0x1fe   : > { %v923_v54 = vsel %vm5842_vm6, %v920_v37, %v922_v18  ;;  %v997_v52 = vsel %vm445_vm1, %v952_v24, %v3973_v57 }
 0x1ff   : > { %v987_v59 = vsel %vm445_vm1, %v912_v55, %v923_v54 }
 0x202   : > { %v1164_v26 = vld.sshfl [vmem:[#allocation1 + $0x8] sm:$0xff pattern:$0x73625140]  ;;  %v1162_v30 = vld.sshfl [vmem:[#allocation1] sm:$0xff pattern:$0x73625140] }
 0x203   : > { %1168 = vrot.lane.b32.xlu1 %v1164_v26, %s3643_s20  ;;  %1166 = vrot.lane.b32.xlu0 %v1162_v30, %s3643_s20  ;;  %1172 = vst [vmem:[#allocation1 + $0x3] ss:$4 sm:$0xff] %v4103_v2 }
 0x204   : > { %1153 = vrot.lane.b32.xlu2 %v1149_v14, %s3650_s27 }
 0x205   : > { %v931_v53 = vpop.permute.xlu0 %930 }
 0x206   : > { %v934_v6 = vsel %vm5841_vm7, %v931_v53, %v933_v25  ;;  %v989_v41 = vsel %vm448_vm3, %v984_v22, %v931_v53 }
 0x207   : > { %v991_v51 = vsel %vm448_vm3, %v987_v59, %v934_v6 }
 0x20a   : > { %v1175_v10 = vld.sshfl [vmem:[#allocation1 + $0x8] sm:$0xff pattern:$0x73625140]  ;;  %v1173_v13 = vld.sshfl [vmem:[#allocation1] sm:$0xff pattern:$0x73625140] }
 0x20b   : > { %1179 = vrot.lane.b32.xlu0 %v1175_v10, %s3644_s21  ;;  %1182 = vst [vmem:[#allocation1] ss:$4 sm:$0xff] %v4103_v2 }
 0x20c   : > { %1177 = vrot.lane.b32.xlu2 %v1173_v13, %s3644_s21 }
 0x20d   : > { %v944_v58 = vpop.permute.xlu0 %943  ;;  %v942_v60 = vpop.permute.xlu1 %941 }
 0x20e   : > { %v945_v46 = vsel %vm5840_vm8, %v942_v60, %v944_v58  ;;  %v969_v29 = vpop.permute.xlu2 %968  ;;  %v993_v0 = vsel %vm451_vm4, %v989_v41, %v942_v60 }
 0x20f   : > { %v995_v1 = vsel %vm451_vm4, %v991_v51, %v945_v46 }
 0x210   : > { %1016 = vrot.lane.b32.xlu1 %v995_v1, %s3649_s26 }
 0x212   : > { %v1183_v42 = vld.sshfl [vmem:[#allocation1] sm:$0xff pattern:$0x73625140]  ;;  %v1185_v49 = vld.sshfl [vmem:[#allocation1 + $0x8] sm:$0xff pattern:$0x73625140] }
 0x213   : > { %1193 = vst [vmem:[#allocation1 + $0x1] ss:$4 sm:$0xff] %v4103_v2 }
 0x214   : > { %1014 = vrot.lane.b32.xlu2 %v993_v0, %s3649_s26 }
 0x215   : > { %v954_v38 = vpop.permute.xlu1 %953 }
 0x216   : > { %v4134_v3 = vpop.permute.xlu2 %1076  ;;  %v955_v23 = vsel %vm5839_vm9, %v952_v24, %v954_v38 }
 0x217   : > { %5862 = vst [vmem:[#allocation15_spill] sm:$0xff] %v4134_v3  ;;  %v999_v20 = vsel %vm445_vm1, %v955_v23, %v3975_v48  ;;  %v4169_v48 = vld [vmem:[%s3704_s19 + $0x10] sm:$0xf]  ;;  %v807_v3 = vsel %vm316_vm11, %v3987_v39, %v3989_v62 }
 0x218   : > { %1187 = vrot.lane.b32.xlu1 %v1183_v42, %s3645_s22  ;;  %v1003_v14 = vsel %vm448_vm3, %v999_v20, %v969_v29 }
 0x21a   : > { %v1194_v17 = vld.sshfl [vmem:[#allocation1] sm:$0xff pattern:$0x73625140]  ;;  %v1196_v40 = vld.sshfl [vmem:[#allocation1 + $0x8] sm:$0xff pattern:$0x73625140] }
 0x21b   : > { %1198 = vrot.lane.b32.xlu0 %v1194_v17, %s3646_s23  ;;  %1204 = vst [vmem:[#allocation1 + $0x2] ss:$4 sm:$0xff] %v4103_v2 }
 0x21c   : > { %1189 = vrot.lane.b32.xlu2 %v1185_v49, %s3645_s22  ;;  %v3658_v49 = vmov 0  }
 0x21e   : > { %v4140_v50 = vpop.permute.xlu2 %1078 }
 0x21f   : > { %5863 = vst [vmem:[#allocation16_spill] sm:$0xff] %v4140_v50 }
 0x220   : > { %1200 = vrot.lane.b32.xlu1 %v1196_v40, %s3646_s23 }
 0x222   : > { %v1207_v19 = vld.sshfl [vmem:[#allocation1 + $0x8] sm:$0xff pattern:$0x73625140]  ;;  %v1205_v36 = vld.sshfl [vmem:[#allocation1] sm:$0xff pattern:$0x73625140] }
 0x223   : > { %1211 = vrot.lane.b32.xlu0 %v1207_v19, %s3647_s24  ;;  %1215 = vst [vmem:[#allocation1 + $0x3] ss:$4 sm:$0xff] %v4103_v2 }
 0x224   : > { %1209 = vrot.lane.b32.xlu2 %v1205_v36, %s3647_s24 }
 0x225   : > { %v967_v11 = vpop.permute.xlu0 %966 }
 0x226   : > { %v970_v16 = vsel %vm292_vm0, %v967_v11, %v969_v29  ;;  %v4150_v37 = vpop.permute.xlu2 %1087 }
 0x227   : > { %5864 = vst [vmem:[#allocation17_spill] sm:$0xff] %v4150_v37  ;;  %v1001_v21 = vsel %vm448_vm3, %v997_v52, %v970_v16 }
 0x22a   : > { %v1216_v4 = vld.sshfl [vmem:[#allocation1] sm:$0xff pattern:$0x73625140]  ;;  %v1218_v25 = vld.sshfl [vmem:[#allocation1 + $0x8] sm:$0xff pattern:$0x73625140] }
 0x22b   : > { %1018 = vrot.lane.b32.xlu0 %v1001_v21, %s3649_s26  ;;  %1220 = vrot.lane.b32.xlu1 %v1216_v4, %s3648_s25  ;;  %1255 = vst [vmem:[#allocation1] ss:$4 sm:$0xff] %v4103_v2 }
 0x22c   : > { %1020 = vrot.lane.b32.xlu2 %v1003_v14, %s3649_s26 }
 0x22e   : > { %v4160_v57 = vpop.permute.xlu2 %1089 }
 0x22f   : > { %5865 = vst [vmem:[#allocation18_spill] sm:$0xff] %v4160_v57 }
 0x232   : > { %v4162_v7 = vld.sshfl [vmem:[#allocation1] sm:$0xff pattern:$0x73625140]  ;;  %v4164_v26 = vld.sshfl [vmem:[#allocation1 + $0x8] sm:$0xff pattern:$0x73625140] }
 0x233   : > { %1259 = vst [vmem:[#allocation1 + $0x1] ss:$4 sm:$0xff] %v4103_v2  ;;  %v218_v2 = vlaneseq }
 0x234   : > { %1222 = vrot.lane.b32.xlu2 %v1218_v25, %s3648_s25 }
 0x235   : > { %v4183_v6 = vand.u32 127, %v218_v2 }
 0x236   : > { %v4171_v30 = vpop.permute.xlu2 %1098 }
 0x237   : > { %5866 = vst [vmem:[#allocation19_spill] sm:$0xff] %v4171_v30  ;;  %v224_v13 = vand.u32 65535, %v4183_v6  ;;  %v225_v22 = vshrl.u32 %v4183_v6, 16  ;;  %vm220_vm6 = vcmp.lt.s32.totalorder %v4183_v6, 80 }
 0x239   : > { %v228_v51 = vmul.u32 52428, %v224_v13  ;;  %v227_v60 = vmul.u32 52429, %v224_v13  ;;  %v229_v41 = vmul.u32 52429, %v225_v22  ;;  %v230_v0 = vmul.u32 52428, %v225_v22 }
 0x23a   : > { %v1262_v18 = vld.sshfl [vmem:[#allocation1 + $0x8] sm:$0xff pattern:$0x73625140]  ;;  %v1260_v24 = vld.sshfl [vmem:[#allocation1] sm:$0xff pattern:$0x73625140] }
 0x23b   : > { %1266 = vrot.lane.b32.xlu1 %v1262_v18, %s3643_s20  ;;  %1264 = vrot.lane.b32.xlu0 %v1260_v24, %s3643_s20  ;;  %1271 = vst [vmem:[#allocation1 + $0x2] ss:$4 sm:$0xff] %v4169_v48  ;;  %v231_v46 = vshll.u32 %v228_v51, 16  ;;  %v233_v42 = vshll.u32 %v229_v41, 16  ;;  %v232_v23 = vshrl.u32 %v228_v51, 16  ;;  %v234_v14 = vshrl.u32 %v229_v41, 16 }
 0x23d   : > { %vm235_vm9 = vc.u32 %v227_v60, %v231_v46  ;;  %v237_v40 = vadd.s32 %v231_v46, %v227_v60  ;;  %v4201_v21 = vpop.permute.xlu1 %1100 }
 0x23e   : > { %v4176_v55 = vpop.permute.xlu2 %1110  ;;  %v236_v17 = vsel %vm235_vm9, 1, %v3658_v49  ;;  %5868 = vst [vmem:[#allocation21_spill] sm:$0xff] %v4201_v21 }
 0x23f   : > { %v238_v38 = vadd.s32 %v236_v17, %v230_v0  ;;  %vm239_vm8 = vc.u32 %v237_v40, %v233_v42 }
 0x240   : > { %v240_v36 = vsel %vm239_vm8, 1, %v3658_v49 }
 0x241   : > { %v242_v52 = vadd.s32 %v240_v36, %v238_v38 }
 0x242   : > { %v1272_v53 = vld.sshfl [vmem:[#allocation1] sm:$0xff pattern:$0x73625140] }
 0x243   : > { %1277 = vst [vmem:[#allocation1 + $0x3] ss:$4 sm:$0xff] %v4169_v48  ;;  %1274 = vrot.lane.b32.xlu2 %v1272_v53, %s3651_s28  ;;  %v243_v4 = vadd.s32 %v242_v52, %v232_v23 }
 0x245   : > { %v4189_v58 = vpop.permute.xlu0 %1108  ;;  %v244_v18 = vadd.s32 %v243_v4, %v234_v14  ;;  %v4243_v4 = vld [vmem:[%s3704_s19 + $0xc] sm:$0xf] }
 0x246   : > { %v4185_v10 = vpop.permute.xlu2 %1119  ;;  %5872 = vst [vmem:[#allocation25_spill] sm:$0xff] %v4243_v4 }
 0x24a   : > { %v1280_v54 = vld.sshfl [vmem:[#allocation1 + $0x8] sm:$0xff pattern:$0x73625140]  ;;  %v1278_v59 = vld.sshfl [vmem:[#allocation1] sm:$0xff pattern:$0x73625140] }
 0x24b   : > { %1284 = vrot.lane.b32.xlu1 %v1280_v54, %s3652_s29  ;;  %1282 = vrot.lane.b32.xlu0 %v1278_v59, %s3652_s29  ;;  %1287 = vst [vmem:[#allocation1] ss:$4 sm:$0xff] %v4169_v48  ;;  %v245_v54 = vshrl.u32 %v244_v18, 3  ;;  %v3659_v18 = vmov 0.0  }
 0x24d   : > { %v246_v22 = vmul.u32 10, %v245_v54 }
 0x24e   : > { %v4194_v19 = vpop.permute.xlu2 %1121 }
 0x252   : > { %v1290_v29 = vld.sshfl [vmem:[#allocation1 + $0x8] sm:$0xff pattern:$0x73625140]  ;;  %v1288_v1 = vld.sshfl [vmem:[#allocation1] sm:$0xff pattern:$0x73625140] }
 0x253   : > { %1294 = vrot.lane.b32.xlu0 %v1290_v29, %s3653_s30  ;;  %1298 = vst [vmem:[#allocation1 + $0x1] ss:$4 sm:$0xff] %v4169_v48  ;;  %1292 = vrot.lane.b32.xlu2 %v1288_v1, %s3653_s30  ;;  %v247_v29 = vsub.s32 %v4183_v6, %v246_v22 }
 0x255   : > { %v4211_v59 = vpop.permute.xlu1 %1132  ;;  %vm250_vm8 = vcmp.ne.s32.totalorder %v247_v29, 0  ;;  %vm251_vm9 = vcmp.lt.s32.totalorder %v247_v29, 0  ;;  %v253_v38 = vadd.s32 10, %v247_v29 }
 0x256   : > { %v4198_v20 = vpop.permute.xlu0 %1130  ;;  %v4203_v25 = vpop.permute.xlu2 %1141  ;;  %5871 = vst [vmem:[#allocation24_spill] sm:$0xff] %v4211_v59  ;;  %vm252_vm7 = vmand %vm251_vm9, %vm250_vm8  ;;  %vm5891_vm8 = vcmask 80896   ;;  %vm5892_vm9 = vcmask 72704  }
 0x257   : > { %5867 = vst [vmem:[#allocation20_spill] sm:$0xff] %v4198_v20  ;;  %v254_v23 = vsel %vm252_vm7, %v253_v38, %v247_v29  ;;  %vm5889_vm7 = vcmask 89088  }
 0x258   : > { %5869 = vst [vmem:[#allocation22_spill] sm:$0xff] %v4203_v25  ;;  %vm255_vm5 = vcmp.lt.s32.totalorder %v254_v23, 8 }
 0x259   : > { %vm256_vm2 = vmand %vm220_vm6, %vm255_vm5  ;;  %vm5886_vm5 = vcmask 162816   ;;  %vm5888_vm6 = vcmask 154624  }
 0x25a   : > { %v1299_v11 = vld.sshfl [vmem:[#allocation1] sm:$0xff pattern:$0x73625140]  ;;  %v1301_v16 = vld.sshfl [vmem:[#allocation1 + $0x8] sm:$0xff pattern:$0x73625140] }
 0x25b   : > { %1303 = vrot.lane.b32.xlu1 %v1299_v11, %s3654_s4  ;;  %1309 = vst [vmem:[#allocation1 + $0x2] ss:$4 sm:$0xff] %v4169_v48  ;;  %1305 = vrot.lane.b32.xlu2 %v1301_v16, %s3654_s4 }
 0x25e   : > { %v4208_v2 = vpop.permute.xlu0 %1143  ;;  %v4218_v46 = vpop.permute.xlu2 %1153 }
 0x25f   : > { %5870 = vst [vmem:[#allocation23_spill] sm:$0xff] %v4208_v2 }
 0x261   : > { %v4226_v42 = vpop.permute.xlu1 %1010 }
 0x262   : > { %v1312_v24 = vld.sshfl [vmem:[#allocation1 + $0x8] sm:$0xff pattern:$0x73625140]  ;;  %v1310_v53 = vld.sshfl [vmem:[#allocation1] sm:$0xff pattern:$0x73625140] }
 0x263   : > { %1316 = vrot.lane.b32.xlu1 %v1312_v24, %s3655_s5  ;;  %1314 = vrot.lane.b32.xlu0 %v1310_v53, %s3655_s5  ;;  %1320 = vst [vmem:[#allocation1 + $0x3] ss:$4 sm:$0xff] %v4169_v48  ;;  %v4245_v24 = vsel %vm256_vm2, 1.0, %v3659_v18  ;;  %vm5873_vm2 = vcmask 867328  }
 0x264   : > { %v771_v39 = vsel %vm5873_vm2, %v3959_v34, %v3971_v47  ;;  %v739_v47 = vsel %vm339_vm14, %v3939_v32, %v3943_v31  ;;  %v5875_v31 = vld [vmem:[#allocation9_spill] sm:$0xff]  ;;  %vm5893_vm2 = vcmask 7168  }
 0x265   : > { %v857_v34 = vsel %vm445_vm1, %v771_v39, %v3870_v9  ;;  %v5874_v9 = vld [vmem:[#allocation14_spill] sm:$0xff] }
 0x266   : > { %v4224_v1 = vpop.permute.xlu0 %1012  ;;  %v4230_v40 = vpop.permute.xlu2 %1177 }
 0x268   : > { %v656_v13 = vpop.f32.mrf.mxu0 }
 0x269   : > { %v660_v51 = vpack.c.bf16 %v656_v13, %v656_v13  ;;  %v4234_v52 = vpop.permute.xlu1 %1151  ;;  %v665_v6 = vmul.f32 %v4245_v24, %v656_v13 }
 0x26a   : > { %v1321_v60 = vld.sshfl [vmem:[#allocation1] sm:$0xff pattern:$0x73625140]  ;;  %v1323_v41 = vld.sshfl [vmem:[#allocation1 + $0x8] sm:$0xff pattern:$0x73625140] }
 0x26b   : > { %1325 = vrot.lane.b32.xlu2 %v1321_v60, %s3656_s6  ;;  %661 = vst [vmem:[%s4216_s17] sm:$0xf] %v660_v51 }
 0x26c   : > { %1330 = vst [vmem:[#allocation1] ss:$4 sm:$0xff] %v4169_v48 }
 0x26e   : > { %v1015_v14 = vpop.permute.xlu2 %1014 }
 0x270   : > { %v658_v0 = vpop.f32.mrf.mxu0 }
 0x273   : > { %v1333_v49 = vld.sshfl [vmem:[#allocation1 + $0x8] sm:$0xff pattern:$0x73625140]  ;;  %v1331_v17 = vld.sshfl [vmem:[#allocation1] sm:$0xff pattern:$0x73625140] }
 0x274   : > { %1337 = vrot.lane.b32.xlu2 %v1333_v49, %s3657_s7  ;;  %1341 = vst [vmem:[#allocation1 + $0x1] ss:$4 sm:$0xff] %v4169_v48 }
 0x275   : > { %v4232_v36 = vpop.permute.xlu0 %1166  ;;  %v4250_v51 = vpop.permute.xlu1 %1168 }
 0x276   : > { %v4253_v60 = vpop.permute.xlu2 %1189 }
 0x27b   : > { %v4236_v11 = vld.sshfl [vmem:[#allocation1] sm:$0xff pattern:$0x73625140]  ;;  %v4238_v16 = vld.sshfl [vmem:[#allocation1 + $0x8] sm:$0xff pattern:$0x73625140] }
 0x27c   : > { %1345 = vst [vmem:[#allocation1 + $0x2] ss:$4 sm:$0xff] %v4169_v48  ;;  %v671_v48 = vmul.f32 %v665_v6, %v665_v6 }
 0x27d   : > { %v4247_v53 = vpop.permute.xlu0 %1179 }
 0x27e   : > { %v4262_v23 = vpop.permute.xlu2 %1209 }
 0x282   : > { %v1017_v38 = vpop.permute.xlu1 %1016 }
 0x283   : > { %v1346_v54 = vld.sshfl [vmem:[#allocation1] sm:$0xff pattern:$0x73625140]  ;;  %v1348_v22 = vld.sshfl [vmem:[#allocation1 + $0x8] sm:$0xff pattern:$0x73625140]  ;;  %v1023_v50 = vsel %vm363_vm10, %v1015_v14, %v1017_v38 }
 0x284   : > { %1455 = vst [vmem:[#allocation1 + $0x1] ss:$4 sm:$0xff] %v4243_v4  ;;  %v5880_v14 = vld [vmem:[#allocation10_spill] sm:$0xff] }
 0x286   : > { %v1021_v37 = vpop.permute.xlu2 %1020 }
 0x28a   : > { %v4271_v21 = vpop.permute.xlu1 %1187 }
 0x28b   : > { %v4255_v29 = vld.sshfl [vmem:[#allocation1] sm:$0xff pattern:$0x73625140]  ;;  %v4257_v0 = vld.sshfl [vmem:[#allocation1 + $0x8] sm:$0xff pattern:$0x73625140] }
 0x28c   : > { %1466 = vst [vmem:[#allocation1 + $0x2] ss:$4 sm:$0xff] %v4243_v4 }
 0x28d   : > { %v4260_v49 = vpop.permute.xlu0 %1198  ;;  %672 = vadd.xlane.f32.xlu1 %v671_v48  ;;  %666 = vadd.xlane.f32.xlu0 %v665_v6 }
 0x28e   : > { %v4349_v39 = vpop.permute.xlu2 %1222 }
 0x292   : > { %v4279_v2 = vpop.permute.xlu1 %1200 }
 0x293   : > { %v4264_v18 = vld.sshfl [vmem:[#allocation1] sm:$0xff pattern:$0x73625140]  ;;  %v4266_v30 = vld.sshfl [vmem:[#allocation1 + $0x8] sm:$0xff pattern:$0x73625140] }
 0x294   : > { %1477 = vst [vmem:[#allocation1 + $0x3] ss:$4 sm:$0xff] %v4243_v4 }
 0x295   : > { %v4269_v13 = vpop.permute.xlu0 %1211 }
 0x29b   : > { %v1480_v57 = vld.sshfl [vmem:[#allocation1 + $0x8] sm:$0xff pattern:$0x73625140]  ;;  %v4273_v8 = vld.sshfl [vmem:[#allocation1] sm:$0xff pattern:$0x73625140] }
 0x29c   : > { %1484 = vrot.lane.b32.xlu2 %v1480_v57, %s3645_s22  ;;  %1487 = vst [vmem:[#allocation1] ss:$4 sm:$0xff] %v4243_v4  ;;  %v818_v57 = vsel %vm327_vm12, %v4006_v27, %v3995_v28  ;;  %v1022_v28 = vsel %vm363_vm10, %v4226_v42, %v4224_v1  ;;  %v840_v27 = vsel %vm351_vm15, %v4018_v5, %v4064_v15  ;;  %v5878_v1 = vld [vmem:[#allocation3_spill] sm:$0xff] }
 0x29d   : > { %v1019_v6 = vpop.permute.xlu0 %1018  ;;  %v728_v5 = vsel %vm327_vm12, %v3949_v12, %v3945_v56  ;;  %v5876_v56 = vld [vmem:[#allocation11_spill] sm:$0xff] }
 0x29e   : > { %v1024_v48 = vsel %vm363_vm10, %v1019_v6, %v1021_v37  ;;  %v865_v37 = vsel %vm445_vm1, %v807_v3, %v818_v57  ;;  %v850_v32 = vsel %vm445_vm1, %v728_v5, %v739_v47  ;;  %v750_v12 = vsel %vm351_vm15, %v5876_v56, %v5875_v31  ;;  %v5881_v6 = vld [vmem:[#allocation2_spill] sm:$0xff]  ;;  %v5885_v47 = vld [vmem:[#allocation7_spill] sm:$0xff] }
 0x29f   : > { %v1028_v25 = vsel %vm451_vm4, %v1024_v48, 0  ;;  %v852_v38 = vsel %vm448_vm3, %v850_v32, %v750_v12  ;;  %v5882_v57 = vld [vmem:[#allocation6_spill] sm:$0xff] }
 0x2a0   : > { %1031 = vmatpush.bf16.msra.mxu1 %v1028_v25  ;;  %v829_v25 = vsel %vm339_vm14, %v3999_v61, %v4045_v35  ;;  %v786_v61 = vsel %vm292_vm0, %v3985_v33, %v3969_v44  ;;  %v4319_v35 = vpop.permute.xlu1 %1220  ;;  %v797_v33 = vsel %vm304_vm13, %v5874_v9, %v3993_v45  ;;  %v5879_v45 = vld [vmem:[#allocation12_spill] sm:$0xff] }
 0x2a1   : > { %1327 = vrot.lane.b32.xlu0 %v1323_v41, %s3656_s6  ;;  %v867_v62 = vsel %vm448_vm3, %v865_v37, %v829_v25  ;;  %v5877_v41 = vld [vmem:[#allocation4_spill] sm:$0xff]  ;;  %v5883_v37 = vld [vmem:[#allocation5_spill] sm:$0xff] }
 0x2a2   : > { %v869_v15 = vsel %vm451_vm4, %v867_v62, %v840_v27  ;;  %v696_v42 = vsel %vm292_vm0, %v5878_v1, %v5877_v41  ;;  %v707_v25 = vsel %vm304_vm13, %v5883_v37, %v5882_v57 }
 0x2a3   : > { %v1488_v20 = vld.sshfl [vmem:[#allocation1] sm:$0xff pattern:$0x73625140]  ;;  %v4289_v59 = vld.sshfl [vmem:[#allocation1 + $0x8] sm:$0xff pattern:$0x73625140]  ;;  %v842_v48 = vsel %vm445_vm1, %v5881_v6, %v696_v42 }
 0x2a4   : > { %1032 = vmatpush.bf16.msra.mxu1 %v1023_v50  ;;  %1498 = vst [vmem:[#allocation1 + $0x1] ss:$4 sm:$0xff] %v4243_v4  ;;  %v859_v50 = vsel %vm448_vm3, %v857_v34, %v786_v61  ;;  %v5884_v34 = vld [vmem:[#allocation8_spill] sm:$0xff]  ;;  %v3546_v42 = vld [vmem:[%s3704_s19 + $0x10] sm:$0xf] }
 0x2a5   : > { %v718_v5 = vsel %vm316_vm11, %v5885_v47, %v5884_v34  ;;  %v4410_v47 = vld [vmem:[%s3704_s19 + $0x14] sm:$0xf] }
 0x2a6   : > { %1335 = vrot.lane.b32.xlu1 %v1331_v17, %s3657_s7  ;;  %v861_v17 = vsel %vm451_vm4, %v859_v50, %v797_v33  ;;  %v1275_v50 = vpop.permute.xlu2 %1274 }
 0x2a8   : > { %1033 = vmatpush.bf16.msra.mxu1 %v1022_v28 }
 0x2a9   : > { %1350 = vrot.lane.b32.xlu0 %v1346_v54, %s3643_s20  ;;  %v761_v54 = vsel %vm363_vm10, %v5880_v14, %v5879_v45 }
 0x2aa   : > { %v854_v28 = vsel %vm451_vm4, %v852_v38, %v761_v54 }
 0x2ab   : > { %v4322_v3 = vld.sshfl [vmem:[#allocation1] sm:$0xff pattern:$0x73625140]  ;;  %v4324_v44 = vld.sshfl [vmem:[#allocation1 + $0x8] sm:$0xff pattern:$0x73625140] }
 0x2ac   : > { %1034 = vmatpush.bf16.msra.mxu1 %v869_v15  ;;  %1509 = vst [vmem:[#allocation1 + $0x2] ss:$4 sm:$0xff] %v4243_v4  ;;  %v844_v15 = vsel %vm448_vm3, %v842_v48, %v707_v25 }
 0x2ad   : > { %v1267_v27 = vpop.permute.xlu1 %1266  ;;  %v1265_v62 = vpop.permute.xlu0 %1264 }
 0x2ae   : > { %1352 = vrot.lane.b32.xlu1 %v1348_v22, %s3643_s20  ;;  %v1268_v9 = vsel %vm292_vm0, %v1265_v62, %v1267_v27  ;;  %v1358_v33 = vsel %vm445_vm1, %v4164_v26, %v1267_v27 }
 0x2af   : > { %v1356_v32 = vsel %vm445_vm1, %v4162_v7, %v1268_v9  ;;  %v1361_v56 = vsel %vm448_vm3, %v1358_v33, %v1275_v50 }
 0x2b0   : > { %1035 = vmatpush.bf16.msra.mxu1 %v861_v17  ;;  %v1360_v41 = vsel %vm448_vm3, %v1356_v32, %v1275_v50 }
 0x2b1   : > { %1492 = vrot.lane.b32.xlu0 %v1488_v20, %s3646_s23  ;;  %v846_v20 = vsel %vm451_vm4, %v844_v15, %v718_v5 }
 0x2b3   : > { %v1510_v22 = vld.sshfl [vmem:[#allocation1] sm:$0xff pattern:$0x73625140]  ;;  %v1512_v61 = vld.sshfl [vmem:[#allocation1 + $0x8] sm:$0xff pattern:$0x73625140] }
 0x2b4   : > { %1514 = vrot.lane.b32.xlu2 %v1510_v22, %s3648_s25  ;;  %1036 = vmatpush.bf16.msra.mxu1 %v854_v28  ;;  %1520 = vst [vmem:[#allocation1 + $0x3] ss:$4 sm:$0xff] %v4243_v4 }
 0x2b6   : > { %1460 = vrot.lane.b32.xlu1 %v4255_v29, %s3643_s20 }
 0x2b8   : > { %1037 = vmatpush.bf16.msra.mxu1 %v846_v20 }
 0x2b9   : > { %1516 = vrot.lane.b32.xlu0 %v1512_v61, %s3648_s25 }
 0x2bb   : > { %v1523_v31 = vld.sshfl [vmem:[#allocation1 + $0x8] sm:$0xff pattern:$0x73625140]  ;;  %3538 = vmatmul.msk.bf16.vlgmr.msra.gmra.mxu1 %vm351_vm15, %v4088_v43  ;;  %v1521_v29 = vld.sshfl [vmem:[#allocation1] sm:$0xff pattern:$0x73625140] }
 0x2bc   : > { %1527 = vrot.lane.b32.xlu2 %v1523_v31, %s3649_s26  ;;  %1530 = vst [vmem:[#allocation1] ss:$4 sm:$0xff] %v4243_v4 }
 0x2bd   : > { %v1285_v12 = vpop.permute.xlu1 %1284  ;;  %v1283_v26 = vpop.permute.xlu0 %1282 }
 0x2be   : > { %v1286_v1 = vsel %vm5886_vm5, %v1283_v26, %v1285_v12  ;;  %1462 = vrot.lane.b32.xlu1 %v4257_v0, %s3643_s20  ;;  %v1363_v43 = vsel %vm451_vm4, %v1360_v41, %v1283_v26  ;;  %vm5908_vm5 = vcmask 867328  }
 0x2bf   : > { %v1365_v7 = vsel %vm451_vm4, %v1361_v56, %v1286_v1 }
 0x2c1   : > { %1396 = vrot.lane.b32.xlu0 %v1365_v7, %s3649_s26 }
 0x2c3   : > { %v1531_v17 = vld.sshfl [vmem:[#allocation1] sm:$0xff pattern:$0x73625140]  ;;  %v1533_v45 = vld.sshfl [vmem:[#allocation1 + $0x8] sm:$0xff pattern:$0x73625140] }
 0x2c4   : > { %1394 = vrot.lane.b32.xlu2 %v1363_v43, %s3649_s26  ;;  %1542 = vst [vmem:[#allocation1 + $0x1] ss:$4 sm:$0xff] %v3546_v42 }
 0x2c5   : > { %v1295_v25 = vpop.permute.xlu0 %1294 }
 0x2c6   : > { %1471 = vrot.lane.b32.xlu1 %v4264_v18, %s3644_s21 }
 0x2c9   : > { %1535 = vrot.lane.b32.xlu0 %v1531_v17, %s3650_s27 }
 0x2cb   : > { %v4385_v14 = vld.sshfl [vmem:[#allocation1] sm:$0xff pattern:$0x73625140] }
 0x2cc   : > { %1545 = vst [vmem:[#allocation1 + $0x2] ss:$4 sm:$0xff] %v3546_v42 }
 0x2ce   : > { %1473 = vrot.lane.b32.xlu1 %v4266_v30, %s3644_s21 }
 0x2d3   : > { %v1548_v0 = vld.sshfl [vmem:[#allocation1 + $0x8] sm:$0xff pattern:$0x73625140]  ;;  %v1546_v54 = vld.sshfl [vmem:[#allocation1] sm:$0xff pattern:$0x73625140] }
 0x2d4   : > { %1552 = vrot.lane.b32.xlu0 %v1548_v0, %s3643_s20  ;;  %1550 = vrot.lane.b32.xlu2 %v1546_v54, %s3643_s20  ;;  %1556 = vst [vmem:[#allocation1 + $0x3] ss:$4 sm:$0xff] %v3546_v42 }
 0x2d5   : > { %v1315_v62 = vpop.permute.xlu0 %1314 }
 0x2d6   : > { %1482 = vrot.lane.b32.xlu1 %v4273_v8, %s3645_s22 }
 0x2db   : > { %v1557_v38 = vld.sshfl [vmem:[#allocation1] sm:$0xff pattern:$0x73625140]  ;;  %v1559_v18 = vld.sshfl [vmem:[#allocation1 + $0x8] sm:$0xff pattern:$0x73625140] }
 0x2dc   : > { %1563 = vrot.lane.b32.xlu2 %v1559_v18, %s3644_s21  ;;  %1566 = vst [vmem:[#allocation1] ss:$4 sm:$0xff] %v3546_v42 }
 0x2de   : > { %1494 = vrot.lane.b32.xlu1 %v4289_v59, %s3646_s23  ;;  %v1293_v59 = vpop.permute.xlu2 %1292 }
 0x2df   : > { %v1296_v31 = vsel %vm5888_vm6, %v1293_v59, %v1295_v25  ;;  %vm5918_vm6 = vcmask 162816  }
 0x2e3   : > { %v1567_v6 = vld.sshfl [vmem:[#allocation1] sm:$0xff pattern:$0x73625140]  ;;  %v1569_v30 = vld.sshfl [vmem:[#allocation1 + $0x8] sm:$0xff pattern:$0x73625140] }
 0x2e4   : > { %1571 = vrot.lane.b32.xlu0 %v1567_v6, %s3645_s22  ;;  %1577 = vst [vmem:[#allocation1 + $0x1] ss:$4 sm:$0xff] %v3546_v42 }
 0x2e6   : > { %1503 = vrot.lane.b32.xlu1 %v4322_v3, %s3647_s24  ;;  %v1304_v3 = vpop.permute.xlu1 %1303  ;;  %v1306_v27 = vpop.permute.xlu2 %1305 }
 0x2e7   : > { %v1368_v5 = vsel %vm445_vm1, %v1293_v59, %v1304_v3 }
 0x2e8   : > { %v1373_v15 = vsel %vm448_vm3, %v1368_v5, %v1315_v62 }
 0x2eb   : > { %v1580_v48 = vld.sshfl [vmem:[#allocation1 + $0x8] sm:$0xff pattern:$0x73625140]  ;;  %v1578_v57 = vld.sshfl [vmem:[#allocation1] sm:$0xff pattern:$0x73625140] }
 0x2ec   : > { %1584 = vrot.lane.b32.xlu0 %v1580_v48, %s3646_s23  ;;  %1588 = vst [vmem:[#allocation1 + $0x2] ss:$4 sm:$0xff] %v3546_v42 }
 0x2ee   : > { %1505 = vrot.lane.b32.xlu1 %v4324_v44, %s3647_s24  ;;  %v1317_v44 = vpop.permute.xlu1 %1316  ;;  %v1326_v20 = vpop.permute.xlu2 %1325 }
 0x2ef   : > { %v1377_v32 = vsel %vm451_vm4, %v1373_v15, %v1326_v20  ;;  %v1318_v12 = vsel %vm5891_vm8, %v1315_v62, %v1317_v44 }
 0x2f3   : > { %v1589_v8 = vld.sshfl [vmem:[#allocation1] sm:$0xff pattern:$0x73625140]  ;;  %v1591_v37 = vld.sshfl [vmem:[#allocation1 + $0x8] sm:$0xff pattern:$0x73625140] }
 0x2f4   : > { %1599 = vst [vmem:[#allocation1 + $0x3] ss:$4 sm:$0xff] %v3546_v42 }
 0x2f6   : > { %1525 = vrot.lane.b32.xlu1 %v1521_v29, %s3649_s26  ;;  %v1307_v29 = vsel %vm5889_vm7, %v1304_v3, %v1306_v27  ;;  %v1338_v54 = vpop.permute.xlu2 %1337 }
 0x2f7   : > { %v1371_v26 = vsel %vm445_vm1, %v1296_v31, %v1307_v29 }
 0x2f8   : > { %v1375_v43 = vsel %vm448_vm3, %v1371_v26, %v1318_v12 }
 0x2fb   : > { %v1600_v22 = vld.sshfl [vmem:[#allocation1] sm:$0xff pattern:$0x73625140]  ;;  %v1602_v28 = vld.sshfl [vmem:[#allocation1 + $0x8] sm:$0xff pattern:$0x73625140] }
 0x2fc   : > { %1639 = vst [vmem:[#allocation1] ss:$4 sm:$0xff] %v3546_v42 }
 0x2fe   : > { %1537 = vrot.lane.b32.xlu1 %v1533_v45, %s3650_s27 }
 0x300   : > { %v4414_v9 = vpop.xlane.xlu0 %666  ;;  %v4421_v56 = vpop.xlane.xlu1 %672 }
 0x301   : > { %5887 = vst [vmem:[#allocation14_spill] sm:$0xff] %v4414_v9 }
 0x302   : > { %5890 = vst [vmem:[#allocation9_spill] sm:$0xff] %v4421_v56 }
 0x303   : > { %v4404_v61 = vld.sshfl [vmem:[#allocation1] sm:$0xff pattern:$0x73625140]  ;;  %v4406_v34 = vld.sshfl [vmem:[#allocation1 + $0x8] sm:$0xff pattern:$0x73625140] }
 0x304   : > { %1643 = vst [vmem:[#allocation1 + $0x1] ss:$4 sm:$0xff] %v3546_v42 }
 0x306   : > { %1561 = vrot.lane.b32.xlu1 %v1557_v38, %s3644_s21 }
 0x30b   : > { %v1646_v33 = vld.sshfl [vmem:[#allocation1 + $0x8] sm:$0xff pattern:$0x73625140]  ;;  %v1644_v50 = vld.sshfl [vmem:[#allocation1] sm:$0xff pattern:$0x73625140] }
 0x30c   : > { %1655 = vst [vmem:[#allocation1 + $0x2] ss:$4 sm:$0xff] %v4410_v47 }
 0x30e   : > { %1398 = vrot.lane.b32.xlu1 %v1377_v32, %s3649_s26 }
 0x313   : > { %v1328_v41 = vpop.permute.xlu0 %1327  ;;  %v1656_v1 = vld.sshfl [vmem:[#allocation1] sm:$0xff pattern:$0x73625140] }
 0x314   : > { %v1329_v7 = vsel %vm5892_vm9, %v1326_v20, %v1328_v41  ;;  %1661 = vst [vmem:[#allocation1 + $0x3] ss:$4 sm:$0xff] %v4410_v47  ;;  %v4484_v41 = vpop.permute.xlu2 %1484  ;;  %vm5923_vm9 = vcmask 154624  }
 0x315   : > { %v1379_v42 = vsel %vm451_vm4, %v1375_v43, %v1329_v7  ;;  %5899 = vst [vmem:[#allocation2_spill] sm:$0xff] %v4484_v41  ;;  %v4489_v7 = vld [vmem:[%s3704_s19 + $0x10] sm:$0xf] }
 0x316   : > { %1400 = vrot.lane.b32.xlu2 %v1379_v42, %s3649_s26  ;;  %1573 = vrot.lane.b32.xlu1 %v1569_v30, %s3645_s22  ;;  %5901 = vst [vmem:[#allocation5_spill] sm:$0xff] %v4489_v7 }
 0x318   : > { %v1336_v17 = vpop.permute.xlu1 %1335 }
 0x319   : > { %v1339_v6 = vsel %vm5893_vm2, %v1336_v17, %v1338_v54  ;;  %v1381_v48 = vsel %vm445_vm1, %v1336_v17, %v4236_v11  ;;  %vm5924_vm2 = vcmask 72704  }
 0x31b   : > { %v1664_v45 = vld.sshfl [vmem:[#allocation1 + $0x8] sm:$0xff pattern:$0x73625140]  ;;  %v1662_v0 = vld.sshfl [vmem:[#allocation1] sm:$0xff pattern:$0x73625140]  ;;  %v1351_v38 = vpop.permute.xlu0 %1350 }
 0x31c   : > { %1671 = vst [vmem:[#allocation1] ss:$4 sm:$0xff] %v4410_v47 }
 0x31e   : > { %1593 = vrot.lane.b32.xlu1 %v1589_v8, %s3647_s24  ;;  %1582 = vrot.lane.b32.xlu2 %v1578_v57, %s3646_s23  ;;  %v1383_v8 = vsel %vm445_vm1, %v1339_v6, %v4238_v16 }
 0x320   : > { %v1353_v18 = vpop.permute.xlu1 %1352 }
 0x321   : > { %v1354_v59 = vsel %vm292_vm0, %v1351_v38, %v1353_v18  ;;  %v1387_v57 = vsel %vm448_vm3, %v1383_v8, %v1353_v18 }
 0x322   : > { %v1385_v30 = vsel %vm448_vm3, %v1381_v48, %v1354_v59 }
 0x323   : > { %1402 = vrot.lane.b32.xlu0 %v1385_v30, %s3649_s26  ;;  %v1672_v25 = vld.sshfl [vmem:[#allocation1] sm:$0xff pattern:$0x73625140]  ;;  %v1674_v3 = vld.sshfl [vmem:[#allocation1 + $0x8] sm:$0xff pattern:$0x73625140]  ;;  %v4492_v17 = vpop.permute.xlu0 %1492 }
 0x324   : > { %1682 = vst [vmem:[#allocation1 + $0x1] ss:$4 sm:$0xff] %v4410_v47 }
 0x325   : > { %5902 = vst [vmem:[#allocation8_spill] sm:$0xff] %v4492_v17 }
 0x326   : > { %1404 = vrot.lane.b32.xlu1 %v1387_v57, %s3649_s26  ;;  %1595 = vrot.lane.b32.xlu2 %v1591_v37, %s3647_s24 }
 0x328   : > { %v4446_v11 = vpop.permute.xlu1 %1460 }
 0x329   : > { %5894 = vst [vmem:[#allocation11_spill] sm:$0xff] %v4446_v11 }
 0x32b   : > { %1604 = vrot.lane.b32.xlu0 %v1600_v22, %s3648_s25  ;;  %v1683_v27 = vld.sshfl [vmem:[#allocation1] sm:$0xff pattern:$0x73625140]  ;;  %v1685_v62 = vld.sshfl [vmem:[#allocation1 + $0x8] sm:$0xff pattern:$0x73625140]  ;;  %v4502_v38 = vpop.permute.xlu0 %1516 }
 0x32c   : > { %1693 = vst [vmem:[#allocation1 + $0x2] ss:$4 sm:$0xff] %v4410_v47 }
 0x32d   : > { %5904 = vst [vmem:[#allocation26_spill] sm:$0xff] %v4502_v38 }
 0x32e   : > { %1606 = vrot.lane.b32.xlu1 %v1602_v28, %s3648_s25  ;;  %1648 = vrot.lane.b32.xlu2 %v1644_v50, %s3643_s20 }
 0x330   : > { %v4452_v16 = vpop.permute.xlu1 %1462 }
 0x331   : > { %5895 = vst [vmem:[#allocation4_spill] sm:$0xff] %v4452_v16 }
 0x333   : > { %1650 = vrot.lane.b32.xlu0 %v1646_v33, %s3643_s20  ;;  %v1696_v44 = vld.sshfl [vmem:[#allocation1 + $0x8] sm:$0xff pattern:$0x73625140]  ;;  %v1694_v5 = vld.sshfl [vmem:[#allocation1] sm:$0xff pattern:$0x73625140] }
 0x334   : > { %1704 = vst [vmem:[#allocation1 + $0x3] ss:$4 sm:$0xff] %v4410_v47 }
 0x336   : > { %1658 = vrot.lane.b32.xlu1 %v1656_v1, %s3651_s28  ;;  %1666 = vrot.lane.b32.xlu2 %v1662_v0, %s3652_s29  ;;  %v4497_v0 = vpop.permute.xlu2 %1514 }
 0x337   : > { %5903 = vst [vmem:[#allocation7_spill] sm:$0xff] %v4497_v0 }
 0x338   : > { %v4458_v37 = vpop.permute.xlu1 %1471  ;;  %v1039_v20 = vpop.f32.mrf.mxu1 }
 0x339   : > { %5896 = vst [vmem:[#allocation3_spill] sm:$0xff] %v4458_v37  ;;  %v1043_v33 = vpack.c.bf16 %v1039_v20, %v1039_v20  ;;  %v1049_v57 = vmul.f32 %v4245_v24, %v1039_v20 }
 0x33b   : > { %1668 = vrot.lane.b32.xlu0 %v1664_v45, %s3652_s29  ;;  %v4461_v22 = vld.sshfl [vmem:[#allocation1] sm:$0xff pattern:$0x73625140]  ;;  %v1707_v28 = vld.sshfl [vmem:[#allocation1 + $0x8] sm:$0xff pattern:$0x73625140] }
 0x33c   : > { %1714 = vst [vmem:[#allocation1] ss:$4 sm:$0xff] %v4410_v47 }
 0x33d   : > { %3539 = vst [vmem:[%s4216_s17 + $0x4] sm:$0xf] %v1043_v33 }
 0x33e   : > { %1676 = vrot.lane.b32.xlu1 %v1672_v25, %s3653_s30  ;;  %1678 = vrot.lane.b32.xlu2 %v1674_v3, %s3653_s30  ;;  %v4506_v6 = vpop.permute.xlu2 %1527  ;;  %v4515_v25 = vpop.permute.xlu0 %1396 }
 0x33f   : > { %5905 = vst [vmem:[#allocation27_spill] sm:$0xff] %v4506_v6 }
 0x340   : > { %v4466_v15 = vpop.permute.xlu1 %1473  ;;  %v1041_v29 = vpop.f32.mrf.mxu1 }
 0x341   : > { %5897 = vst [vmem:[#allocation12_spill] sm:$0xff] %v4466_v15 }
 0x343   : > { %1687 = vrot.lane.b32.xlu0 %v1683_v27, %s3654_s4  ;;  %v1715_v50 = vld.sshfl [vmem:[#allocation1] sm:$0xff pattern:$0x73625140]  ;;  %v4469_v32 = vld.sshfl [vmem:[#allocation1 + $0x8] sm:$0xff pattern:$0x73625140] }
 0x344   : > { %1725 = vst [vmem:[#allocation1 + $0x1] ss:$4 sm:$0xff] %v4410_v47 }
 0x346   : > { %1689 = vrot.lane.b32.xlu1 %v1685_v62, %s3654_s4  ;;  %1698 = vrot.lane.b32.xlu2 %v1694_v5, %s3655_s5  ;;  %v1395_v27 = vpop.permute.xlu2 %1394  ;;  %v1055_v5 = vmul.f32 %v1049_v57, %v1049_v57 }
 0x348   : > { %v4475_v31 = vpop.permute.xlu1 %1482 }
 0x349   : > { %5898 = vst [vmem:[#allocation10_spill] sm:$0xff] %v4475_v31 }
 0x34b   : > { %1700 = vrot.lane.b32.xlu0 %v1696_v44, %s3655_s5  ;;  %v4478_v12 = vld.sshfl [vmem:[#allocation1] sm:$0xff pattern:$0x73625140]  ;;  %v4480_v26 = vld.sshfl [vmem:[#allocation1 + $0x8] sm:$0xff pattern:$0x73625140]  ;;  %v4523_v44 = vpop.permute.xlu0 %1535 }
 0x34c   : > { %1729 = vst [vmem:[#allocation1 + $0x2] ss:$4 sm:$0xff] %v4410_v47 }
 0x34e   : > { %1711 = vrot.lane.b32.xlu2 %v1707_v28, %s3656_s6  ;;  %v4529_v29 = vpop.permute.xlu2 %1550 }
 0x350   : > { %v4486_v1 = vpop.permute.xlu1 %1494 }
 0x351   : > { %5900 = vst [vmem:[#allocation6_spill] sm:$0xff] %v4486_v1  ;;  %v1202_v1 = vsel %vm327_vm12, %v4260_v49, %v4279_v2  ;;  %v1155_v2 = vsel %vm5908_vm5, %v4234_v52, %v4218_v46  ;;  %v1170_v46 = vsel %vm292_vm0, %v4232_v36, %v4250_v51  ;;  %v1123_v52 = vsel %vm339_vm14, %v4185_v10, %v4194_v19 }
 0x352   : > { %vm5926_vm5 = vcmask 7168  }
 0x353   : > { %v1732_v43 = vld.sshfl [vmem:[#allocation1 + $0x8] sm:$0xff pattern:$0x73625140]  ;;  %v1730_v42 = vld.sshfl [vmem:[#allocation1] sm:$0xff pattern:$0x73625140] }
 0x354   : > { %1839 = vst [vmem:[#allocation1 + $0x1] ss:$4 sm:$0xff] %v4489_v7 }
 0x356   : > { %1734 = vrot.lane.b32.xlu2 %v1730_v42, %s3643_s20  ;;  %v4533_v42 = vpop.permute.xlu0 %1552 }
 0x358   : > { %v4495_v45 = vpop.permute.xlu1 %1503 }
 0x35b   : > { %v1840_v47 = vld.sshfl [vmem:[#allocation1] sm:$0xff pattern:$0x73625140]  ;;  %v4499_v54 = vld.sshfl [vmem:[#allocation1 + $0x8] sm:$0xff pattern:$0x73625140] }
 0x35c   : > { %1850 = vst [vmem:[#allocation1 + $0x2] ss:$4 sm:$0xff] %v4489_v7 }
 0x35e   : > { %v4542_v31 = vpop.permute.xlu0 %1571 }
 0x360   : > { %v4504_v18 = vpop.permute.xlu1 %1505 }
 0x363   : > { %v4508_v48 = vld.sshfl [vmem:[#allocation1] sm:$0xff pattern:$0x73625140]  ;;  %v4510_v59 = vld.sshfl [vmem:[#allocation1 + $0x8] sm:$0xff pattern:$0x73625140] }
 0x364   : > { %1861 = vst [vmem:[#allocation1 + $0x3] ss:$4 sm:$0xff] %v4489_v7 }
 0x366   : > { %v4554_v16 = vpop.permute.xlu0 %1584 }
 0x368   : > { %v4513_v30 = vpop.permute.xlu1 %1525 }
 0x369   : > { %5906 = vst [vmem:[#allocation28_spill] sm:$0xff] %v4513_v30 }
 0x36b   : > { %v1864_v3 = vld.sshfl [vmem:[#allocation1 + $0x8] sm:$0xff pattern:$0x73625140]  ;;  %v4517_v8 = vld.sshfl [vmem:[#allocation1] sm:$0xff pattern:$0x73625140] }
 0x36c   : > { %1871 = vst [vmem:[#allocation1] ss:$4 sm:$0xff] %v4489_v7 }
 0x370   : > { %v4521_v62 = vpop.permute.xlu1 %1537  ;;  %1050 = vadd.xlane.f32.xlu1 %v1049_v57  ;;  %v4540_v57 = vpop.permute.xlu2 %1563 }
 0x373   : > { %v1874_v28 = vld.sshfl [vmem:[#allocation1 + $0x8] sm:$0xff pattern:$0x73625140]  ;;  %v4525_v33 = vld.sshfl [vmem:[#allocation1] sm:$0xff pattern:$0x73625140] }
 0x374   : > { %1878 = vrot.lane.b32.xlu2 %v1874_v28, %s3646_s23  ;;  %1882 = vst [vmem:[#allocation1 + $0x1] ss:$4 sm:$0xff] %v4489_v7 }
 0x375   : > { %1056 = vadd.xlane.f32.xlu0 %v1055_v5 }
 0x378   : > { %v4531_v20 = vpop.permute.xlu1 %1561  ;;  %v1401_v37 = vpop.permute.xlu2 %1400 }
 0x379   : > { %5907 = vst [vmem:[#allocation29_spill] sm:$0xff] %v4531_v20 }
 0x37b   : > { %v4535_v56 = vld.sshfl [vmem:[#allocation1] sm:$0xff pattern:$0x73625140]  ;;  %v4537_v9 = vld.sshfl [vmem:[#allocation1 + $0x8] sm:$0xff pattern:$0x73625140] }
 0x37c   : > { %1893 = vst [vmem:[#allocation1 + $0x2] ss:$4 sm:$0xff] %v4489_v7 }
 0x380   : > { %v1399_v4 = vpop.permute.xlu1 %1398  ;;  %v4558_v6 = vpop.permute.xlu2 %1582 }
 0x383   : > { %v1894_v28 = vld.sshfl [vmem:[#allocation1] sm:$0xff pattern:$0x73625140]  ;;  %v4544_v41 = vld.sshfl [vmem:[#allocation1 + $0x8] sm:$0xff pattern:$0x73625140] }
 0x384   : > { %1904 = vst [vmem:[#allocation1 + $0x3] ss:$4 sm:$0xff] %v4489_v7 }
 0x388   : > { %v4547_v5 = vpop.permute.xlu1 %1573  ;;  %v4575_v17 = vpop.permute.xlu2 %1595 }
 0x389   : > { %1709 = vrot.lane.b32.xlu1 %v4461_v22, %s3656_s6  ;;  %1719 = vrot.lane.b32.xlu0 %v1715_v50, %s3657_s7  ;;  %v4564_v22 = vld [vmem:[%s3704_s19 + $0x14] sm:$0xf] }
 0x38b   : > { %v1905_v15 = vld.sshfl [vmem:[#allocation1] sm:$0xff pattern:$0x73625140]  ;;  %v1907_v11 = vld.sshfl [vmem:[#allocation1 + $0x8] sm:$0xff pattern:$0x73625140] }
 0x38c   : > { %1909 = vrot.lane.b32.xlu2 %v1905_v15, %s3649_s26  ;;  %1914 = vst [vmem:[#allocation1] ss:$4 sm:$0xff] %v4489_v7 }
 0x390   : > { %v4556_v30 = vpop.permute.xlu1 %1593  ;;  %v1649_v49 = vpop.permute.xlu2 %1648 }
 0x391   : > { %1721 = vrot.lane.b32.xlu1 %v4469_v32, %s3657_s7  ;;  %1736 = vrot.lane.b32.xlu0 %v1732_v43, %s3643_s20  ;;  %v1191_v43 = vsel %vm316_vm11, %v4271_v21, %v4253_v60  ;;  %v1224_v60 = vsel %vm351_vm15, %v4319_v35, %v4349_v39 }
 0x393   : > { %v4566_v0 = vld.sshfl [vmem:[#allocation1 + $0x8] sm:$0xff pattern:$0x73625140]  ;;  %v4568_v38 = vld.sshfl [vmem:[#allocation1] sm:$0xff pattern:$0x73625140] }
 0x394   : > { %1926 = vst [vmem:[#allocation1 + $0x1] ss:$4 sm:$0xff] %v4564_v22 }
 0x395   : > { %v1403_v50 = vpop.permute.xlu0 %1402 }
 0x398   : > { %v1405_v15 = vpop.permute.xlu1 %1404 }
 0x399   : > { %1844 = vrot.lane.b32.xlu0 %v1840_v47, %s3643_s20  ;;  %1868 = vrot.lane.b32.xlu1 %v1864_v3, %s3645_s22  ;;  %v1408_v7 = vsel %vm363_vm10, %v1403_v50, %v1405_v15  ;;  %v1407_v47 = vsel %vm363_vm10, %v1399_v4, %v1401_v37  ;;  %v1249_v50 = vsel %vm445_vm1, %v1191_v43, %v1202_v1  ;;  %v5914_v43 = vld [vmem:[#allocation22_spill] sm:$0xff] }
 0x39a   : > { %v1412_v32 = vsel %vm451_vm4, %v1408_v7, 0  ;;  %v1213_v7 = vsel %vm339_vm14, %v4262_v23, %v4269_v13  ;;  %v1406_v4 = vsel %vm363_vm10, %v1395_v27, %v4515_v25  ;;  %v1241_v13 = vsel %vm445_vm1, %v1155_v2, %v4110_v63  ;;  %v5911_v25 = vld [vmem:[#allocation16_spill] sm:$0xff]  ;;  %v5912_v27 = vld [vmem:[#allocation15_spill] sm:$0xff]  ;;  %v5915_v2 = vld [vmem:[#allocation13_spill] sm:$0xff] }
 0x39b   : > { %1415 = vmatpush.bf16.msra.mxu2 %v1412_v32  ;;  %v4586_v3 = vld.sshfl [vmem:[#allocation1] sm:$0xff pattern:$0x73625140]  ;;  %v1251_v23 = vsel %vm448_vm3, %v1249_v50, %v1213_v7  ;;  %v1112_v37 = vsel %vm327_vm12, %v4189_v58, %v4176_v55  ;;  %v1181_v63 = vsel %vm304_vm13, %v4230_v40, %v4247_v53  ;;  %v1243_v51 = vsel %vm448_vm3, %v1241_v13, %v1170_v46  ;;  %v5909_v55 = vld [vmem:[#allocation24_spill] sm:$0xff]  ;;  %v5913_v32 = vld [vmem:[#allocation23_spill] sm:$0xff] }
 0x39c   : > { %1929 = vst [vmem:[#allocation1 + $0x2] ss:$4 sm:$0xff] %v4564_v22  ;;  %v1253_v39 = vsel %vm451_vm4, %v1251_v23, %v1224_v60  ;;  %v1234_v10 = vsel %vm445_vm1, %v1112_v37, %v1123_v52  ;;  %v5910_v58 = vld [vmem:[#allocation20_spill] sm:$0xff]  ;;  %v1245_v15 = vsel %vm451_vm4, %v1243_v51, %v1181_v63  ;;  %v1667_v60 = vpop.permute.xlu2 %1666 }
 0x39d   : > { %v4583_v20 = vpop.permute.xlu0 %1604  ;;  %v1134_v19 = vsel %vm351_vm15, %v5910_v58, %v5909_v55  ;;  %v4670_v58 = vld [vmem:[%s5834_s1] sm:$0xf] }
 0x39e   : > { %v1236_v50 = vsel %vm448_vm3, %v1234_v10, %v1134_v19 }
 0x39f   : > { %1416 = vmatpush.bf16.msra.mxu2 %v1407_v47  ;;  %v1145_v47 = vsel %vm363_vm10, %v5914_v43, %v5913_v32 }
 0x3a0   : > { %v4593_v21 = vpop.permute.xlu1 %1606 }
 0x3a1   : > { %1846 = vrot.lane.b32.xlu0 %v4499_v54, %s3643_s20  ;;  %1898 = vrot.lane.b32.xlu1 %v1894_v28, %s3648_s25  ;;  %v1080_v28 = vsel %vm292_vm0, %v5912_v27, %v5911_v25 }
 0x3a3   : > { %1417 = vmatpush.bf16.msra.mxu2 %v1406_v4  ;;  %v1930_v1 = vld.sshfl [vmem:[#allocation1] sm:$0xff pattern:$0x73625140]  ;;  %v4619_v54 = vld.sshfl [vmem:[#allocation1 + $0x8] sm:$0xff pattern:$0x73625140] }
 0x3a4   : > { %1940 = vst [vmem:[#allocation1 + $0x3] ss:$4 sm:$0xff] %v4564_v22  ;;  %v5917_v4 = vld [vmem:[#allocation17_spill] sm:$0xff] }
 0x3a5   : > { %v1651_v35 = vpop.permute.xlu0 %1650 }
 0x3a6   : > { %v1652_v36 = vsel %vm292_vm0, %v1649_v49, %v1651_v35  ;;  %v1742_v7 = vsel %vm445_vm1, %v4406_v34, %v1651_v35  ;;  %v1238_v34 = vsel %vm451_vm4, %v1236_v50, %v1145_v47  ;;  %v5919_v35 = vld [vmem:[#allocation21_spill] sm:$0xff]  ;;  %v1679_v47 = vpop.permute.xlu2 %1678 }
 0x3a7   : > { %1418 = vmatpush.bf16.msra.mxu2 %v1253_v39  ;;  %v1740_v40 = vsel %vm445_vm1, %v4404_v61, %v1652_v36  ;;  %v5920_v39 = vld [vmem:[#allocation19_spill] sm:$0xff] }
 0x3a8   : > { %v1659_v53 = vpop.permute.xlu1 %1658  ;;  %v1102_v63 = vsel %vm316_vm11, %v5920_v39, %v5919_v35 }
 0x3a9   : > { %1855 = vrot.lane.b32.xlu0 %v4508_v48, %s3644_s21  ;;  %1911 = vrot.lane.b32.xlu1 %v1907_v11, %s3649_s26  ;;  %v1226_v48 = vsel %vm445_vm1, %v5915_v2, %v1080_v28  ;;  %v5916_v11 = vld [vmem:[#allocation18_spill] sm:$0xff]  ;;  %v1744_v49 = vsel %vm448_vm3, %v1740_v40, %v1659_v53  ;;  %v1745_v13 = vsel %vm448_vm3, %v1742_v7, %v1659_v53 }
 0x3aa   : > { %v1091_v61 = vsel %vm304_vm13, %v5917_v4, %v5916_v11  ;;  %v1747_v10 = vsel %vm451_vm4, %v1744_v49, %v1667_v60 }
 0x3ab   : > { %1419 = vmatpush.bf16.msra.mxu2 %v1245_v15  ;;  %v1941_v52 = vld.sshfl [vmem:[#allocation1] sm:$0xff pattern:$0x73625140]  ;;  %v1943_v37 = vld.sshfl [vmem:[#allocation1 + $0x8] sm:$0xff pattern:$0x73625140]  ;;  %v1228_v51 = vsel %vm448_vm3, %v1226_v48, %v1091_v61 }
 0x3ac   : > { %1950 = vst [vmem:[#allocation1] ss:$4 sm:$0xff] %v4564_v22  ;;  %v1230_v55 = vsel %vm451_vm4, %v1228_v51, %v1102_v63 }
 0x3ad   : > { %v1669_v23 = vpop.permute.xlu0 %1668 }
 0x3ae   : > { %v1670_v46 = vsel %vm5918_vm6, %v1667_v60, %v1669_v23  ;;  %v1699_v2 = vpop.permute.xlu2 %1698  ;;  %vm5944_vm6 = vcmask 867328  }
 0x3af   : > { %1420 = vmatpush.bf16.msra.mxu2 %v1238_v34  ;;  %v1749_v36 = vsel %vm451_vm4, %v1745_v13, %v1670_v46 }
 0x3b0   : > { %1780 = vrot.lane.b32.xlu2 %v1749_v36, %s3649_s26  ;;  %v1677_v32 = vpop.permute.xlu1 %1676 }
 0x3b1   : > { %1857 = vrot.lane.b32.xlu0 %v4510_v59, %s3644_s21  ;;  %1778 = vrot.lane.b32.xlu1 %v1747_v10, %s3649_s26  ;;  %v1680_v23 = vsel %vm5923_vm9, %v1677_v32, %v1679_v47 }
 0x3b3   : > { %1421 = vmatpush.bf16.msra.mxu2 %v1230_v55  ;;  %v1953_v19 = vld.sshfl [vmem:[#allocation1 + $0x8] sm:$0xff pattern:$0x73625140]  ;;  %v4674_v25 = vld.sshfl [vmem:[#allocation1] sm:$0xff pattern:$0x73625140] }
 0x3b4   : > { %1961 = vst [vmem:[#allocation1 + $0x1] ss:$4 sm:$0xff] %v4564_v22 }
 0x3b5   : > { %v1688_v43 = vpop.permute.xlu0 %1687 }
 0x3b6   : > { %3543 = vmatmul.msk.bf16.vlgmr.msra.gmra.mxu2 %vm351_vm15, %v4670_v58  ;;  %v1752_v61 = vsel %vm445_vm1, %v1677_v32, %v1688_v43  ;;  %v1712_v49 = vpop.permute.xlu2 %1711 }
 0x3b7   : > { %v1757_v13 = vsel %vm448_vm3, %v1752_v61, %v1699_v2 }
 0x3b8   : > { %1921 = vrot.lane.b32.xlu2 %v4566_v0, %s3650_s27 }
 0x3b9   : > { %1866 = vrot.lane.b32.xlu0 %v4517_v8, %s3645_s22  ;;  %1934 = vrot.lane.b32.xlu1 %v1930_v1, %s3643_s20 }
 0x3bb   : > { %v4682_v59 = vld.sshfl [vmem:[#allocation1] sm:$0xff pattern:$0x73625140]  ;;  %v4684_v27 = vld.sshfl [vmem:[#allocation1 + $0x8] sm:$0xff pattern:$0x73625140] }
 0x3bc   : > { %1972 = vst [vmem:[#allocation1 + $0x2] ss:$4 sm:$0xff] %v4564_v22 }
 0x3be   : > { %v1735_v55 = vpop.permute.xlu2 %1734 }
 0x3c0   : > { %1945 = vrot.lane.b32.xlu2 %v1941_v52, %s3644_s21 }
 0x3c1   : > { %1876 = vrot.lane.b32.xlu0 %v4525_v33, %s3646_s23  ;;  %1947 = vrot.lane.b32.xlu1 %v1943_v37, %s3644_s21 }
 0x3c3   : > { %v1973_v0 = vld.sshfl [vmem:[#allocation1] sm:$0xff pattern:$0x73625140]  ;;  %v4691_v28 = vld.sshfl [vmem:[#allocation1 + $0x8] sm:$0xff pattern:$0x73625140] }
 0x3c4   : > { %1983 = vst [vmem:[#allocation1 + $0x3] ss:$4 sm:$0xff] %v4564_v22 }
 0x3c8   : > { %1957 = vrot.lane.b32.xlu2 %v1953_v19, %s3645_s22 }
 0x3c9   : > { %1887 = vrot.lane.b32.xlu0 %v4535_v56, %s3647_s24  ;;  %v4713_v56 = vld [vmem:[%s3704_s19 + $0x18] sm:$0xf] }
 0x3cb   : > { %v4697_v8 = vld.sshfl [vmem:[#allocation1 + $0x8] sm:$0xff pattern:$0x73625140]  ;;  %v4699_v1 = vld.sshfl [vmem:[#allocation1] sm:$0xff pattern:$0x73625140] }
 0x3cc   : > { %2023 = vst [vmem:[#allocation1] ss:$4 sm:$0xff] %v4564_v22 }
 0x3d0   : > { %1977 = vrot.lane.b32.xlu2 %v1973_v0, %s3647_s24 }
 0x3d1   : > { %1889 = vrot.lane.b32.xlu0 %v4537_v9, %s3647_s24 }
 0x3d3   : > { %v4705_v33 = vld.sshfl [vmem:[#allocation1] sm:$0xff pattern:$0x73625140]  ;;  %v4707_v40 = vld.sshfl [vmem:[#allocation1 + $0x8] sm:$0xff pattern:$0x73625140] }
 0x3d4   : > { %2027 = vst [vmem:[#allocation1 + $0x1] ss:$4 sm:$0xff] %v4564_v22  ;;  %v1701_v22 = vpop.permute.xlu0 %1700 }
 0x3d5   : > { %v1702_v60 = vsel %vm5891_vm8, %v1699_v2, %v1701_v22  ;;  %vm5960_vm8 = vmmov %vm5923_vm9  ;;  %vm5961_vm9 = vcmask 89088  }
 0x3d9   : > { %1900 = vrot.lane.b32.xlu0 %v4544_v41, %s3648_s25  ;;  %v1690_v41 = vpop.permute.xlu1 %1689 }
 0x3db   : > { %v4715_v53 = vld.sshfl [vmem:[#allocation1] sm:$0xff pattern:$0x73625140]  ;;  %v4717_v15 = vld.sshfl [vmem:[#allocation1 + $0x8] sm:$0xff pattern:$0x73625140] }
 0x3dc   : > { %2039 = vst [vmem:[#allocation1 + $0x2] ss:$4 sm:$0xff] %v4713_v56 }
 0x3e1   : > { %1919 = vrot.lane.b32.xlu0 %v4568_v38, %s3650_s27 }
 0x3e3   : > { %v2040_v9 = vld.sshfl [vmem:[#allocation1] sm:$0xff pattern:$0x73625140]  ;;  %v4728_v48 = vpop.xlane.xlu1 %1050 }
 0x3e4   : > { %2045 = vst [vmem:[#allocation1 + $0x3] ss:$4 sm:$0xff] %v4713_v56 }
 0x3e5   : > { %5921 = vst [vmem:[#allocation24_spill] sm:$0xff] %v4728_v48 }
 0x3e8   : > { %v4730_v11 = vpop.xlane.xlu0 %1056 }
 0x3e9   : > { %1936 = vrot.lane.b32.xlu0 %v4619_v54, %s3643_s20  ;;  %5922 = vst [vmem:[#allocation20_spill] sm:$0xff] %v4730_v11  ;;  %v1691_v54 = vsel %vm5889_vm7, %v1688_v43, %v1690_v41  ;;  %vm5959_vm7 = vcmask 162816  }
 0x3ea   : > { %v1755_v46 = vsel %vm445_vm1, %v1680_v23, %v1691_v54  ;;  %v4820_v23 = vpop.permute.xlu2 %1878 }
 0x3eb   : > { %v2046_v7 = vld.sshfl [vmem:[#allocation1] sm:$0xff pattern:$0x73625140]  ;;  %v4725_v50 = vld.sshfl [vmem:[#allocation1 + $0x8] sm:$0xff pattern:$0x73625140]  ;;  %v1759_v37 = vsel %vm448_vm3, %v1755_v46, %v1702_v60 }
 0x3ec   : > { %2055 = vst [vmem:[#allocation1] ss:$4 sm:$0xff] %v4713_v56 }
 0x3ed   : > { %5934 = vst [vmem:[#allocation19_spill] sm:$0xff] %v4820_v23 }
 0x3f3   : > { %v2056_v38 = vld.sshfl [vmem:[#allocation1] sm:$0xff pattern:$0x73625140]  ;;  %v2058_v4 = vld.sshfl [vmem:[#allocation1 + $0x8] sm:$0xff pattern:$0x73625140] }
 0x3f4   : > { %2066 = vst [vmem:[#allocation1 + $0x1] ss:$4 sm:$0xff] %v4713_v56 }
 0x3fb   : > { %v1710_v34 = vpop.permute.xlu1 %1709  ;;  %v1720_v52 = vpop.permute.xlu0 %1719  ;;  %v2069_v36 = vld.sshfl [vmem:[#allocation1 + $0x8] sm:$0xff pattern:$0x73625140]  ;;  %v2067_v51 = vld.sshfl [vmem:[#allocation1] sm:$0xff pattern:$0x73625140] }
 0x3fc   : > { %v1713_v35 = vsel %vm5924_vm2, %v1710_v34, %v1712_v49  ;;  %v1761_v39 = vsel %vm451_vm4, %v1757_v13, %v1710_v34  ;;  %2077 = vst [vmem:[#allocation1 + $0x2] ss:$4 sm:$0xff] %v4713_v56  ;;  %v1765_v10 = vsel %vm445_vm1, %v1720_v52, %v4478_v12 }
 0x3fd   : > { %1782 = vrot.lane.b32.xlu0 %v1761_v39, %s3649_s26  ;;  %v1763_v63 = vsel %vm451_vm4, %v1759_v37, %v1713_v35  ;;  %v4834_v39 = vpop.permute.xlu2 %1909 }
 0x3fe   : > { %1784 = vrot.lane.b32.xlu1 %v1763_v63, %s3649_s26  ;;  %5937 = vst [vmem:[#allocation32_spill] sm:$0xff] %v4834_v39 }
 0x403   : > { %v1737_v19 = vpop.permute.xlu0 %1736  ;;  %v2078_v43 = vld.sshfl [vmem:[#allocation1] sm:$0xff pattern:$0x73625140]  ;;  %v2080_v47 = vld.sshfl [vmem:[#allocation1 + $0x8] sm:$0xff pattern:$0x73625140]  ;;  %v1722_v12 = vpop.permute.xlu1 %1721 }
 0x404   : > { %v1738_v0 = vsel %vm292_vm0, %v1735_v55, %v1737_v19  ;;  %2088 = vst [vmem:[#allocation1 + $0x3] ss:$4 sm:$0xff] %v4713_v56  ;;  %v1723_v22 = vsel %vm5926_vm5, %v1720_v52, %v1722_v12  ;;  %vm5962_vm5 = vcmask 80896  }
 0x405   : > { %1955 = vrot.lane.b32.xlu0 %v4674_v25, %s3645_s22  ;;  %v1769_v32 = vsel %vm448_vm3, %v1765_v10, %v1738_v0  ;;  %v1767_v25 = vsel %vm445_vm1, %v1723_v22, %v4480_v26 }
 0x406   : > { %1966 = vrot.lane.b32.xlu1 %v4682_v59, %s3646_s23  ;;  %1786 = vrot.lane.b32.xlu2 %v1769_v32, %s3649_s26  ;;  %v1771_v2 = vsel %vm448_vm3, %v1767_v25, %v1737_v19 }
 0x40a   : > { %v4845_v0 = vpop.permute.xlu2 %1780 }
 0x40b   : > { %v4756_v41 = vpop.permute.xlu0 %1844  ;;  %v2089_v61 = vld.sshfl [vmem:[#allocation1] sm:$0xff pattern:$0x73625140]  ;;  %v2091_v54 = vld.sshfl [vmem:[#allocation1 + $0x8] sm:$0xff pattern:$0x73625140]  ;;  %v4818_v49 = vpop.permute.xlu1 %1868 }
 0x40c   : > { %5925 = vst [vmem:[#allocation16_spill] sm:$0xff] %v4756_v41 }
 0x40d   : > { %1968 = vrot.lane.b32.xlu0 %v4684_v27, %s3646_s23  ;;  %2098 = vst [vmem:[#allocation1] ss:$4 sm:$0xff] %v4713_v56 }
 0x40e   : > { %1979 = vrot.lane.b32.xlu1 %v4691_v28, %s3647_s24  ;;  %1990 = vrot.lane.b32.xlu2 %v4697_v8, %s3648_s25  ;;  %5933 = vst [vmem:[#allocation21_spill] sm:$0xff] %v4818_v49  ;;  %v4879_v49 = vld [vmem:[%s3704_s19 + $0x18] sm:$0xf] }
 0x412   : > { %v4858_v25 = vpop.permute.xlu2 %1921 }
 0x413   : > { %v4767_v59 = vpop.permute.xlu0 %1846  ;;  %v4832_v35 = vpop.permute.xlu1 %1898 }
 0x414   : > { %5927 = vst [vmem:[#allocation15_spill] sm:$0xff] %v4767_v59  ;;  %v4777_v28 = vld.sshfl [vmem:[#allocation1] sm:$0xff pattern:$0x73625140] }
 0x415   : > { %1788 = vrot.lane.b32.xlu0 %v1771_v2, %s3649_s26  ;;  %v4779_v26 = vld.sshfl [vmem:[#allocation1 + $0x8] sm:$0xff pattern:$0x73625140]  ;;  %5936 = vst [vmem:[#allocation31_spill] sm:$0xff] %v4832_v35 }
 0x416   : > { %2042 = vrot.lane.b32.xlu2 %v2040_v9, %s3651_s28  ;;  %2032 = vrot.lane.b32.xlu1 %v4715_v53, %s3643_s20  ;;  %2109 = vst [vmem:[#allocation1 + $0x1] ss:$4 sm:$0xff] %v4713_v56 }
 0x41b   : > { %v4775_v27 = vpop.permute.xlu0 %1855  ;;  %v4841_v10 = vpop.permute.xlu1 %1911 }
 0x41c   : > { %5928 = vst [vmem:[#allocation23_spill] sm:$0xff] %v4775_v27 }
 0x41d   : > { %1988 = vrot.lane.b32.xlu0 %v4699_v1, %s3648_s25  ;;  %v4788_v9 = vld.sshfl [vmem:[#allocation1] sm:$0xff pattern:$0x73625140]  ;;  %v4790_v53 = vld.sshfl [vmem:[#allocation1 + $0x8] sm:$0xff pattern:$0x73625140] }
 0x41e   : > { %2060 = vrot.lane.b32.xlu2 %v2056_v38, %s3653_s30  ;;  %2050 = vrot.lane.b32.xlu1 %v2046_v7, %s3652_s29  ;;  %2113 = vst [vmem:[#allocation1 + $0x2] ss:$4 sm:$0xff] %v4713_v56  ;;  %v4798_v1 = vld [vmem:[%s3704_s19 + $0x14] sm:$0xf] }
 0x41f   : > { %5930 = vst [vmem:[#allocation13_spill] sm:$0xff] %v4798_v1 }
 0x420   : > { %5939 = vst [vmem:[#allocation34_spill] sm:$0xff] %v4841_v10 }
 0x423   : > { %v4786_v8 = vpop.permute.xlu0 %1857  ;;  %v4856_v22 = vpop.permute.xlu1 %1778 }
 0x424   : > { %5929 = vst [vmem:[#allocation22_spill] sm:$0xff] %v4786_v8 }
 0x425   : > { %2034 = vrot.lane.b32.xlu0 %v4717_v15, %s3643_s20  ;;  %v4800_v38 = vld.sshfl [vmem:[#allocation1 + $0x8] sm:$0xff pattern:$0x73625140]  ;;  %v2114_v7 = vld.sshfl [vmem:[#allocation1] sm:$0xff pattern:$0x73625140] }
 0x426   : > { %2073 = vrot.lane.b32.xlu2 %v2069_v36, %s3654_s4  ;;  %2062 = vrot.lane.b32.xlu1 %v2058_v4, %s3653_s30  ;;  %2223 = vst [vmem:[#allocation1 + $0x1] ss:$4 sm:$0xff] %v4798_v1 }
 0x42b   : > { %v4802_v60 = vpop.permute.xlu0 %1866 }
 0x42c   : > { %5931 = vst [vmem:[#allocation18_spill] sm:$0xff] %v4802_v60 }
 0x42d   : > { %2052 = vrot.lane.b32.xlu0 %v4725_v50, %s3652_s29  ;;  %v4809_v56 = vld.sshfl [vmem:[#allocation1] sm:$0xff pattern:$0x73625140]  ;;  %v4811_v15 = vld.sshfl [vmem:[#allocation1 + $0x8] sm:$0xff pattern:$0x73625140] }
 0x42e   : > { %2093 = vrot.lane.b32.xlu2 %v2089_v61, %s3656_s6  ;;  %2082 = vrot.lane.b32.xlu1 %v2078_v43, %s3655_s5  ;;  %2234 = vst [vmem:[#allocation1 + $0x2] ss:$4 sm:$0xff] %v4798_v1 }
 0x433   : > { %v4816_v4 = vpop.permute.xlu0 %1876 }
 0x434   : > { %5932 = vst [vmem:[#allocation17_spill] sm:$0xff] %v4816_v4 }
 0x435   : > { %2071 = vrot.lane.b32.xlu0 %v2067_v51, %s3654_s4  ;;  %v4823_v46 = vld.sshfl [vmem:[#allocation1] sm:$0xff pattern:$0x73625140]  ;;  %v4826_v34 = vld.sshfl [vmem:[#allocation1 + $0x8] sm:$0xff pattern:$0x73625140] }
 0x436   : > { %2095 = vrot.lane.b32.xlu1 %v2091_v54, %s3656_s6  ;;  %2245 = vst [vmem:[#allocation1 + $0x3] ss:$4 sm:$0xff] %v4798_v1 }
 0x439   : > { %v1423_v50 = vpop.f32.mrf.mxu2 }
 0x43a   : > { %v1427_v13 = vpack.c.bf16 %v1423_v50, %v1423_v50  ;;  %v1433_v32 = vmul.f32 %v4245_v24, %v1423_v50  ;;  %v4868_v50 = vpop.permute.xlu2 %1945 }
 0x43b   : > { %v4830_v52 = vpop.permute.xlu0 %1887  ;;  %5942 = vst [vmem:[#allocation37_spill] sm:$0xff] %v4868_v50 }
 0x43c   : > { %3544 = vst [vmem:[%s4216_s17 + $0x8] sm:$0xf] %v1427_v13  ;;  %v1439_v13 = vmul.f32 %v1433_v32, %v1433_v32 }
 0x43d   : > { %2084 = vrot.lane.b32.xlu0 %v2080_v47, %s3655_s5  ;;  %5935 = vst [vmem:[#allocation30_spill] sm:$0xff] %v4830_v52  ;;  %v2248_v63 = vld.sshfl [vmem:[#allocation1 + $0x8] sm:$0xff pattern:$0x73625140] }
 0x43e   : > { %2118 = vrot.lane.b32.xlu1 %v2114_v7, %s3643_s20  ;;  %v4836_v36 = vld.sshfl [vmem:[#allocation1] sm:$0xff pattern:$0x73625140]  ;;  %v4865_v7 = vpop.permute.xlu1 %1934 }
 0x43f   : > { %2255 = vst [vmem:[#allocation1] ss:$4 sm:$0xff] %v4798_v1 }
 0x440   : > { %5941 = vst [vmem:[#allocation36_spill] sm:$0xff] %v4865_v7 }
 0x441   : > { %v1425_v37 = vpop.f32.mrf.mxu2 }
 0x442   : > { %v4876_v60 = vpop.permute.xlu2 %1957 }
 0x443   : > { %v4839_v51 = vpop.permute.xlu0 %1889 }
 0x444   : > { %5938 = vst [vmem:[#allocation33_spill] sm:$0xff] %v4839_v51 }
 0x446   : > { %v4843_v55 = vld.sshfl [vmem:[#allocation1] sm:$0xff pattern:$0x73625140]  ;;  %v2258_v19 = vld.sshfl [vmem:[#allocation1 + $0x8] sm:$0xff pattern:$0x73625140]  ;;  %v4874_v48 = vpop.permute.xlu1 %1947 }
 0x447   : > { %2266 = vst [vmem:[#allocation1 + $0x1] ss:$4 sm:$0xff] %v4798_v1  ;;  %2262 = vrot.lane.b32.xlu1 %v2258_v19, %s3646_s23 }
 0x448   : > { %5943 = vst [vmem:[#allocation38_spill] sm:$0xff] %v4874_v48 }
 0x44b   : > { %v4850_v43 = vpop.permute.xlu0 %1900 }
 0x44c   : > { %5940 = vst [vmem:[#allocation35_spill] sm:$0xff] %v4850_v43 }
 0x44e   : > { %v4852_v47 = vld.sshfl [vmem:[#allocation1] sm:$0xff pattern:$0x73625140]  ;;  %v4854_v12 = vld.sshfl [vmem:[#allocation1 + $0x8] sm:$0xff pattern:$0x73625140] }
 0x44f   : > { %2277 = vst [vmem:[#allocation1 + $0x2] ss:$4 sm:$0xff] %v4798_v1 }
 0x453   : > { %v4861_v2 = vpop.permute.xlu0 %1919 }
 0x456   : > { %v2278_v61 = vld.sshfl [vmem:[#allocation1] sm:$0xff pattern:$0x73625140]  ;;  %v4863_v54 = vld.sshfl [vmem:[#allocation1 + $0x8] sm:$0xff pattern:$0x73625140] }
 0x457   : > { %1434 = vadd.xlane.f32.xlu2 %v1433_v32  ;;  %2288 = vst [vmem:[#allocation1 + $0x3] ss:$4 sm:$0xff] %v4798_v1 }
 0x45b   : > { %v4872_v11 = vpop.permute.xlu0 %1936 }
 0x45e   : > { %v2289_v37 = vld.sshfl [vmem:[#allocation1] sm:$0xff pattern:$0x73625140]  ;;  %v2291_v19 = vld.sshfl [vmem:[#allocation1 + $0x8] sm:$0xff pattern:$0x73625140] }
 0x45f   : > { %2295 = vrot.lane.b32.xlu1 %v2291_v19, %s3649_s26  ;;  %2298 = vst [vmem:[#allocation1] ss:$4 sm:$0xff] %v4798_v1  ;;  %v4888_v1 = vpop.permute.xlu2 %1977 }
 0x466   : > { %v4881_v27 = vld.sshfl [vmem:[#allocation1 + $0x8] sm:$0xff pattern:$0x73625140]  ;;  %v4883_v8 = vld.sshfl [vmem:[#allocation1] sm:$0xff pattern:$0x73625140] }
 0x467   : > { %1440 = vadd.xlane.f32.xlu0 %v1439_v13  ;;  %2310 = vst [vmem:[#allocation1 + $0x1] ss:$4 sm:$0xff] %v4879_v49 }
 0x46e   : > { %v4890_v13 = vld.sshfl [vmem:[#allocation1] sm:$0xff pattern:$0x73625140] }
 0x46f   : > { %v1783_v32 = vpop.permute.xlu0 %1782  ;;  %2105 = vrot.lane.b32.xlu2 %v4779_v26, %s3657_s7  ;;  %2313 = vst [vmem:[#allocation1 + $0x2] ss:$4 sm:$0xff] %v4879_v49  ;;  %v1787_v26 = vpop.permute.xlu2 %1786 }
 0x470   : > { %v1785_v19 = vpop.permute.xlu1 %1784 }
 0x476   : > { %v4900_v39 = vld.sshfl [vmem:[#allocation1] sm:$0xff pattern:$0x73625140]  ;;  %v4902_v10 = vld.sshfl [vmem:[#allocation1 + $0x8] sm:$0xff pattern:$0x73625140] }
 0x477   : > { %v4893_v41 = vpop.permute.xlu0 %1955  ;;  %2252 = vrot.lane.b32.xlu2 %v2248_v63, %s3645_s22  ;;  %2324 = vst [vmem:[#allocation1 + $0x3] ss:$4 sm:$0xff] %v4879_v49 }
 0x478   : > { %v4896_v59 = vpop.permute.xlu1 %1966 }
 0x47b   : > { %2103 = vrot.lane.b32.xlu0 %v4777_v28, %s3657_s7  ;;  %v4916_v28 = vpop.permute.xlu2 %1990 }
 0x47e   : > { %v4912_v63 = vld.sshfl [vmem:[#allocation1] sm:$0xff pattern:$0x73625140]  ;;  %v4914_v35 = vld.sshfl [vmem:[#allocation1 + $0x8] sm:$0xff pattern:$0x73625140] }
 0x47f   : > { %v4905_v4 = vpop.permute.xlu0 %1968  ;;  %2282 = vrot.lane.b32.xlu2 %v2278_v61, %s3648_s25  ;;  %2334 = vst [vmem:[#allocation1] ss:$4 sm:$0xff] %v4879_v49 }
 0x480   : > { %v4908_v23 = vpop.permute.xlu1 %1979 }
 0x483   : > { %2120 = vrot.lane.b32.xlu0 %v4800_v38, %s3643_s20  ;;  %v1791_v38 = vsel %vm363_vm10, %v1783_v32, %v1785_v19  ;;  %v1597_v32 = vsel %vm339_vm14, %v4556_v30, %v4575_v17  ;;  %v1790_v19 = vsel %vm363_vm10, %v4856_v22, %v4845_v0  ;;  %v1554_v30 = vsel %vm292_vm0, %v4529_v29, %v4533_v42  ;;  %v5946_v0 = vld [vmem:[#allocation6_spill] sm:$0xff]  ;;  %v5947_v29 = vld [vmem:[#allocation8_spill] sm:$0xff] }
 0x484   : > { %v1496_v42 = vsel %vm327_vm12, %v5947_v29, %v5946_v0 }
 0x486   : > { %v4925_v52 = vld.sshfl [vmem:[#allocation1 + $0x8] sm:$0xff pattern:$0x73625140]  ;;  %v4927_v51 = vld.sshfl [vmem:[#allocation1] sm:$0xff pattern:$0x73625140] }
 0x487   : > { %v1789_v43 = vpop.permute.xlu0 %1788  ;;  %2293 = vrot.lane.b32.xlu2 %v2289_v37, %s3649_s26  ;;  %2345 = vst [vmem:[#allocation1 + $0x1] ss:$4 sm:$0xff] %v4879_v49 }
 0x488   : > { %v1792_v50 = vsel %vm363_vm10, %v1787_v26, %v1789_v43  ;;  %v2033_v48 = vpop.permute.xlu1 %2032  ;;  %v1575_v43 = vsel %vm316_vm11, %v4542_v31, %v4547_v5  ;;  %v1539_v26 = vsel %vm5944_vm6, %v4523_v44, %v4521_v62  ;;  %v1608_v31 = vsel %vm351_vm15, %v4583_v20, %v4593_v21  ;;  %v5945_v21 = vld [vmem:[#allocation29_spill] sm:$0xff] }
 0x489   : > { %v1796_v61 = vsel %vm451_vm4, %v1792_v50, 0  ;;  %v1586_v50 = vsel %vm327_vm12, %v4558_v6, %v4554_v16  ;;  %v1625_v6 = vsel %vm445_vm1, %v1539_v26, %v4385_v14  ;;  %v1507_v5 = vsel %vm339_vm14, %v4495_v45, %v4504_v18  ;;  %v5951_v26 = vld [vmem:[#allocation28_spill] sm:$0xff] }
 0x48a   : > { %1799 = vmatpush.bf16.msra.mxu3 %v1796_v61  ;;  %v1633_v16 = vsel %vm445_vm1, %v1575_v43, %v1586_v50  ;;  %v1627_v61 = vsel %vm448_vm3, %v1625_v6, %v1554_v30  ;;  %v5948_v43 = vld [vmem:[#allocation26_spill] sm:$0xff]  ;;  %v5949_v50 = vld [vmem:[#allocation7_spill] sm:$0xff]  ;;  %v1618_v18 = vsel %vm445_vm1, %v1496_v42, %v1507_v5  ;;  %v5952_v6 = vld [vmem:[#allocation4_spill] sm:$0xff]  ;;  %vm5963_vm6 = vcmask 7168  }
 0x48b   : > { %2228 = vrot.lane.b32.xlu0 %v4809_v56, %s3643_s20  ;;  %v2043_v56 = vpop.permute.xlu2 %2042  ;;  %v1635_v17 = vsel %vm448_vm3, %v1633_v16, %v1597_v32  ;;  %v1518_v45 = vsel %vm351_vm15, %v5949_v50, %v5948_v43  ;;  %v5953_v30 = vld [vmem:[#allocation11_spill] sm:$0xff]  ;;  %v5954_v5 = vld [vmem:[#allocation12_spill] sm:$0xff]  ;;  %v5958_v50 = vld [vmem:[#allocation25_spill] sm:$0xff] }
 0x48c   : > { %v1637_v62 = vsel %vm451_vm4, %v1635_v17, %v1608_v31 }
 0x48e   : > { %1800 = vmatpush.bf16.msra.mxu3 %v1791_v38  ;;  %v4960_v44 = vld.sshfl [vmem:[#allocation1] sm:$0xff pattern:$0x73625140]  ;;  %v4962_v20 = vld.sshfl [vmem:[#allocation1 + $0x8] sm:$0xff pattern:$0x73625140] }
 0x48f   : > { %v4930_v7 = vpop.permute.xlu0 %1988  ;;  %2356 = vst [vmem:[#allocation1 + $0x2] ss:$4 sm:$0xff] %v4879_v49 }
 0x490   : > { %v2051_v37 = vpop.permute.xlu1 %2050 }
 0x492   : > { %1801 = vmatpush.bf16.msra.mxu3 %v1790_v19  ;;  %v5950_v19 = vld [vmem:[#allocation27_spill] sm:$0xff] }
 0x493   : > { %2230 = vrot.lane.b32.xlu0 %v4811_v15, %s3643_s20  ;;  %v1565_v15 = vsel %vm304_vm13, %v5945_v21, %v4540_v57  ;;  %v1529_v31 = vsel %vm363_vm10, %v5951_v26, %v5950_v19  ;;  %v4986_v16 = vpop.permute.xlu2 %2060  ;;  %v5955_v21 = vld [vmem:[#allocation3_spill] sm:$0xff] }
 0x494   : > { %v1629_v32 = vsel %vm451_vm4, %v1627_v61, %v1565_v15  ;;  %v1475_v15 = vsel %vm304_vm13, %v5955_v21, %v5954_v5  ;;  %v5957_v61 = vld [vmem:[#allocation10_spill] sm:$0xff]  ;;  %v5046_v5 = vld [vmem:[%s3704_s19 + $0x1c] sm:$0xf] }
 0x496   : > { %1802 = vmatpush.bf16.msra.mxu3 %v1637_v62  ;;  %v1620_v62 = vsel %vm448_vm3, %v1618_v18, %v1518_v45  ;;  %v2359_v42 = vld.sshfl [vmem:[#allocation1 + $0x8] sm:$0xff pattern:$0x73625140] }
 0x497   : > { %v2035_v14 = vpop.permute.xlu0 %2034  ;;  %v1622_v29 = vsel %vm451_vm4, %v1620_v62, %v1529_v31 }
 0x498   : > { %v2036_v22 = vsel %vm292_vm0, %v2033_v48, %v2035_v14  ;;  %v2063_v38 = vpop.permute.xlu1 %2062  ;;  %v2126_v0 = vsel %vm445_vm1, %v4707_v40, %v2035_v14 }
 0x499   : > { %v2124_v57 = vsel %vm445_vm1, %v4705_v33, %v2036_v22  ;;  %v1464_v33 = vsel %vm292_vm0, %v5953_v30, %v5952_v6  ;;  %v5956_v22 = vld [vmem:[#allocation2_spill] sm:$0xff]  ;;  %v2129_v40 = vsel %vm448_vm3, %v2126_v0, %v2043_v56 }
 0x49a   : > { %1803 = vmatpush.bf16.msra.mxu3 %v1629_v32  ;;  %v2128_v48 = vsel %vm448_vm3, %v2124_v57, %v2043_v56  ;;  %v1486_v43 = vsel %vm316_vm11, %v5957_v61, %v5956_v22  ;;  %v1610_v45 = vsel %vm445_vm1, %v5958_v50, %v1464_v33 }
 0x49b   : > { %2239 = vrot.lane.b32.xlu0 %v4823_v46, %s3644_s21  ;;  %v2131_v17 = vsel %vm451_vm4, %v2128_v48, %v2051_v37  ;;  %v2357_v46 = vld.sshfl [vmem:[#allocation1] sm:$0xff pattern:$0x73625140]  ;;  %v1612_v32 = vsel %vm448_vm3, %v1610_v45, %v1475_v15  ;;  %v2074_v31 = vpop.permute.xlu2 %2073 }
 0x49c   : > { %2162 = vrot.lane.b32.xlu2 %v2131_v17, %s3649_s26  ;;  %2367 = vst [vmem:[#allocation1 + $0x3] ss:$4 sm:$0xff] %v4879_v49  ;;  %v1614_v14 = vsel %vm451_vm4, %v1612_v32, %v1486_v43 }
 0x49e   : > { %1804 = vmatpush.bf16.msra.mxu3 %v1622_v29 }
 0x49f   : > { %v2053_v18 = vpop.permute.xlu0 %2052 }
 0x4a0   : > { %v2054_v57 = vsel %vm5959_vm7, %v2051_v37, %v2053_v18  ;;  %v2083_v26 = vpop.permute.xlu1 %2082  ;;  %vm5964_vm7 = vcmask 867328  }
 0x4a1   : > { %v2133_v19 = vsel %vm451_vm4, %v2129_v40, %v2054_v57 }
 0x4a2   : > { %1805 = vmatpush.bf16.msra.mxu3 %v1614_v14  ;;  %2164 = vrot.lane.b32.xlu1 %v2133_v19, %s3649_s26 }
 0x4a3   : > { %2241 = vrot.lane.b32.xlu0 %v4826_v34, %s3644_s21  ;;  %v2370_v37 = vld.sshfl [vmem:[#allocation1 + $0x8] sm:$0xff pattern:$0x73625140]  ;;  %v5021_v56 = vld.sshfl [vmem:[#allocation1] sm:$0xff pattern:$0x73625140]  ;;  %v2094_v30 = vpop.permute.xlu2 %2093 }
 0x4a4   : > { %2305 = vrot.lane.b32.xlu2 %v4881_v27, %s3650_s27  ;;  %2407 = vst [vmem:[#allocation1] ss:$4 sm:$0xff] %v4879_v49 }
 0x4a5   : > { %3548 = vmatmul.msk.bf16.vlgmr.msra.gmra.mxu3 %vm351_vm15, %v4670_v58  ;;  %v2064_v58 = vsel %vm5960_vm8, %v4986_v16, %v2063_v38  ;;  %vm5965_vm8 = vmmov %vm5964_vm7 }
 0x4a7   : > { %v2072_v48 = vpop.permute.xlu0 %2071 }
 0x4a8   : > { %v2096_v27 = vpop.permute.xlu1 %2095  ;;  %v2075_v34 = vsel %vm5961_vm9, %v2072_v48, %v2074_v31  ;;  %vm5984_vm9 = vcmask 162816  }
 0x4a9   : > { %v2139_v33 = vsel %vm445_vm1, %v2064_v58, %v2075_v34 }
 0x4aa   : > { %2318 = vrot.lane.b32.xlu1 %v4900_v39, %s3643_s20 }
 0x4ab   : > { %2250 = vrot.lane.b32.xlu0 %v4836_v36, %s3645_s22  ;;  %v5033_v17 = vld.sshfl [vmem:[#allocation1] sm:$0xff pattern:$0x73625140]  ;;  %v5035_v6 = vld.sshfl [vmem:[#allocation1 + $0x8] sm:$0xff pattern:$0x73625140]  ;;  %v2097_v36 = vsel %vm5924_vm2, %v2094_v30, %v2096_v27 }
 0x4ac   : > { %2329 = vrot.lane.b32.xlu2 %v4912_v63, %s3644_s21  ;;  %2411 = vst [vmem:[#allocation1 + $0x1] ss:$4 sm:$0xff] %v4879_v49  ;;  %vm5985_vm2 = vcmask 89088  }
 0x4af   : > { %v2085_v39 = vpop.permute.xlu0 %2084 }
 0x4b0   : > { %v2086_v63 = vsel %vm5962_vm5, %v2083_v26, %v2085_v39  ;;  %v2119_v50 = vpop.permute.xlu1 %2118  ;;  %vm5986_vm5 = vcmask 154624  }
 0x4b1   : > { %v2143_v62 = vsel %vm448_vm3, %v2139_v33, %v2086_v63 }
 0x4b2   : > { %v2147_v38 = vsel %vm451_vm4, %v2143_v62, %v2097_v36  ;;  %2331 = vrot.lane.b32.xlu1 %v4914_v35, %s3644_s21 }
 0x4b3   : > { %2260 = vrot.lane.b32.xlu0 %v4843_v55, %s3646_s23  ;;  %v2412_v49 = vld.sshfl [vmem:[#allocation1] sm:$0xff pattern:$0x73625140]  ;;  %v5051_v21 = vld.sshfl [vmem:[#allocation1 + $0x8] sm:$0xff pattern:$0x73625140] }
 0x4b4   : > { %2168 = vrot.lane.b32.xlu2 %v2147_v38, %s3649_s26  ;;  %2423 = vst [vmem:[#allocation1 + $0x2] ss:$4 sm:$0xff] %v5046_v5 }
 0x4b9   : > { %v5129_v58 = vpop.permute.xlu1 %2262 }
 0x4ba   : > { %2350 = vrot.lane.b32.xlu1 %v4960_v44, %s3646_s23 }
 0x4bb   : > { %2271 = vrot.lane.b32.xlu0 %v4852_v47, %s3647_s24  ;;  %v2424_v35 = vld.sshfl [vmem:[#allocation1] sm:$0xff pattern:$0x73625140] }
 0x4bc   : > { %2341 = vrot.lane.b32.xlu2 %v4925_v52, %s3645_s22  ;;  %2429 = vst [vmem:[#allocation1 + $0x3] ss:$4 sm:$0xff] %v5046_v5 }
 0x4c2   : > { %2363 = vrot.lane.b32.xlu1 %v2359_v42, %s3647_s24 }
 0x4c3   : > { %2273 = vrot.lane.b32.xlu0 %v4854_v12, %s3647_s24  ;;  %v2430_v55 = vld.sshfl [vmem:[#allocation1] sm:$0xff pattern:$0x73625140]  ;;  %v5065_v15 = vld.sshfl [vmem:[#allocation1 + $0x8] sm:$0xff pattern:$0x73625140] }
 0x4c4   : > { %2361 = vrot.lane.b32.xlu2 %v2357_v46, %s3647_s24  ;;  %2439 = vst [vmem:[#allocation1] ss:$4 sm:$0xff] %v5046_v5 }
 0x4ca   : > { %v5085_v46 = vpop.xlane.xlu2 %1434 }
 0x4cb   : > { %2284 = vrot.lane.b32.xlu0 %v4863_v54, %s3648_s25  ;;  %v2440_v52 = vld.sshfl [vmem:[#allocation1] sm:$0xff pattern:$0x73625140]  ;;  %v2442_v47 = vld.sshfl [vmem:[#allocation1 + $0x8] sm:$0xff pattern:$0x73625140]  ;;  %v2136_v54 = vsel %vm445_vm1, %v4986_v16, %v2072_v48 }
 0x4cc   : > { %2374 = vrot.lane.b32.xlu2 %v2370_v37, %s3648_s25  ;;  %2450 = vst [vmem:[#allocation1 + $0x1] ss:$4 sm:$0xff] %v5046_v5 }
 0x4d1   : > { %v5147_v33 = vpop.permute.xlu1 %2295 }
 0x4d2   : > { %v2106_v16 = vpop.permute.xlu2 %2105 }
 0x4d3   : > { %2303 = vrot.lane.b32.xlu0 %v4883_v8, %s3650_s27  ;;  %v2453_v12 = vld.sshfl [vmem:[#allocation1 + $0x8] sm:$0xff pattern:$0x73625140]  ;;  %v2451_v44 = vld.sshfl [vmem:[#allocation1] sm:$0xff pattern:$0x73625140]  ;;  %v2141_v8 = vsel %vm448_vm3, %v2136_v54, %v2083_v26 }
 0x4d4   : > { %2426 = vrot.lane.b32.xlu2 %v2424_v35, %s3651_s28  ;;  %2461 = vst [vmem:[#allocation1 + $0x2] ss:$4 sm:$0xff] %v5046_v5  ;;  %v2145_v42 = vsel %vm451_vm4, %v2141_v8, %v2094_v30  ;;  %v5139_v30 = vld [vmem:[%s3704_s19 + $0x18] sm:$0xf] }
 0x4da   : > { %v5095_v43 = vpop.permute.xlu2 %2252 }
 0x4db   : > { %2320 = vrot.lane.b32.xlu0 %v4902_v10, %s3643_s20  ;;  %v2462_v0 = vld.sshfl [vmem:[#allocation1] sm:$0xff pattern:$0x73625140]  ;;  %v5081_v29 = vld.sshfl [vmem:[#allocation1 + $0x8] sm:$0xff pattern:$0x73625140]  ;;  %v5090_v10 = vpop.xlane.xlu0 %1440 }
 0x4dc   : > { %2444 = vrot.lane.b32.xlu2 %v2440_v52, %s3653_s30  ;;  %2472 = vst [vmem:[#allocation1 + $0x3] ss:$4 sm:$0xff] %v5046_v5 }
 0x4e3   : > { %2166 = vrot.lane.b32.xlu0 %v2145_v42, %s3649_s26  ;;  %v2473_v22 = vld.sshfl [vmem:[#allocation1] sm:$0xff pattern:$0x73625140]  ;;  %v2475_v19 = vld.sshfl [vmem:[#allocation1 + $0x8] sm:$0xff pattern:$0x73625140] }
 0x4e4   : > { %2457 = vrot.lane.b32.xlu2 %v2453_v12, %s3654_s4  ;;  %2482 = vst [vmem:[#allocation1] ss:$4 sm:$0xff] %v5046_v5 }
 0x4eb   : > { %2339 = vrot.lane.b32.xlu0 %v4927_v51, %s3645_s22  ;;  %v5115_v31 = vld.sshfl [vmem:[#allocation1 + $0x8] sm:$0xff pattern:$0x73625140] }
 0x4ec   : > { %2477 = vrot.lane.b32.xlu2 %v2473_v22, %s3656_s6 }
 0x4ed   : > { %v2104_v61 = vpop.permute.xlu0 %2103 }
 0x4ee   : > { %v2107_v18 = vsel %vm5963_vm6, %v2104_v61, %v2106_v16  ;;  %v2149_v57 = vsel %vm445_vm1, %v2104_v61, %v4788_v9  ;;  %v2483_v9 = vld.sshfl [vmem:[#allocation1] sm:$0xff pattern:$0x73625140]  ;;  %vm5987_vm6 = vcmask 80896  }
 0x4ef   : > { %v2151_v51 = vsel %vm445_vm1, %v2107_v18, %v4790_v53  ;;  %2493 = vst [vmem:[#allocation1 + $0x1] ss:$4 sm:$0xff] %v5046_v5 }
 0x4f3   : > { %2352 = vrot.lane.b32.xlu0 %v4962_v20, %s3646_s23  ;;  %v5108_v20 = vpop.permute.xlu2 %2282 }
 0x4f5   : > { %v2121_v45 = vpop.permute.xlu0 %2120 }
 0x4f6   : > { %v2122_v32 = vsel %vm292_vm0, %v2119_v50, %v2121_v45  ;;  %v2155_v14 = vsel %vm448_vm3, %v2151_v51, %v2121_v45  ;;  %v5125_v48 = vld.sshfl [vmem:[#allocation1] sm:$0xff pattern:$0x73625140]  ;;  %v5127_v27 = vld.sshfl [vmem:[#allocation1 + $0x8] sm:$0xff pattern:$0x73625140] }
 0x4f7   : > { %v2153_v40 = vsel %vm448_vm3, %v2149_v57, %v2122_v32  ;;  %2497 = vst [vmem:[#allocation1 + $0x2] ss:$4 sm:$0xff] %v5046_v5 }
 0x4f8   : > { %2170 = vrot.lane.b32.xlu1 %v2153_v40, %s3649_s26 }
 0x4fb   : > { %2172 = vrot.lane.b32.xlu0 %v2155_v14, %s3649_s26  ;;  %v5120_v53 = vpop.permute.xlu2 %2293 }
 0x4fd   : > { %v5112_v26 = vpop.permute.xlu0 %2228 }
 0x4fe   : > { %v2500_v39 = vld.sshfl [vmem:[#allocation1 + $0x8] sm:$0xff pattern:$0x73625140]  ;;  %v5142_v36 = vld.sshfl [vmem:[#allocation1] sm:$0xff pattern:$0x73625140] }
 0x4ff   : > { %2607 = vst [vmem:[#allocation1 + $0x1] ss:$4 sm:$0xff] %v5139_v30 }
 0x500   : > { %2416 = vrot.lane.b32.xlu1 %v2412_v49, %s3643_s20 }
 0x503   : > { %2372 = vrot.lane.b32.xlu0 %v5021_v56, %s3648_s25  ;;  %v5136_v34 = vpop.permute.xlu2 %2162 }
 0x505   : > { %v5122_v37 = vpop.permute.xlu0 %2230 }
 0x506   : > { %v2608_v38 = vld.sshfl [vmem:[#allocation1] sm:$0xff pattern:$0x73625140]  ;;  %v2610_v5 = vld.sshfl [vmem:[#allocation1 + $0x8] sm:$0xff pattern:$0x73625140] }
 0x507   : > { %2618 = vst [vmem:[#allocation1 + $0x2] ss:$4 sm:$0xff] %v5139_v30 }
 0x508   : > { %2434 = vrot.lane.b32.xlu1 %v2430_v55, %s3652_s29 }
 0x50b   : > { %2418 = vrot.lane.b32.xlu0 %v5051_v21, %s3643_s20  ;;  %v2306_v62 = vpop.permute.xlu2 %2305 }
 0x50d   : > { %v5134_v56 = vpop.permute.xlu0 %2239 }
 0x50e   : > { %v2619_v35 = vld.sshfl [vmem:[#allocation1] sm:$0xff pattern:$0x73625140]  ;;  %v2621_v55 = vld.sshfl [vmem:[#allocation1 + $0x8] sm:$0xff pattern:$0x73625140] }
 0x50f   : > { %2629 = vst [vmem:[#allocation1 + $0x3] ss:$4 sm:$0xff] %v5139_v30 }
 0x510   : > { %2446 = vrot.lane.b32.xlu1 %v2442_v47, %s3653_s30 }
 0x513   : > { %2436 = vrot.lane.b32.xlu0 %v5065_v15, %s3652_s29  ;;  %v2330_v15 = vpop.permute.xlu2 %2329 }
 0x514   : > { %v5156_v21 = vpop.permute.xlu1 %2164 }
 0x515   : > { %v5149_v63 = vpop.permute.xlu0 %2241 }
 0x516   : > { %v2632_v8 = vld.sshfl [vmem:[#allocation1 + $0x8] sm:$0xff pattern:$0x73625140] }
 0x518   : > { %2466 = vrot.lane.b32.xlu1 %v2462_v0, %s3655_s5  ;;  %v2630_v0 = vld.sshfl [vmem:[#allocation1] sm:$0xff pattern:$0x73625140] }
 0x519   : > { %2639 = vst [vmem:[#allocation1] ss:$4 sm:$0xff] %v5139_v30 }
 0x51b   : > { %2455 = vrot.lane.b32.xlu0 %v2451_v44, %s3654_s4  ;;  %v5168_v16 = vpop.permute.xlu2 %2168 }
 0x51c   : > { %v2319_v47 = vpop.permute.xlu1 %2318 }
 0x51d   : > { %v5154_v49 = vpop.permute.xlu0 %2250 }
 0x520   : > { %2479 = vrot.lane.b32.xlu1 %v2475_v19, %s3656_s6  ;;  %v2642_v45 = vld.sshfl [vmem:[#allocation1 + $0x8] sm:$0xff pattern:$0x73625140]  ;;  %v2640_v18 = vld.sshfl [vmem:[#allocation1] sm:$0xff pattern:$0x73625140] }
 0x521   : > { %2650 = vst [vmem:[#allocation1 + $0x1] ss:$4 sm:$0xff] %v5139_v30 }
 0x523   : > { %2468 = vrot.lane.b32.xlu0 %v5081_v29, %s3655_s5  ;;  %v2342_v32 = vpop.permute.xlu2 %2341 }
 0x524   : > { %v2332_v22 = vpop.permute.xlu1 %2331 }
 0x525   : > { %v5162_v52 = vpop.permute.xlu0 %2260  ;;  %v2333_v50 = vsel %vm304_vm13, %v2330_v15, %v2332_v22 }
 0x528   : > { %v1807_v12 = vpop.f32.mrf.mxu3  ;;  %v2651_v51 = vld.sshfl [vmem:[#allocation1] sm:$0xff pattern:$0x73625140]  ;;  %v2653_v14 = vld.sshfl [vmem:[#allocation1 + $0x8] sm:$0xff pattern:$0x73625140] }
 0x529   : > { %v1811_v44 = vpack.c.bf16 %v1807_v12, %v1807_v12  ;;  %v1817_v54 = vmul.f32 %v4245_v24, %v1807_v12  ;;  %2661 = vst [vmem:[#allocation1 + $0x2] ss:$4 sm:$0xff] %v5139_v30 }
 0x52b   : > { %3549 = vst [vmem:[%s4216_s17 + $0xc] sm:$0xf] %v1811_v44  ;;  %v1823_v42 = vmul.f32 %v1817_v54, %v1817_v54  ;;  %2487 = vrot.lane.b32.xlu0 %v2483_v9, %s3657_s7  ;;  %v2362_v9 = vpop.permute.xlu2 %2361 }
 0x52c   : > { %v2351_v40 = vpop.permute.xlu1 %2350 }
 0x52d   : > { %v5170_v29 = vpop.permute.xlu0 %2271  ;;  %1824 = vadd.xlane.f32.xlu2 %v1823_v42 }
 0x530   : > { %v1809_v61 = vpop.f32.mrf.mxu3  ;;  %v2662_v12 = vld.sshfl [vmem:[#allocation1] sm:$0xff pattern:$0x73625140]  ;;  %v2664_v44 = vld.sshfl [vmem:[#allocation1 + $0x8] sm:$0xff pattern:$0x73625140] }
 0x531   : > { %2672 = vst [vmem:[#allocation1 + $0x3] ss:$4 sm:$0xff] %v5139_v30 }
 0x533   : > { %2504 = vrot.lane.b32.xlu0 %v2500_v39, %s3643_s20 }
 0x534   : > { %v2364_v15 = vpop.permute.xlu1 %2363 }
 0x535   : > { %v5175_v57 = vpop.permute.xlu0 %2273  ;;  %v2365_v39 = vsel %vm339_vm14, %v2362_v9, %v2364_v15 }
 0x538   : > { %v2675_v22 = vld.sshfl [vmem:[#allocation1 + $0x8] sm:$0xff pattern:$0x73625140]  ;;  %v5188_v61 = vld.sshfl [vmem:[#allocation1] sm:$0xff pattern:$0x73625140] }
 0x539   : > { %2682 = vst [vmem:[#allocation1] ss:$4 sm:$0xff] %v5139_v30 }
 0x53b   : > { %2612 = vrot.lane.b32.xlu0 %v2608_v38, %s3643_s20 }
 0x53d   : > { %v5179_v19 = vpop.permute.xlu0 %2284 }
 0x543   : > { %2614 = vrot.lane.b32.xlu0 %v2610_v5, %s3643_s20 }
 0x545   : > { %v2304_v42 = vpop.permute.xlu0 %2303  ;;  %2489 = vrot.lane.b32.xlu2 %v5115_v31, %s3657_s7 }
 0x546   : > { %v2307_v38 = vsel %vm5964_vm7, %v2304_v42, %v2306_v62  ;;  %v5205_v42 = vld.sshfl [vmem:[#allocation1] sm:$0xff pattern:$0x73625140]  ;;  %vm5988_vm7 = vcmask 72704  }
 0x547   : > { %v2393_v5 = vsel %vm445_vm1, %v2307_v38, %v4890_v13 }
 0x54a   : > { %1818 = vadd.xlane.f32.xlu1 %v1817_v54  ;;  %v5200_v54 = vld [vmem:[%s3704_s19 + $0x1c] sm:$0xf] }
 0x54b   : > { %2623 = vrot.lane.b32.xlu0 %v2619_v35, %s3644_s21  ;;  %v5203_v35 = vld.sshfl [vmem:[#allocation1 + $0x8] sm:$0xff pattern:$0x73625140] }
 0x54c   : > { %2694 = vst [vmem:[#allocation1 + $0x1] ss:$4 sm:$0xff] %v5200_v54 }
 0x54d   : > { %v2321_v9 = vpop.permute.xlu0 %2320  ;;  %2636 = vrot.lane.b32.xlu2 %v2632_v8, %s3645_s22 }
 0x54e   : > { %v2322_v15 = vsel %vm292_vm0, %v2319_v47, %v2321_v9  ;;  %v2375_v9 = vpop.permute.xlu2 %2374 }
 0x54f   : > { %v2395_v31 = vsel %vm448_vm3, %v2393_v5, %v2322_v15 }
 0x550   : > { %v5197_v62 = vsel %vm451_vm4, %v2395_v31, %v2333_v50 }
 0x553   : > { %2625 = vrot.lane.b32.xlu0 %v2621_v55, %s3644_s21  ;;  %v5210_v47 = vld.sshfl [vmem:[#allocation1] sm:$0xff pattern:$0x73625140] }
 0x554   : > { %2697 = vst [vmem:[#allocation1 + $0x2] ss:$4 sm:$0xff] %v5200_v54 }
 0x555   : > { %v2167_v13 = vpop.permute.xlu0 %2166  ;;  %2666 = vrot.lane.b32.xlu2 %v2662_v12, %s3648_s25 }
 0x55b   : > { %2634 = vrot.lane.b32.xlu0 %v2630_v0, %s3645_s22  ;;  %v5217_v55 = vld.sshfl [vmem:[#allocation1] sm:$0xff pattern:$0x73625140]  ;;  %v5219_v50 = vld.sshfl [vmem:[#allocation1 + $0x8] sm:$0xff pattern:$0x73625140] }
 0x55c   : > { %2708 = vst [vmem:[#allocation1 + $0x3] ss:$4 sm:$0xff] %v5200_v54 }
 0x55d   : > { %v2340_v8 = vpop.permute.xlu0 %2339  ;;  %2679 = vrot.lane.b32.xlu2 %v2675_v22, %s3649_s26 }
 0x55e   : > { %v2343_v12 = vsel %vm316_vm11, %v2340_v8, %v2342_v32  ;;  %v2427_v8 = vpop.permute.xlu2 %2426 }
 0x563   : > { %2502 = vrot.lane.b32.xlu1 %v5142_v36, %s3643_s20  ;;  %2646 = vrot.lane.b32.xlu0 %v2642_v45, %s3646_s23  ;;  %v5228_v36 = vld.sshfl [vmem:[#allocation1 + $0x8] sm:$0xff pattern:$0x73625140]  ;;  %v5230_v45 = vld.sshfl [vmem:[#allocation1] sm:$0xff pattern:$0x73625140] }
 0x564   : > { %2718 = vst [vmem:[#allocation1] ss:$4 sm:$0xff] %v5200_v54 }
 0x565   : > { %v2353_v0 = vpop.permute.xlu0 %2352 }
 0x566   : > { %v2354_v38 = vsel %vm327_vm12, %v2351_v40, %v2353_v0  ;;  %v1970_v0 = vsel %vm327_vm12, %v4896_v59, %v4905_v4  ;;  %v1981_v59 = vsel %vm339_vm14, %v4888_v1, %v4908_v23  ;;  %v2174_v4 = vsel %vm363_vm10, %v5136_v34, %v5156_v21  ;;  %v5276_v21 = vpop.permute.xlu2 %2444 }
 0x567   : > { %v2401_v5 = vsel %vm445_vm1, %v2343_v12, %v2354_v38 }
 0x568   : > { %v2403_v22 = vsel %vm448_vm3, %v2401_v5, %v2365_v39 }
 0x56a   : > { %v2171_v15 = vpop.permute.xlu1 %2170 }
 0x56b   : > { %2655 = vrot.lane.b32.xlu0 %v2651_v51, %s3647_s24  ;;  %2644 = vrot.lane.b32.xlu1 %v2640_v18, %s3646_s23  ;;  %v2175_v51 = vsel %vm363_vm10, %v2167_v13, %v5168_v16  ;;  %v5239_v18 = vld.sshfl [vmem:[#allocation1] sm:$0xff pattern:$0x73625140]  ;;  %v5241_v39 = vld.sshfl [vmem:[#allocation1 + $0x8] sm:$0xff pattern:$0x73625140]  ;;  %v1959_v16 = vsel %vm316_vm11, %v4893_v41, %v4876_v60 }
 0x56c   : > { %2729 = vst [vmem:[#allocation1 + $0x1] ss:$4 sm:$0xff] %v5200_v54  ;;  %v2017_v13 = vsel %vm445_vm1, %v1959_v16, %v1970_v0  ;;  %v5966_v60 = vld [vmem:[#allocation36_spill] sm:$0xff] }
 0x56d   : > { %v2173_v32 = vpop.permute.xlu0 %2172  ;;  %v2019_v23 = vsel %vm448_vm3, %v2017_v13, %v1981_v59 }
 0x56e   : > { %v2176_v31 = vsel %vm363_vm10, %v2171_v15, %v2173_v32  ;;  %v5969_v15 = vld [vmem:[#allocation38_spill] sm:$0xff] }
 0x56f   : > { %v2180_v40 = vsel %vm451_vm4, %v2176_v31, 0 }
 0x570   : > { %2183 = vmatpush.bf16.msrb.mxu0 %v2180_v40  ;;  %v5972_v40 = vld [vmem:[#allocation31_spill] sm:$0xff] }
 0x572   : > { %v2417_v12 = vpop.permute.xlu1 %2416 }
 0x573   : > { %2657 = vrot.lane.b32.xlu0 %v2653_v14, %s3647_s24  ;;  %2668 = vrot.lane.b32.xlu1 %v2664_v44, %s3648_s25  ;;  %v1923_v14 = vsel %vm5965_vm8, %v4861_v2, %v4858_v25  ;;  %v1992_v25 = vsel %vm351_vm15, %v4930_v7, %v4916_v28  ;;  %v1938_v2 = vsel %vm292_vm0, %v5966_v60, %v4872_v11  ;;  %v5280_v7 = vld.sshfl [vmem:[#allocation1 + $0x8] sm:$0xff pattern:$0x73625140]  ;;  %v5967_v28 = vld [vmem:[#allocation33_spill] sm:$0xff]  ;;  %vm5989_vm8 = vcmask 7168  }
 0x574   : > { %2184 = vmatpush.bf16.msrb.mxu0 %v2175_v51  ;;  %v2009_v41 = vsel %vm445_vm1, %v1923_v14, %v4586_v3  ;;  %v2021_v34 = vsel %vm451_vm4, %v2019_v23, %v1992_v25  ;;  %v5968_v3 = vld [vmem:[#allocation30_spill] sm:$0xff]  ;;  %v5970_v11 = vld [vmem:[#allocation37_spill] sm:$0xff] }
 0x575   : > { %v2373_v38 = vpop.permute.xlu0 %2372  ;;  %v1949_v32 = vsel %vm304_vm13, %v5970_v11, %v5969_v15  ;;  %v2011_v31 = vsel %vm448_vm3, %v2009_v41, %v1938_v2  ;;  %v5974_v14 = vld [vmem:[#allocation17_spill] sm:$0xff]  ;;  %v5975_v25 = vld [vmem:[#allocation34_spill] sm:$0xff]  ;;  %v5976_v41 = vld [vmem:[#allocation32_spill] sm:$0xff] }
 0x576   : > { %v2376_v44 = vsel %vm351_vm15, %v2373_v38, %v2375_v9  ;;  %v5278_v9 = vld.sshfl [vmem:[#allocation1] sm:$0xff pattern:$0x73625140]  ;;  %v5973_v38 = vld [vmem:[#allocation19_spill] sm:$0xff]  ;;  %v1913_v60 = vsel %vm363_vm10, %v5976_v41, %v5975_v25  ;;  %v5979_v15 = vld [vmem:[#allocation22_spill] sm:$0xff] }
 0x577   : > { %v5262_v5 = vsel %vm451_vm4, %v2403_v22, %v2376_v44  ;;  %v1891_v22 = vsel %vm339_vm14, %v5968_v3, %v5967_v28  ;;  %2740 = vst [vmem:[#allocation1 + $0x2] ss:$4 sm:$0xff] %v5200_v54  ;;  %v1880_v16 = vsel %vm327_vm12, %v5974_v14, %v5973_v38  ;;  %v5977_v28 = vld [vmem:[#allocation15_spill] sm:$0xff]  ;;  %v5978_v3 = vld [vmem:[#allocation16_spill] sm:$0xff]  ;;  %v5983_v14 = vld [vmem:[#allocation5_spill] sm:$0xff] }
 0x578   : > { %2185 = vmatpush.bf16.msrb.mxu0 %v2174_v4  ;;  %v2002_v13 = vsel %vm445_vm1, %v1880_v16, %v1891_v22  ;;  %v2013_v4 = vsel %vm451_vm4, %v2011_v31, %v1949_v32  ;;  %v5980_v11 = vld [vmem:[#allocation23_spill] sm:$0xff]  ;;  %v5336_v41 = vld [vmem:[%s5834_s1] sm:$0xf] }
 0x579   : > { %v1859_v32 = vsel %vm304_vm13, %v5980_v11, %v5979_v15 }
 0x57a   : > { %v2435_v1 = vpop.permute.xlu1 %2434 }
 0x57b   : > { %2677 = vrot.lane.b32.xlu0 %v5188_v61, %s3649_s26  ;;  %v5971_v61 = vld [vmem:[#allocation35_spill] sm:$0xff] }
 0x57c   : > { %2186 = vmatpush.bf16.msrb.mxu0 %v2021_v34  ;;  %v1902_v51 = vsel %vm351_vm15, %v5972_v40, %v5971_v61  ;;  %v5981_v40 = vld [vmem:[#allocation21_spill] sm:$0xff] }
 0x57d   : > { %v2419_v0 = vpop.permute.xlu0 %2418  ;;  %v2004_v23 = vsel %vm448_vm3, %v2002_v13, %v1902_v51  ;;  %v5982_v51 = vld [vmem:[#allocation18_spill] sm:$0xff]  ;;  %v2458_v13 = vpop.permute.xlu2 %2457 }
 0x57e   : > { %v2420_v44 = vsel %vm292_vm0, %v2417_v12, %v2419_v0  ;;  %v2510_v34 = vsel %vm445_vm1, %v5035_v6, %v2419_v0  ;;  %v2006_v31 = vsel %vm451_vm4, %v2004_v23, %v1913_v60  ;;  %v2743_v61 = vld.sshfl [vmem:[#allocation1 + $0x8] sm:$0xff pattern:$0x73625140]  ;;  %v2741_v6 = vld.sshfl [vmem:[#allocation1] sm:$0xff pattern:$0x73625140]  ;;  %v1870_v0 = vsel %vm316_vm11, %v5982_v51, %v5981_v40 }
 0x57f   : > { %v2508_v59 = vsel %vm445_vm1, %v5033_v17, %v2420_v44  ;;  %v1848_v17 = vsel %vm292_vm0, %v5978_v3, %v5977_v28  ;;  %v2513_v38 = vsel %vm448_vm3, %v2510_v34, %v2427_v8  ;;  %2751 = vst [vmem:[#allocation1 + $0x3] ss:$4 sm:$0xff] %v5200_v54 }
 0x580   : > { %2187 = vmatpush.bf16.msrb.mxu0 %v2013_v4  ;;  %v2512_v2 = vsel %vm448_vm3, %v2508_v59, %v2427_v8  ;;  %v1994_v16 = vsel %vm445_vm1, %v5983_v14, %v1848_v17 }
 0x581   : > { %v2515_v12 = vsel %vm451_vm4, %v2512_v2, %v2435_v1  ;;  %v1996_v59 = vsel %vm448_vm3, %v1994_v16, %v1859_v32 }
 0x582   : > { %v2447_v22 = vpop.permute.xlu1 %2446  ;;  %2546 = vrot.lane.b32.xlu2 %v2515_v12, %s3649_s26  ;;  %v1998_v4 = vsel %vm451_vm4, %v1996_v59, %v1870_v0  ;;  %v5368_v0 = vld [vmem:[%s3704_s19 + $0x20] sm:$0xf] }
 0x583   : > { %2689 = vrot.lane.b32.xlu0 %v5203_v35, %s3650_s27  ;;  %v2448_v15 = vsel %vm5986_vm5, %v5276_v21, %v2447_v22  ;;  %vm5997_vm5 = vcmask 89088  }
 0x584   : > { %2188 = vmatpush.bf16.msrb.mxu0 %v2006_v31 }
 0x585   : > { %v2437_v44 = vpop.permute.xlu0 %2436  ;;  %v2478_v34 = vpop.permute.xlu2 %2477 }
 0x586   : > { %v2438_v35 = vsel %vm5984_vm9, %v2435_v1, %v2437_v44  ;;  %v2752_v1 = vld.sshfl [vmem:[#allocation1] sm:$0xff pattern:$0x73625140]  ;;  %v5342_v60 = vld.sshfl [vmem:[#allocation1 + $0x8] sm:$0xff pattern:$0x73625140] }
 0x587   : > { %v2517_v25 = vsel %vm451_vm4, %v2513_v38, %v2438_v35  ;;  %2791 = vst [vmem:[#allocation1] ss:$4 sm:$0xff] %v5200_v54  ;;  %vm5990_vm9 = vcmask 867328  }
 0x588   : > { %2189 = vmatpush.bf16.msrb.mxu0 %v1998_v4  ;;  %2548 = vrot.lane.b32.xlu1 %v2517_v25, %s3649_s26 }
 0x58a   : > { %v2467_v8 = vpop.permute.xlu1 %2466  ;;  %2702 = vrot.lane.b32.xlu2 %v5217_v55, %s3643_s20 }
 0x58b   : > { %3553 = vmatmul.msk.bf16.vlgmr.msrb.gmra.mxu0 %vm351_vm15, %v5336_v41  ;;  %2715 = vrot.lane.b32.xlu0 %v5228_v36, %s3644_s21 }
 0x58d   : > { %v2456_v2 = vpop.permute.xlu0 %2455 }
 0x58e   : > { %v2520_v55 = vsel %vm445_vm1, %v5276_v21, %v2456_v2  ;;  %v2459_v36 = vsel %vm5985_vm2, %v2456_v2, %v2458_v13  ;;  %v5353_v28 = vld.sshfl [vmem:[#allocation1] sm:$0xff pattern:$0x73625140]  ;;  %v5355_v3 = vld.sshfl [vmem:[#allocation1 + $0x8] sm:$0xff pattern:$0x73625140] }
 0x58f   : > { %v2525_v23 = vsel %vm448_vm3, %v2520_v55, %v2467_v8  ;;  %2795 = vst [vmem:[#allocation1 + $0x1] ss:$4 sm:$0xff] %v5200_v54  ;;  %vm5992_vm2 = vcmask 162816  }
 0x590   : > { %2687 = vrot.lane.b32.xlu1 %v5205_v42, %s3650_s27  ;;  %v2529_v12 = vsel %vm451_vm4, %v2525_v23, %v2478_v34  ;;  %v2523_v42 = vsel %vm445_vm1, %v2448_v15, %v2459_v36 }
 0x592   : > { %v2480_v17 = vpop.permute.xlu1 %2479 }
 0x593   : > { %2550 = vrot.lane.b32.xlu0 %v2529_v12, %s3649_s26  ;;  %v2481_v31 = vsel %vm5988_vm7, %v2478_v34, %v2480_v17  ;;  %vm5999_vm7 = vcmask 80896  }
 0x595   : > { %v2469_v11 = vpop.permute.xlu0 %2468 }
 0x596   : > { %v2470_v32 = vsel %vm5987_vm6, %v2467_v8, %v2469_v11  ;;  %v2796_v54 = vld.sshfl [vmem:[#allocation1] sm:$0xff pattern:$0x73625140]  ;;  %v5373_v21 = vld.sshfl [vmem:[#allocation1 + $0x8] sm:$0xff pattern:$0x73625140] }
 0x597   : > { %v2527_v40 = vsel %vm448_vm3, %v2523_v42, %v2470_v32  ;;  %2807 = vst [vmem:[#allocation1 + $0x2] ss:$4 sm:$0xff] %v5368_v0  ;;  %vm5998_vm6 = vcmask 154624  }
 0x598   : > { %v2531_v51 = vsel %vm451_vm4, %v2527_v40, %v2481_v31  ;;  %2704 = vrot.lane.b32.xlu1 %v5219_v50, %s3643_s20 }
 0x599   : > { %2552 = vrot.lane.b32.xlu2 %v2531_v51, %s3649_s26 }
 0x59b   : > { %2725 = vrot.lane.b32.xlu0 %v5241_v39, %s3645_s22 }
 0x59d   : > { %v2488_v22 = vpop.permute.xlu0 %2487 }
 0x59e   : > { %v5383_v50 = vld.sshfl [vmem:[#allocation1] sm:$0xff pattern:$0x73625140]  ;;  %v2533_v17 = vsel %vm445_vm1, %v2488_v22, %v5125_v48 }
 0x59f   : > { %2813 = vst [vmem:[#allocation1 + $0x3] ss:$4 sm:$0xff] %v5368_v0 }
 0x5a0   : > { %v5376_v38 = vpop.xlane.xlu2 %1824  ;;  %2713 = vrot.lane.b32.xlu1 %v5230_v45, %s3644_s21 }
 0x5a1   : > { %2734 = vrot.lane.b32.xlu2 %v5278_v9, %s3646_s23 }
 0x5a3   : > { %2745 = vrot.lane.b32.xlu0 %v2741_v6, %s3647_s24 }
 0x5a5   : > { %v2505_v39 = vpop.permute.xlu0 %2504 }
 0x5a6   : > { %v2816_v44 = vld.sshfl [vmem:[#allocation1 + $0x8] sm:$0xff pattern:$0x73625140]  ;;  %v2814_v9 = vld.sshfl [vmem:[#allocation1] sm:$0xff pattern:$0x73625140] }
 0x5a7   : > { %2823 = vst [vmem:[#allocation1] ss:$4 sm:$0xff] %v5368_v0 }
 0x5a8   : > { %v2490_v14 = vpop.permute.xlu2 %2489  ;;  %2723 = vrot.lane.b32.xlu1 %v5239_v18, %s3645_s22 }
 0x5a9   : > { %2747 = vrot.lane.b32.xlu2 %v2743_v61, %s3647_s24  ;;  %v2491_v16 = vsel %vm5989_vm8, %v2488_v22, %v2490_v14  ;;  %vm6000_vm8 = vcmask 72704  }
 0x5aa   : > { %v2535_v45 = vsel %vm445_vm1, %v2491_v16, %v5127_v27 }
 0x5ab   : > { %v2539_v13 = vsel %vm448_vm3, %v2535_v45, %v2505_v39 }
 0x5ac   : > { %2556 = vrot.lane.b32.xlu0 %v2539_v13, %s3649_s26 }
 0x5ad   : > { %v2613_v6 = vpop.permute.xlu0 %2612 }
 0x5ae   : > { %v2824_v18 = vld.sshfl [vmem:[#allocation1] sm:$0xff pattern:$0x73625140]  ;;  %v2826_v61 = vld.sshfl [vmem:[#allocation1 + $0x8] sm:$0xff pattern:$0x73625140] }
 0x5af   : > { %2834 = vst [vmem:[#allocation1 + $0x1] ss:$4 sm:$0xff] %v5368_v0 }
 0x5b0   : > { %2736 = vrot.lane.b32.xlu1 %v5280_v7, %s3646_s23 }
 0x5b1   : > { %2756 = vrot.lane.b32.xlu2 %v2752_v1, %s3648_s25  ;;  %v2637_v1 = vpop.permute.xlu2 %2636 }
 0x5b4   : > { %2818 = vrot.lane.b32.xlu0 %v2814_v9, %s3652_s29 }
 0x5b5   : > { %v2615_v35 = vpop.permute.xlu0 %2614 }
 0x5b6   : > { %v2616_v27 = vsel %vm292_vm0, %v2613_v6, %v2615_v35  ;;  %v2835_v59 = vld.sshfl [vmem:[#allocation1] sm:$0xff pattern:$0x73625140]  ;;  %v2837_v4 = vld.sshfl [vmem:[#allocation1 + $0x8] sm:$0xff pattern:$0x73625140] }
 0x5b7   : > { %2845 = vst [vmem:[#allocation1 + $0x2] ss:$4 sm:$0xff] %v5368_v0  ;;  %v2762_v32 = vsel %vm445_vm1, %v5139_v30, %v2616_v27 }
 0x5b9   : > { %2800 = vrot.lane.b32.xlu2 %v2796_v54, %s3643_s20  ;;  %v2667_v31 = vpop.permute.xlu2 %2666 }
 0x5bc   : > { %2830 = vrot.lane.b32.xlu0 %v2826_v61, %s3653_s30 }
 0x5bd   : > { %v2624_v25 = vpop.permute.xlu0 %2623  ;;  %v5407_v2 = vpop.xlane.xlu1 %1818 }
 0x5be   : > { %v2848_v34 = vld.sshfl [vmem:[#allocation1 + $0x8] sm:$0xff pattern:$0x73625140]  ;;  %v2846_v42 = vld.sshfl [vmem:[#allocation1] sm:$0xff pattern:$0x73625140] }
 0x5bf   : > { %2856 = vst [vmem:[#allocation1 + $0x3] ss:$4 sm:$0xff] %v5368_v0 }
 0x5c1   : > { %2820 = vrot.lane.b32.xlu2 %v2816_v44, %s3652_s29  ;;  %v2680_v16 = vpop.permute.xlu2 %2679 }
 0x5c4   : > { %2850 = vrot.lane.b32.xlu0 %v2846_v42, %s3655_s5 }
 0x5c5   : > { %v2626_v7 = vpop.permute.xlu0 %2625 }
 0x5c6   : > { %v2627_v8 = vsel %vm304_vm13, %v2624_v25, %v2626_v7  ;;  %v2859_v25 = vld.sshfl [vmem:[#allocation1 + $0x8] sm:$0xff pattern:$0x73625140]  ;;  %v2857_v7 = vld.sshfl [vmem:[#allocation1] sm:$0xff pattern:$0x73625140] }
 0x5c7   : > { %v2764_v48 = vsel %vm448_vm3, %v2762_v32, %v2627_v8  ;;  %2866 = vst [vmem:[#allocation1] ss:$4 sm:$0xff] %v5368_v0 }
 0x5c9   : > { %2839 = vrot.lane.b32.xlu2 %v2835_v59, %s3654_s4 }
 0x5cc   : > { %2863 = vrot.lane.b32.xlu0 %v2859_v25, %s3656_s6 }
 0x5cd   : > { %v2635_v55 = vpop.permute.xlu0 %2634 }
 0x5ce   : > { %v2638_v23 = vsel %vm316_vm11, %v2635_v55, %v2637_v1 }
 0x5cf   : > { %v5425_v22 = vsel %vm451_vm4, %v2764_v48, %v2638_v23  ;;  %v2867_v23 = vld.sshfl [vmem:[#allocation1] sm:$0xff pattern:$0x73625140] }
 0x5d1   : > { %2852 = vrot.lane.b32.xlu2 %v2848_v34, %s3655_s5  ;;  %v2869_v34 = vld.sshfl [vmem:[#allocation1 + $0x8] sm:$0xff pattern:$0x73625140] }
 0x5d2   : > { %2877 = vst [vmem:[#allocation1 + $0x1] ss:$4 sm:$0xff] %v5368_v0 }
 0x5d4   : > { %2871 = vrot.lane.b32.xlu0 %v2867_v23, %s3657_s7 }
 0x5d5   : > { %v2503_v12 = vpop.permute.xlu1 %2502  ;;  %v2647_v36 = vpop.permute.xlu0 %2646 }
 0x5d6   : > { %v2506_v15 = vsel %vm292_vm0, %v2503_v12, %v2505_v39 }
 0x5d7   : > { %v2537_v11 = vsel %vm448_vm3, %v2533_v17, %v2506_v15 }
 0x5d8   : > { %2554 = vrot.lane.b32.xlu1 %v2537_v11, %s3649_s26 }
 0x5dc   : > { %v5437_v61 = vpop.permute.xlu2 %2546 }
 0x5dd   : > { %v2656_v40 = vpop.permute.xlu0 %2655  ;;  %v2645_v51 = vpop.permute.xlu1 %2644 }
 0x5de   : > { %v2648_v54 = vsel %vm327_vm12, %v2645_v51, %v2647_v36  ;;  %v5462_v51 = vld.sshfl [vmem:[#allocation1 + $0x8] sm:$0xff pattern:$0x73625140] }
 0x5e0   : > { %2758 = vrot.lane.b32.xlu1 %v5342_v60, %s3648_s25 }
 0x5e4   : > { %v2703_v27 = vpop.permute.xlu2 %2702 }
 0x5e5   : > { %v2658_v39 = vpop.permute.xlu0 %2657  ;;  %v2669_v14 = vpop.permute.xlu1 %2668 }
 0x5e6   : > { %v2659_v45 = vsel %vm339_vm14, %v2656_v40, %v2658_v39  ;;  %v2670_v30 = vsel %vm351_vm15, %v2667_v31, %v2669_v14  ;;  %v5460_v40 = vld.sshfl [vmem:[#allocation1] sm:$0xff pattern:$0x73625140] }
 0x5e7   : > { %v2770_v44 = vsel %vm445_vm1, %v2648_v54, %v2659_v45  ;;  %2881 = vst [vmem:[#allocation1 + $0x2] ss:$4 sm:$0xff] %v5368_v0 }
 0x5e8   : > { %2802 = vrot.lane.b32.xlu1 %v5373_v21, %s3643_s20  ;;  %v2772_v60 = vsel %vm448_vm3, %v2770_v44, %v2670_v30 }
 0x5ed   : > { %v2678_v9 = vpop.permute.xlu0 %2677 }
 0x5ee   : > { %v2681_v6 = vsel %vm363_vm10, %v2678_v9, %v2680_v16  ;;  %v5470_v16 = vld [vmem:[%s3704_s19 + $0x1c] sm:$0xf]  ;;  %v2884_v30 = vld.sshfl [vmem:[#allocation1 + $0x8] sm:$0xff pattern:$0x73625140] }
 0x5ef   : > { %v5435_v13 = vsel %vm451_vm4, %v2772_v60, %v2681_v6  ;;  %v2882_v44 = vld.sshfl [vmem:[#allocation1] sm:$0xff pattern:$0x73625140]  ;;  %2888 = vrot.lane.b32.xlu0 %v2884_v30, %s3643_s20 }
 0x5f0   : > { %2810 = vrot.lane.b32.xlu1 %v5383_v50, %s3651_s28  ;;  %2991 = vst [vmem:[#allocation1 + $0x1] ss:$4 sm:$0xff] %v5470_v16 }
 0x5f3   : > { %v5447_v8 = vpop.permute.xlu2 %2552 }
 0x5f5   : > { %v2690_v35 = vpop.permute.xlu0 %2689 }
 0x5f7   : > { %v5476_v6 = vld.sshfl [vmem:[#allocation1] sm:$0xff pattern:$0x73625140]  ;;  %v5478_v60 = vld.sshfl [vmem:[#allocation1 + $0x8] sm:$0xff pattern:$0x73625140] }
 0x5f8   : > { %2828 = vrot.lane.b32.xlu1 %v2824_v18, %s3653_s30  ;;  %3002 = vst [vmem:[#allocation1 + $0x2] ss:$4 sm:$0xff] %v5470_v16 }
 0x5fa   : > { %v5442_v59 = vpop.permute.xlu1 %2548 }
 0x5fb   : > { %v2735_v15 = vpop.permute.xlu2 %2734 }
 0x5fd   : > { %v2716_v21 = vpop.permute.xlu0 %2715 }
 0x600   : > { %2841 = vrot.lane.b32.xlu1 %v2837_v4, %s3654_s4 }
 0x602   : > { %v2688_v1 = vpop.permute.xlu1 %2687 }
 0x603   : > { %v2691_v50 = vsel %vm5990_vm9, %v2688_v1, %v2690_v35  ;;  %v2748_v48 = vpop.permute.xlu2 %2747  ;;  %vm6001_vm9 = vcmask 7168  }
 0x604   : > { %v2777_v36 = vsel %vm445_vm1, %v2691_v50, %v5210_v47  ;;  %v5485_v50 = vld.sshfl [vmem:[#allocation1] sm:$0xff pattern:$0x73625140] }
 0x605   : > { %v5450_v55 = vpop.permute.xlu0 %2550 }
 0x608   : > { %v2191_v18 = vpop.f32.mrf.mxu0 }
 0x609   : > { %v2195_v12 = vpack.c.bf16 %v2191_v18, %v2191_v18  ;;  %v2201_v4 = vmul.f32 %v4245_v24, %v2191_v18  ;;  %v5487_v18 = vld.sshfl [vmem:[#allocation1 + $0x8] sm:$0xff pattern:$0x73625140] }
 0x60a   : > { %v2705_v17 = vpop.permute.xlu1 %2704  ;;  %3013 = vst [vmem:[#allocation1 + $0x3] ss:$4 sm:$0xff] %v5470_v16 }
 0x60b   : > { %3554 = vst [vmem:[%s4216_s17 + $0x10] sm:$0xf] %v2195_v12  ;;  %2202 = vadd.xlane.f32.xlu2 %v2201_v4  ;;  %v2706_v11 = vsel %vm292_vm0, %v2703_v27, %v2705_v17  ;;  %v2207_v1 = vmul.f32 %v2201_v4, %v2201_v4 }
 0x60c   : > { %v2779_v42 = vsel %vm448_vm3, %v2777_v36, %v2706_v11 }
 0x60d   : > { %v2726_v32 = vpop.permute.xlu0 %2725 }
 0x610   : > { %v2193_v31 = vpop.f32.mrf.mxu0 }
 0x611   : > { %v5490_v23 = vld.sshfl [vmem:[#allocation1] sm:$0xff pattern:$0x73625140]  ;;  %v5492_v12 = vld.sshfl [vmem:[#allocation1 + $0x8] sm:$0xff pattern:$0x73625140]  ;;  %v2757_v31 = vpop.permute.xlu2 %2756 }
 0x612   : > { %v2714_v47 = vpop.permute.xlu1 %2713  ;;  %3023 = vst [vmem:[#allocation1] ss:$4 sm:$0xff] %v5470_v16 }
 0x613   : > { %v2717_v54 = vsel %vm304_vm13, %v2714_v47, %v2716_v21 }
 0x614   : > { %v5467_v39 = vsel %vm451_vm4, %v2779_v42, %v2717_v54 }
 0x615   : > { %v2746_v14 = vpop.permute.xlu0 %2745 }
 0x616   : > { %v2749_v45 = vsel %vm339_vm14, %v2746_v14, %v2748_v48 }
 0x619   : > { %v5495_v36 = vld.sshfl [vmem:[#allocation1] sm:$0xff pattern:$0x73625140] }
 0x61a   : > { %v2724_v9 = vpop.permute.xlu1 %2723 }
 0x61b   : > { %v2727_v0 = vsel %vm316_vm11, %v2724_v9, %v2726_v32  ;;  %v2801_v9 = vpop.permute.xlu2 %2800 }
 0x61e   : > { %v2557_v42 = vpop.permute.xlu0 %2556 }
 0x622   : > { %v2737_v35 = vpop.permute.xlu1 %2736 }
 0x623   : > { %v2738_v27 = vsel %vm327_vm12, %v2735_v15, %v2737_v35  ;;  %2873 = vrot.lane.b32.xlu2 %v2869_v34, %s3657_s7  ;;  %v5497_v34 = vld.sshfl [vmem:[#allocation1 + $0x8] sm:$0xff pattern:$0x73625140] }
 0x624   : > { %v2785_v21 = vsel %vm445_vm1, %v2727_v0, %v2738_v27  ;;  %3034 = vst [vmem:[#allocation1 + $0x1] ss:$4 sm:$0xff] %v5470_v16  ;;  %v2275_v27 = vsel %vm339_vm14, %v5170_v29, %v5175_v57  ;;  %v5991_v57 = vld [vmem:[#allocation13_spill] sm:$0xff] }
 0x625   : > { %v2787_v25 = vsel %vm448_vm3, %v2785_v21, %v2749_v45  ;;  %v2232_v21 = vsel %vm292_vm0, %v5112_v26, %v5122_v37  ;;  %v2297_v26 = vsel %vm363_vm10, %v5120_v53, %v5147_v33 }
 0x62a   : > { %2208 = vadd.xlane.f32.xlu1 %v2207_v1 }
 0x62b   : > { %v5500_v4 = vld.sshfl [vmem:[#allocation1] sm:$0xff pattern:$0x73625140]  ;;  %v5502_v17 = vld.sshfl [vmem:[#allocation1 + $0x8] sm:$0xff pattern:$0x73625140] }
 0x62c   : > { %3045 = vst [vmem:[#allocation1 + $0x2] ss:$4 sm:$0xff] %v5470_v16 }
 0x633   : > { %v5506_v15 = vld.sshfl [vmem:[#allocation1] sm:$0xff pattern:$0x73625140]  ;;  %v5508_v11 = vld.sshfl [vmem:[#allocation1 + $0x8] sm:$0xff pattern:$0x73625140] }
 0x634   : > { %3056 = vst [vmem:[#allocation1 + $0x3] ss:$4 sm:$0xff] %v5470_v16 }
 0x63b   : > { %v5517_v48 = vld.sshfl [vmem:[#allocation1] sm:$0xff pattern:$0x73625140]  ;;  %v5519_v14 = vld.sshfl [vmem:[#allocation1 + $0x8] sm:$0xff pattern:$0x73625140] }
 0x63c   : > { %3066 = vst [vmem:[#allocation1] ss:$4 sm:$0xff] %v5470_v16 }
 0x643   : > { %2861 = vrot.lane.b32.xlu1 %v2857_v7, %s3656_s6  ;;  %v2559_v7 = vsel %vm363_vm10, %v5450_v55, %v5447_v8  ;;  %v5530_v8 = vld [vmem:[%s3704_s19 + $0x20] sm:$0xf]  ;;  %v5534_v35 = vld.sshfl [vmem:[#allocation1 + $0x8] sm:$0xff pattern:$0x73625140] }
 0x644   : > { %v5532_v55 = vld.sshfl [vmem:[#allocation1] sm:$0xff pattern:$0x73625140] }
 0x645   : > { %3078 = vst [vmem:[#allocation1 + $0x1] ss:$4 sm:$0xff] %v5530_v8 }
 0x64a   : > { %v2555_v32 = vpop.permute.xlu1 %2554 }
 0x64b   : > { %2886 = vrot.lane.b32.xlu1 %v2882_v44, %s3643_s20  ;;  %v2560_v47 = vsel %vm363_vm10, %v2555_v32, %v2557_v42  ;;  %v2558_v44 = vsel %vm363_vm10, %v5437_v61, %v5442_v59  ;;  %v2286_v61 = vsel %vm351_vm15, %v5108_v20, %v5179_v19  ;;  %v2243_v20 = vsel %vm304_vm13, %v5134_v56, %v5149_v63  ;;  %v2821_v19 = vpop.permute.xlu2 %2820 }
 0x64c   : > { %v2564_v54 = vsel %vm451_vm4, %v2560_v47, 0  ;;  %v2254_v42 = vsel %vm316_vm11, %v5154_v49, %v5095_v43 }
 0x64d   : > { %2567 = vmatpush.bf16.msrb.mxu1 %v2564_v54 }
 0x651   : > { %2568 = vmatpush.bf16.msrb.mxu1 %v2559_v7 }
 0x652   : > { %v2759_v45 = vpop.permute.xlu1 %2758 }
 0x653   : > { %v2760_v30 = vsel %vm351_vm15, %v2757_v31, %v2759_v45  ;;  %v2840_v7 = vpop.permute.xlu2 %2839 }
 0x654   : > { %v5527_v0 = vsel %vm451_vm4, %v2787_v25, %v2760_v30  ;;  %v2264_v25 = vsel %vm327_vm12, %v5162_v52, %v5129_v58  ;;  %v2819_v58 = vpop.permute.xlu0 %2818 }
 0x655   : > { %2569 = vmatpush.bf16.msrb.mxu1 %v2558_v44  ;;  %v2386_v1 = vsel %vm445_vm1, %v2264_v25, %v2275_v27  ;;  %v2822_v32 = vsel %vm5992_vm2, %v2819_v58, %v2821_v19 }
 0x656   : > { %v2388_v29 = vsel %vm448_vm3, %v2386_v1, %v2286_v61  ;;  %v5993_v61 = vld [vmem:[#allocation14_spill] sm:$0xff] }
 0x657   : > { %v2390_v52 = vsel %vm451_vm4, %v2388_v29, %v2297_v26 }
 0x659   : > { %2570 = vmatpush.bf16.msrb.mxu1 %v5262_v5  ;;  %v2378_v5 = vsel %vm445_vm1, %v5991_v57, %v2232_v21 }
 0x65a   : > { %v2803_v59 = vpop.permute.xlu1 %2802  ;;  %v2380_v56 = vsel %vm448_vm3, %v2378_v5, %v2243_v20 }
 0x65b   : > { %v2804_v37 = vsel %vm292_vm0, %v2801_v9, %v2803_v59  ;;  %v2894_v53 = vsel %vm445_vm1, %v5355_v3, %v2803_v59  ;;  %v2382_v43 = vsel %vm451_vm4, %v2380_v56, %v2254_v42  ;;  %v2853_v44 = vpop.permute.xlu2 %2852  ;;  %v5994_v59 = vld [vmem:[#allocation24_spill] sm:$0xff]  ;;  %v5995_v42 = vld [vmem:[#allocation9_spill] sm:$0xff] }
 0x65c   : > { %v2892_v33 = vsel %vm445_vm1, %v5353_v28, %v2804_v37  ;;  %v1054_v21 = vadd.f32 %v5994_v59, %v5993_v61 }
 0x65d   : > { %2571 = vmatpush.bf16.msrb.mxu1 %v5197_v62  ;;  %v5563_v62 = vld.sshfl [vmem:[#allocation1] sm:$0xff pattern:$0x73625140] }
 0x65e   : > { %3081 = vst [vmem:[#allocation1 + $0x2] ss:$4 sm:$0xff] %v5530_v8  ;;  %v1438_v25 = vadd.f32 %v5085_v46, %v1054_v21 }
 0x660   : > { %v1822_v1 = vadd.f32 %v5407_v2, %v1438_v25  ;;  %v2831_v2 = vpop.permute.xlu0 %2830 }
 0x661   : > { %2572 = vmatpush.bf16.msrb.mxu1 %v2390_v52 }
 0x662   : > { %v2811_v63 = vpop.permute.xlu1 %2810 }
 0x663   : > { %v2896_v31 = vsel %vm448_vm3, %v2892_v33, %v2811_v63  ;;  %v2897_v47 = vsel %vm448_vm3, %v2894_v53, %v2811_v63 }
 0x664   : > { %v2901_v49 = vsel %vm451_vm4, %v2897_v47, %v2822_v32  ;;  %v2899_v54 = vsel %vm451_vm4, %v2896_v31, %v2819_v58  ;;  %v5996_v32 = vld [vmem:[#allocation20_spill] sm:$0xff] }
 0x665   : > { %2573 = vmatpush.bf16.msrb.mxu1 %v2382_v43  ;;  %2932 = vrot.lane.b32.xlu2 %v2901_v49, %s3649_s26  ;;  %v5584_v28 = vld.sshfl [vmem:[#allocation1] sm:$0xff pattern:$0x73625140]  ;;  %v5586_v3 = vld.sshfl [vmem:[#allocation1 + $0x8] sm:$0xff pattern:$0x73625140]  ;;  %v1059_v56 = vadd.f32 %v5996_v32, %v5995_v42 }
 0x666   : > { %2930 = vrot.lane.b32.xlu0 %v2899_v54, %s3649_s26  ;;  %3092 = vst [vmem:[#allocation1 + $0x3] ss:$4 sm:$0xff] %v5530_v8  ;;  %v5618_v43 = vld [vmem:[%s3704_s19 + $0x24] sm:$0xf] }
 0x667   : > { %v1443_v63 = vadd.f32 %v5090_v10, %v1059_v56 }
 0x668   : > { %3558 = vmatmul.msk.bf16.vlgmr.msrb.gmra.mxu1 %vm351_vm15, %v5336_v41  ;;  %v2851_v61 = vpop.permute.xlu0 %2850 }
 0x669   : > { %v1827_v31 = vadd.f32 %v5376_v38, %v1443_v63 }
 0x66a   : > { %v2829_v37 = vpop.permute.xlu1 %2828 }
 0x66b   : > { %v2832_v38 = vsel %vm5998_vm6, %v2829_v37, %v2831_v2 }
 0x66d   : > { %v5589_v45 = vld.sshfl [vmem:[#allocation1] sm:$0xff pattern:$0x73625140]  ;;  %v5591_v30 = vld.sshfl [vmem:[#allocation1 + $0x8] sm:$0xff pattern:$0x73625140] }
 0x66e   : > { %3102 = vst [vmem:[#allocation1] ss:$4 sm:$0xff] %v5530_v8 }
 0x670   : > { %v2864_v21 = vpop.permute.xlu0 %2863 }
 0x672   : > { %v2842_v46 = vpop.permute.xlu1 %2841 }
 0x675   : > { %v3105_v9 = vld.sshfl [vmem:[#allocation1 + $0x8] sm:$0xff pattern:$0x73625140]  ;;  %v5594_v27 = vld.sshfl [vmem:[#allocation1] sm:$0xff pattern:$0x73625140] }
 0x676   : > { %3109 = vrot.lane.b32.xlu2 %v3105_v9, %s3645_s22  ;;  %3113 = vst [vmem:[#allocation1 + $0x1] ss:$4 sm:$0xff] %v5530_v8 }
 0x678   : > { %v2872_v42 = vpop.permute.xlu0 %2871 }
 0x67d   : > { %v3114_v5 = vld.sshfl [vmem:[#allocation1] sm:$0xff pattern:$0x73625140]  ;;  %v3116_v20 = vld.sshfl [vmem:[#allocation1 + $0x8] sm:$0xff pattern:$0x73625140] }
 0x67e   : > { %v2203_v29 = vpop.xlane.xlu2 %2202  ;;  %3124 = vst [vmem:[#allocation1 + $0x2] ss:$4 sm:$0xff] %v5530_v8 }
 0x67f   : > { %v5602_v57 = vadd.f32 %v2203_v29, %v1822_v1  ;;  %v2904_v1 = vsel %vm445_vm1, %v2829_v37, %v2840_v7 }
 0x680   : > { %v2909_v32 = vsel %vm448_vm3, %v2904_v1, %v2851_v61 }
 0x685   : > { %v3125_v19 = vld.sshfl [vmem:[#allocation1] sm:$0xff pattern:$0x73625140]  ;;  %v3127_v26 = vld.sshfl [vmem:[#allocation1 + $0x8] sm:$0xff pattern:$0x73625140] }
 0x686   : > { %3129 = vrot.lane.b32.xlu2 %v3125_v19, %s3647_s24  ;;  %3135 = vst [vmem:[#allocation1 + $0x3] ss:$4 sm:$0xff] %v5530_v8  ;;  %v2854_v19 = vsel %vm5999_vm7, %v2851_v61, %v2853_v44  ;;  %v2889_v44 = vpop.permute.xlu0 %2888  ;;  %v2917_v61 = vsel %vm445_vm1, %v2872_v42, %v5460_v40 }
 0x68d   : > { %v3138_v58 = vld.sshfl [vmem:[#allocation1 + $0x8] sm:$0xff pattern:$0x73625140]  ;;  %v3136_v52 = vld.sshfl [vmem:[#allocation1] sm:$0xff pattern:$0x73625140] }
 0x68e   : > { %3175 = vst [vmem:[#allocation1] ss:$4 sm:$0xff] %v5530_v8 }
 0x695   : > { %v5610_v53 = vld.sshfl [vmem:[#allocation1] sm:$0xff pattern:$0x73625140]  ;;  %v5612_v33 = vld.sshfl [vmem:[#allocation1 + $0x8] sm:$0xff pattern:$0x73625140] }
 0x696   : > { %3179 = vst [vmem:[#allocation1 + $0x1] ss:$4 sm:$0xff] %v5530_v8  ;;  %v2843_v8 = vsel %vm5997_vm5, %v2840_v7, %v2842_v46  ;;  %vm6002_vm5 = vmmov %vm5998_vm6  ;;  %vm6003_vm6 = vcmask 89088  }
 0x697   : > { %v2907_v29 = vsel %vm445_vm1, %v2832_v38, %v2843_v8  ;;  %v2874_v38 = vpop.permute.xlu2 %2873 }
 0x698   : > { %v2911_v63 = vsel %vm448_vm3, %v2907_v29, %v2854_v19  ;;  %v2875_v19 = vsel %vm6001_vm9, %v2872_v42, %v2874_v38 }
 0x699   : > { %v2919_v40 = vsel %vm445_vm1, %v2875_v19, %v5462_v51 }
 0x69d   : > { %v2209_v47 = vpop.xlane.xlu1 %2208  ;;  %v3180_v54 = vld.sshfl [vmem:[#allocation1] sm:$0xff pattern:$0x73625140]  ;;  %v3182_v9 = vld.sshfl [vmem:[#allocation1 + $0x8] sm:$0xff pattern:$0x73625140] }
 0x69e   : > { %v5620_v49 = vadd.f32 %v2209_v47, %v1827_v31  ;;  %3191 = vst [vmem:[#allocation1 + $0x2] ss:$4 sm:$0xff] %v5618_v43 }
 0x6a5   : > { %v3192_v59 = vld.sshfl [vmem:[#allocation1] sm:$0xff pattern:$0x73625140] }
 0x6a6   : > { %3197 = vst [vmem:[#allocation1 + $0x3] ss:$4 sm:$0xff] %v5618_v43 }
 0x6ad   : > { %v3198_v25 = vld.sshfl [vmem:[#allocation1] sm:$0xff pattern:$0x73625140]  ;;  %v3200_v10 = vld.sshfl [vmem:[#allocation1 + $0x8] sm:$0xff pattern:$0x73625140] }
 0x6ae   : > { %3207 = vst [vmem:[#allocation1] ss:$4 sm:$0xff] %v5618_v43 }
 0x6b5   : > { %v2862_v56 = vpop.permute.xlu1 %2861  ;;  %v3208_v7 = vld.sshfl [vmem:[#allocation1] sm:$0xff pattern:$0x73625140]  ;;  %v3210_v37 = vld.sshfl [vmem:[#allocation1 + $0x8] sm:$0xff pattern:$0x73625140] }
 0x6b6   : > { %v2865_v46 = vsel %vm6000_vm8, %v2862_v56, %v2864_v21  ;;  %v2913_v31 = vsel %vm451_vm4, %v2909_v32, %v2862_v56  ;;  %3218 = vst [vmem:[#allocation1 + $0x1] ss:$4 sm:$0xff] %v5618_v43 }
 0x6b7   : > { %2934 = vrot.lane.b32.xlu1 %v2913_v31, %s3649_s26  ;;  %v2915_v2 = vsel %vm451_vm4, %v2911_v63, %v2865_v46 }
 0x6b8   : > { %2936 = vrot.lane.b32.xlu0 %v2915_v2, %s3649_s26 }
 0x6bd   : > { %v2887_v47 = vpop.permute.xlu1 %2886  ;;  %v3221_v1 = vld.sshfl [vmem:[#allocation1 + $0x8] sm:$0xff pattern:$0x73625140]  ;;  %v3219_v29 = vld.sshfl [vmem:[#allocation1] sm:$0xff pattern:$0x73625140] }
 0x6be   : > { %v2890_v8 = vsel %vm292_vm0, %v2887_v47, %v2889_v44  ;;  %3229 = vst [vmem:[#allocation1 + $0x2] ss:$4 sm:$0xff] %v5618_v43 }
 0x6bf   : > { %3118 = vrot.lane.b32.xlu1 %v3114_v5, %s3646_s23  ;;  %v2921_v21 = vsel %vm448_vm3, %v2917_v61, %v2890_v8  ;;  %v2933_v63 = vpop.permute.xlu2 %2932 }
 0x6c0   : > { %3107 = vrot.lane.b32.xlu0 %v5594_v27, %s3645_s22  ;;  %2938 = vrot.lane.b32.xlu2 %v2921_v21, %s3649_s26  ;;  %v2923_v27 = vsel %vm448_vm3, %v2919_v40, %v2889_v44 }
 0x6c5   : > { %v3230_v5 = vld.sshfl [vmem:[#allocation1] sm:$0xff pattern:$0x73625140]  ;;  %v3232_v32 = vld.sshfl [vmem:[#allocation1 + $0x8] sm:$0xff pattern:$0x73625140] }
 0x6c6   : > { %3240 = vst [vmem:[#allocation1 + $0x3] ss:$4 sm:$0xff] %v5618_v43 }
 0x6c7   : > { %3131 = vrot.lane.b32.xlu1 %v3127_v26, %s3647_s24 }
 0x6c8   : > { %3120 = vrot.lane.b32.xlu0 %v3116_v20, %s3646_s23  ;;  %3142 = vrot.lane.b32.xlu2 %v3138_v58, %s3648_s25 }
 0x6cd   : > { %v3241_v20 = vld.sshfl [vmem:[#allocation1] sm:$0xff pattern:$0x73625140]  ;;  %v3243_v26 = vld.sshfl [vmem:[#allocation1 + $0x8] sm:$0xff pattern:$0x73625140] }
 0x6ce   : > { %3250 = vst [vmem:[#allocation1] ss:$4 sm:$0xff] %v5618_v43 }
 0x6cf   : > { %2940 = vrot.lane.b32.xlu1 %v2923_v27, %s3649_s26 }
 0x6d0   : > { %3140 = vrot.lane.b32.xlu0 %v3136_v52, %s3648_s25  ;;  %3194 = vrot.lane.b32.xlu2 %v3192_v59, %s3651_s28  ;;  %v3110_v46 = vpop.permute.xlu2 %3109 }
 0x6d7   : > { %3184 = vrot.lane.b32.xlu1 %v3180_v54, %s3643_s20  ;;  %v3251_v54 = vld.sshfl [vmem:[#allocation1] sm:$0xff pattern:$0x73625140] }
 0x6d8   : > { %3186 = vrot.lane.b32.xlu0 %v3182_v9, %s3643_s20  ;;  %3212 = vrot.lane.b32.xlu2 %v3208_v7, %s3653_s30  ;;  %v3253_v9 = vld.sshfl [vmem:[#allocation1 + $0x8] sm:$0xff pattern:$0x73625140] }
 0x6d9   : > { %3261 = vst [vmem:[#allocation1 + $0x1] ss:$4 sm:$0xff] %v5618_v43 }
 0x6df   : > { %3202 = vrot.lane.b32.xlu1 %v3198_v25, %s3652_s29 }
 0x6e0   : > { %3204 = vrot.lane.b32.xlu0 %v3200_v10, %s3652_s29  ;;  %3225 = vrot.lane.b32.xlu2 %v3221_v1, %s3654_s4  ;;  %v5672_v59 = vld.sshfl [vmem:[#allocation1] sm:$0xff pattern:$0x73625140]  ;;  %v5674_v25 = vld.sshfl [vmem:[#allocation1 + $0x8] sm:$0xff pattern:$0x73625140]  ;;  %v3130_v7 = vpop.permute.xlu2 %3129 }
 0x6e1   : > { %3265 = vst [vmem:[#allocation1 + $0x2] ss:$4 sm:$0xff] %v5618_v43  ;;  %v2931_v43 = vpop.permute.xlu0 %2930 }
 0x6e5   : > { %v2575_v51 = vpop.f32.mrf.mxu1 }
 0x6e6   : > { %v2579_v58 = vpack.c.bf16 %v2575_v51, %v2575_v51  ;;  %v2585_v42 = vmul.f32 %v4245_v24, %v2575_v51 }
 0x6e7   : > { %3214 = vrot.lane.b32.xlu1 %v3210_v37, %s3653_s30 }
 0x6e8   : > { %3223 = vrot.lane.b32.xlu0 %v3219_v29, %s3654_s4  ;;  %3559 = vst [vmem:[%s4216_s17 + $0x14] sm:$0xf] %v2579_v58  ;;  %v3266_v10 = vld.sshfl [vmem:[#allocation1] sm:$0xff pattern:$0x73625140]  ;;  %v2591_v56 = vmul.f32 %v2585_v42, %v2585_v42 }
 0x6e9   : > { %v3268_v37 = vld.sshfl [vmem:[#allocation1 + $0x8] sm:$0xff pattern:$0x73625140] }
 0x6ed   : > { %v2577_v52 = vpop.f32.mrf.mxu1 }
 0x6ef   : > { %3234 = vrot.lane.b32.xlu1 %v3230_v5, %s3655_s5 }
 0x6f0   : > { %3236 = vrot.lane.b32.xlu0 %v3232_v32, %s3655_s5 }
 0x6f8   : > { %3245 = vrot.lane.b32.xlu0 %v3241_v20, %s3656_s6 }
 0x700   : > { %3270 = vrot.lane.b32.xlu0 %v3266_v10, %s3643_s20 }
 0x708   : > { %3086 = vrot.lane.b32.xlu0 %v5584_v28, %s3643_s20 }
 0x709   : > { %2586 = vadd.xlane.f32.xlu2 %v2585_v42 }
 0x710   : > { %3099 = vrot.lane.b32.xlu0 %v5591_v30, %s3644_s21 }
 0x718   : > { %3039 = vrot.lane.b32.xlu0 %v5500_v4, %s3647_s24 }
 0x719   : > { %2592 = vadd.xlane.f32.xlu1 %v2591_v56 }
 0x71a   : > { %v2939_v44 = vpop.permute.xlu2 %2938 }
 0x721   : > { %3247 = vrot.lane.b32.xlu2 %v3243_v26, %s3656_s6 }
 0x722   : > { %v3143_v19 = vpop.permute.xlu2 %3142 }
 0x729   : > { %v2935_v31 = vpop.permute.xlu1 %2934  ;;  %3255 = vrot.lane.b32.xlu2 %v3251_v54, %s3657_s7 }
 0x72a   : > { %v2937_v2 = vpop.permute.xlu0 %2936  ;;  %v3195_v58 = vpop.permute.xlu2 %3194 }
 0x72b   : > { %v2943_v32 = vsel %vm363_vm10, %v2935_v31, %v2937_v2 }
 0x731   : > { %v3119_v28 = vpop.permute.xlu1 %3118  ;;  %3272 = vrot.lane.b32.xlu2 %v3268_v37, %s3643_s20 }
 0x732   : > { %v3108_v30 = vpop.permute.xlu0 %3107  ;;  %3257 = vrot.lane.b32.xlu1 %v3253_v9, %s3657_s7 }
 0x733   : > { %v3111_v8 = vsel %vm316_vm11, %v3108_v30, %v3110_v46 }
 0x739   : > { %v3132_v47 = vpop.permute.xlu1 %3131  ;;  %3071 = vrot.lane.b32.xlu2 %v5532_v55, %s3650_s27 }
 0x73a   : > { %v3133_v4 = vsel %vm339_vm14, %v3130_v7, %v3132_v47  ;;  %v3121_v61 = vpop.permute.xlu0 %3120  ;;  %3073 = vrot.lane.b32.xlu1 %v5534_v35, %s3650_s27 }
 0x73b   : > { %v3122_v21 = vsel %vm327_vm12, %v3119_v28, %v3121_v61 }
 0x73c   : > { %v3169_v38 = vsel %vm445_vm1, %v3111_v8, %v3122_v21 }
 0x73d   : > { %v3171_v1 = vsel %vm448_vm3, %v3169_v38, %v3133_v4 }
 0x741   : > { %v2941_v29 = vpop.permute.xlu1 %2940  ;;  %3088 = vrot.lane.b32.xlu2 %v5586_v3, %s3643_s20 }
 0x742   : > { %v3141_v55 = vpop.permute.xlu0 %3140  ;;  %3097 = vrot.lane.b32.xlu1 %v5589_v45, %s3644_s21  ;;  %v2944_v40 = vsel %vm363_vm10, %v2939_v44, %v2941_v29  ;;  %v2942_v45 = vsel %vm363_vm10, %v2931_v43, %v2933_v63 }
 0x743   : > { %v3144_v35 = vsel %vm351_vm15, %v3141_v55, %v3143_v19  ;;  %v2948_v27 = vsel %vm451_vm4, %v2944_v40, 0 }
 0x744   : > { %2951 = vmatpush.bf16.msrb.mxu2 %v2948_v27  ;;  %v5706_v5 = vsel %vm451_vm4, %v3171_v1, %v3144_v35 }
 0x748   : > { %2952 = vmatpush.bf16.msrb.mxu2 %v2943_v32 }
 0x749   : > { %v3185_v20 = vpop.permute.xlu1 %3184  ;;  %3028 = vrot.lane.b32.xlu2 %v5495_v36, %s3646_s23 }
 0x74a   : > { %v3187_v3 = vpop.permute.xlu0 %3186  ;;  %3030 = vrot.lane.b32.xlu1 %v5497_v34, %s3646_s23 }
 0x74b   : > { %v3278_v26 = vsel %vm445_vm1, %v5612_v33, %v3187_v3  ;;  %v3188_v52 = vsel %vm292_vm0, %v3185_v20, %v3187_v3 }
 0x74c   : > { %2953 = vmatpush.bf16.msrb.mxu2 %v2942_v45  ;;  %v3281_v34 = vsel %vm448_vm3, %v3278_v26, %v3195_v58 }
 0x750   : > { %2954 = vmatpush.bf16.msrb.mxu2 %v5527_v0  ;;  %v3276_v0 = vsel %vm445_vm1, %v5610_v53, %v3188_v52  ;;  %v3213_v53 = vpop.permute.xlu2 %3212 }
 0x751   : > { %v3203_v51 = vpop.permute.xlu1 %3202  ;;  %3041 = vrot.lane.b32.xlu2 %v5502_v17, %s3647_s24  ;;  %v3280_v17 = vsel %vm448_vm3, %v3276_v0, %v3195_v58 }
 0x752   : > { %v3205_v36 = vpop.permute.xlu0 %3204  ;;  %3050 = vrot.lane.b32.xlu1 %v5506_v15, %s3648_s25  ;;  %v3283_v9 = vsel %vm451_vm4, %v3280_v17, %v3203_v51 }
 0x753   : > { %v3206_v54 = vsel %vm5992_vm2, %v3203_v51, %v3205_v36  ;;  %vm6004_vm2 = vcmask 867328  }
 0x754   : > { %2955 = vmatpush.bf16.msrb.mxu2 %v5467_v39  ;;  %v3285_v33 = vsel %vm451_vm4, %v3281_v34, %v3206_v54 }
 0x755   : > { %3316 = vrot.lane.b32.xlu0 %v3285_v33, %s3649_s26 }
 0x758   : > { %2956 = vmatpush.bf16.msrb.mxu2 %v5435_v13  ;;  %v3226_v46 = vpop.permute.xlu2 %3225 }
 0x759   : > { %v3215_v10 = vpop.permute.xlu1 %3214 }
 0x75a   : > { %v3224_v15 = vpop.permute.xlu0 %3223  ;;  %3314 = vrot.lane.b32.xlu1 %v3283_v9, %s3649_s26  ;;  %v3216_v2 = vsel %vm6002_vm5, %v3213_v53, %v3215_v10 }
 0x75b   : > { %v3288_v56 = vsel %vm445_vm1, %v3213_v53, %v3224_v15 }
 0x75c   : > { %2957 = vmatpush.bf16.msrb.mxu2 %v5425_v22 }
 0x75f   : > { %3563 = vmatmul.msk.bf16.vlgmr.msrb.gmra.mxu2 %vm351_vm15, %v5336_v41  ;;  %v3227_v41 = vsel %vm6003_vm6, %v3224_v15, %v3226_v46 }
 0x760   : > { %v3291_v37 = vsel %vm445_vm1, %v3216_v2, %v3227_v41 }
 0x761   : > { %v3235_v42 = vpop.permute.xlu1 %3234 }
 0x762   : > { %v3237_v39 = vpop.permute.xlu0 %3236  ;;  %v3293_v63 = vsel %vm448_vm3, %v3288_v56, %v3235_v42 }
 0x763   : > { %v3238_v7 = vsel %vm5999_vm7, %v3235_v42, %v3237_v39 }
 0x764   : > { %v3295_v30 = vsel %vm448_vm3, %v3291_v37, %v3238_v7 }
 0x76a   : > { %v3246_v43 = vpop.permute.xlu0 %3245 }
 0x76b   : > { %v3297_v13 = vsel %vm451_vm4, %v3293_v63, %v3246_v43 }
 0x76c   : > { %3318 = vrot.lane.b32.xlu2 %v3297_v13, %s3649_s26 }
 0x772   : > { %v3271_v8 = vpop.permute.xlu0 %3270 }
 0x77a   : > { %v3087_v55 = vpop.permute.xlu0 %3086 }
 0x77c   : > { %v2587_v31 = vpop.xlane.xlu2 %2586 }
 0x77d   : > { %v5741_v22 = vadd.f32 %v2587_v31, %v5602_v57 }
 0x784   : > { %v3248_v28 = vpop.permute.xlu2 %3247 }
 0x785   : > { %v3249_v44 = vsel %vm6000_vm8, %v3246_v43, %v3248_v28 }
 0x786   : > { %v3299_v47 = vsel %vm451_vm4, %v3295_v30, %v3249_v44 }
 0x787   : > { %3320 = vrot.lane.b32.xlu1 %v3299_v47, %s3649_s26 }
 0x78c   : > { %v2593_v4 = vpop.xlane.xlu1 %2592  ;;  %v3256_v57 = vpop.permute.xlu2 %3255 }
 0x78d   : > { %v5752_v61 = vadd.f32 %v2593_v4, %v5620_v49  ;;  %v3301_v38 = vsel %vm445_vm1, %v3256_v57, %v5672_v59 }
 0x78f   : > { %3063 = vrot.lane.b32.xlu1 %v5519_v14, %s3649_s26 }
 0x794   : > { %v3273_v21 = vpop.permute.xlu2 %3272 }
 0x795   : > { %v3274_v1 = vsel %vm292_vm0, %v3271_v8, %v3273_v21 }
 0x796   : > { %v3305_v29 = vsel %vm448_vm3, %v3301_v38, %v3274_v1  ;;  %v3618_v1 = vld [vmem:[%s5834_s1] sm:$0xf] }
 0x797   : > { %3322 = vrot.lane.b32.xlu0 %v3305_v29, %s3649_s26  ;;  %3007 = vrot.lane.b32.xlu1 %v5485_v50, %s3644_s21 }
 0x79c   : > { %v3072_v50 = vpop.permute.xlu2 %3071 }
 0x79f   : > { %3052 = vrot.lane.b32.xlu0 %v5508_v11, %s3648_s25  ;;  %3020 = vrot.lane.b32.xlu1 %v5492_v12, %s3645_s22 }
 0x7a4   : > { %v3258_v14 = vpop.permute.xlu1 %3257  ;;  %v3089_v11 = vpop.permute.xlu2 %3088 }
 0x7a5   : > { %v3259_v49 = vsel %vm6001_vm9, %v3256_v57, %v3258_v14  ;;  %v3090_v56 = vsel %vm292_vm0, %v3087_v55, %v3089_v11 }
 0x7a6   : > { %v3303_v59 = vsel %vm445_vm1, %v3259_v49, %v5674_v25 }
 0x7a7   : > { %2996 = vrot.lane.b32.xlu0 %v5476_v6, %s3643_s20  ;;  %v3307_v19 = vsel %vm448_vm3, %v3303_v59, %v3273_v21 }
 0x7a8   : > { %3324 = vrot.lane.b32.xlu2 %v3307_v19, %s3649_s26 }
 0x7ac   : > { %v3074_v12 = vpop.permute.xlu1 %3073  ;;  %v3029_v27 = vpop.permute.xlu2 %3028 }
 0x7ad   : > { %v3075_v15 = vsel %vm6004_vm2, %v3072_v50, %v3074_v12 }
 0x7ae   : > { %v3161_v53 = vsel %vm445_vm1, %v3075_v15, %v5563_v62 }
 0x7af   : > { %3009 = vrot.lane.b32.xlu0 %v5487_v18, %s3644_s21  ;;  %v3163_v46 = vsel %vm448_vm3, %v3161_v53, %v3090_v56  ;;  %s3573_s21 = sshll.u32 %s6012_s12, 4 }
 0x7b0   : > { %3061 = vrot.lane.b32.xlu2 %v5517_v48, %s3649_s26  ;;  %s216_s24 = scalar_lea.vmem %s5836_s3, %s3573_s21 }
 0x7b4   : > { %v3098_v6 = vpop.permute.xlu1 %3097  ;;  %v3042_v20 = vpop.permute.xlu2 %3041 }
 0x7b8   : > { %2998 = vrot.lane.b32.xlu2 %v5478_v60, %s3643_s20  ;;  %v3100_v60 = vpop.permute.xlu0 %3099 }
 0x7b9   : > { %v3101_v63 = vsel %vm304_vm13, %v3098_v6, %v3100_v60 }
 0x7ba   : > { %v3165_v7 = vsel %vm451_vm4, %v3163_v46, %v3101_v63 }
 0x7bc   : > { %v3031_v48 = vpop.permute.xlu1 %3030 }
 0x7bd   : > { %v3032_v43 = vsel %vm327_vm12, %v3029_v27, %v3031_v48 }
 0x7c0   : > { %3018 = vrot.lane.b32.xlu2 %v5490_v23, %s3645_s22  ;;  %v3040_v23 = vpop.permute.xlu0 %3039 }
 0x7c1   : > { %v3043_v13 = vsel %vm339_vm14, %v3040_v23, %v3042_v20 }
 0x7c2   : > { %v3154_v41 = vsel %vm445_vm1, %v3032_v43, %v3043_v13 }
 0x7c4   : > { %v3051_v3 = vpop.permute.xlu1 %3050 }
 0x7c6   : > { %v3319_v45 = vpop.permute.xlu2 %3318 }
 0x7c8   : > { %v3317_v51 = vpop.permute.xlu0 %3316 }
 0x7cc   : > { %v3315_v26 = vpop.permute.xlu1 %3314 }
 0x7cd   : > { %v3326_v10 = vsel %vm363_vm10, %v3315_v26, %v3317_v51 }
 0x7e2   : > { %v2959_v25 = vpop.f32.mrf.mxu2 }
 0x7e3   : > { %v2963_v40 = vpack.c.bf16 %v2959_v25, %v2959_v25  ;;  %v2969_v35 = vmul.f32 %v4245_v24, %v2959_v25 }
 0x7e5   : > { %3564 = vst [vmem:[%s4216_s17 + $0x18] sm:$0xf] %v2963_v40  ;;  %v2975_v18 = vmul.f32 %v2969_v35, %v2969_v35  ;;  %2970 = vadd.xlane.f32.xlu0 %v2969_v35 }
 0x7e9   : > { %2976 = vadd.xlane.f32.xlu2 %v2975_v18 }
 0x7ea   : > { %v2961_v32 = vpop.f32.mrf.mxu2 }
 0x7f9   : > { %v3321_v58 = vpop.permute.xlu1 %3320 }
 0x7fa   : > { %v3327_v17 = vsel %vm363_vm10, %v3319_v45, %v3321_v58 }
 0x801   : > { %v3064_v33 = vpop.permute.xlu1 %3063 }
 0x802   : > { %v3325_v52 = vpop.permute.xlu2 %3324 }
 0x809   : > { %v3323_v36 = vpop.permute.xlu0 %3322  ;;  %v3008_v42 = vpop.permute.xlu1 %3007 }
 0x80a   : > { %v3328_v34 = vsel %vm363_vm10, %v3323_v36, %v3325_v52  ;;  %v3062_v54 = vpop.permute.xlu2 %3061 }
 0x80b   : > { %v3332_v0 = vsel %vm451_vm4, %v3328_v34, 0  ;;  %v3065_v62 = vsel %vm363_vm10, %v3062_v54, %v3064_v33 }
 0x80c   : > { %3335 = vmatpush.bf16.msrb.mxu3 %v3332_v0 }
 0x810   : > { %3336 = vmatpush.bf16.msrb.mxu3 %v3327_v17 }
 0x811   : > { %v3053_v9 = vpop.permute.xlu0 %3052  ;;  %v3021_v28 = vpop.permute.xlu1 %3020 }
 0x812   : > { %v2999_v39 = vpop.permute.xlu2 %2998  ;;  %v3054_v31 = vsel %vm351_vm15, %v3051_v3, %v3053_v9 }
 0x813   : > { %v3156_v37 = vsel %vm448_vm3, %v3154_v41, %v3054_v31 }
 0x814   : > { %3337 = vmatpush.bf16.msrb.mxu3 %v3326_v10 }
 0x818   : > { %3338 = vmatpush.bf16.msrb.mxu3 %v5706_v5  ;;  %v3158_v5 = vsel %vm451_vm4, %v3156_v37, %v3065_v62 }
 0x819   : > { %v2997_v2 = vpop.permute.xlu0 %2996 }
 0x81a   : > { %v3019_v30 = vpop.permute.xlu2 %3018  ;;  %v3000_v44 = vsel %vm292_vm0, %v2997_v2, %v2999_v39  ;;  %vm6005_vm0 = vmmov %vm6001_vm9 }
 0x81b   : > { %v3022_v4 = vsel %vm316_vm11, %v3019_v30, %v3021_v28  ;;  %v3146_v57 = vsel %vm445_vm1, %v5470_v16, %v3000_v44  ;;  %vm6006_vm1 = vmmov %vm6005_vm0 }
 0x81c   : > { %3339 = vmatpush.bf16.msrb.mxu3 %v3165_v7 }
 0x820   : > { %3340 = vmatpush.bf16.msrb.mxu3 %v3158_v5 }
 0x821   : > { %v3010_v47 = vpop.permute.xlu0 %3009 }
 0x822   : > { %v3011_v8 = vsel %vm304_vm13, %v3008_v42, %v3010_v47 }
 0x823   : > { %v3148_v21 = vsel %vm448_vm3, %v3146_v57, %v3011_v8 }
 0x824   : > { %v3150_v38 = vsel %vm451_vm4, %v3148_v21, %v3022_v4 }
 0x825   : > { %3341 = vmatpush.bf16.msrb.mxu3 %v3150_v38 }
 0x828   : > { %3568 = vmatmul.msk.bf16.vlgmr.msrb.gmra.mxu3 %vm351_vm15, %v3618_v1 }
 0x858   : > { %v2971_v19 = vpop.xlane.xlu0 %2970 }
 0x859   : > { %v2974_v12 = vadd.f32 %v2971_v19, %v5741_v22 }
 0x85c   : > { %v2977_v50 = vpop.xlane.xlu2 %2976 }
 0x85d   : > { %v2979_v6 = vadd.f32 %v2977_v50, %v5752_v61 }
 0x8ab   : > { %v3343_v29 = vpop.f32.mrf.mxu3 }
 0x8ac   : > { %v3347_v14 = vpack.c.bf16 %v3343_v29, %v3343_v29  ;;  %v3353_v49 = vmul.f32 %v4245_v24, %v3343_v29 }
 0x8ae   : > { %3569 = vst [vmem:[%s4216_s17 + $0x1c] sm:$0xf] %v3347_v14  ;;  %v3359_v16 = vmul.f32 %v3353_v49, %v3353_v49  ;;  %3354 = vadd.xlane.f32.xlu1 %v3353_v49 }
 0x8b0   : > { %3360 = vadd.xlane.f32.xlu0 %v3359_v16 }
 0x8b3   : > { %v3345_v59 = vpop.f32.mrf.mxu3 }
 0x921   : > { %v3355_v11 = vpop.xlane.xlu1 %3354 }
 0x922   : > { %v3358_v25 = vadd.f32 %v3355_v11, %v2974_v12 }
 0x923   : > { %v3361_v55 = vpop.xlane.xlu0 %3360 }
 0x924   : > { %3365 = vst.msk [vmem:[%s216_s24] sm:$0xff] %vm6005_vm0, %v3358_v25  ;;  %v3363_v24 = vadd.f32 %v3361_v55, %v2979_v6 }
 0x926   : > { %3366 = vst.msk [vmem:[%s216_s24 + $0x8] sm:$0xff] %vm6006_vm1, %v3363_v24 }
 0x927 PF: > { %s14_s14 = sadd.s32 1, %s3641_s14   ;;  %s6007_s12 = smov %s3637_s13 }
 0x928   : > { %p11_p5 = scmp.ge.s32.totalorder %s14_s14, 4   ;;  %s6008_s13 = smov %s6010_s15 }
 0x92a   :  { %13 = sbr.rel (!%p11_p5) target bundleno = 2 (0x2), region = 247 }

</bundles_post_ra>
